<compile_context>
chip_gen: v7x
topology: tpu7x:2x2x1
jax: 0.10.0
libtpu: 0.0.40
codegen_flags: <defaults>
</compile_context>

<pallas_src>
import jax
import jax.numpy as jnp
from jax import lax
from jax.experimental import pallas as pl
from jax.experimental.pallas import tpu as pltpu

EPS = 1e-5

# Row-tile cap (multiple of 8).  512 rows keeps mem-bound kernels near the HBM
# roofline while the per-buffer footprint stays modest even at ResNet-scale
# channel counts (512 * 2048ch * 4B = 4 MiB).
ROW_TILE_CAP = 512


def _vmem_limit_bytes():
    """Scoped VMEM budget derived from the actual chip (v7x has only 64 MiB)."""
    cap = 64 * 1024 * 1024
    try:
        info_cap = int(pltpu.get_tpu_info().vmem_capacity_bytes)
        if info_cap > 0:
            cap = info_cap
    except Exception:
        pass
    return max(32 * 1024 * 1024, min(cap * 3 // 4, 100 * 1024 * 1024))


VMEM_LIMIT = _vmem_limit_bytes()


def _row_tile(rows, cap=ROW_TILE_CAP):
    """Largest divisor of `rows` that is a multiple of 8 and <= cap."""
    for t in range(min(cap, rows), 7, -1):
        if rows % t == 0 and t % 8 == 0:
            return t
    return rows                      # full-array block (always a legal BlockSpec)


def _bn_scale_shift(stats, gamma, beta, inv_count):
    """Fold global [sum; sumsq] + affine params into per-channel scale/shift."""
    mean = stats[0:1, :] * inv_count
    var = jnp.maximum(stats[1:2, :] * inv_count - mean * mean, 0.0)
    scale = gamma * lax.rsqrt(var + EPS)
    shift = beta - mean * scale
    return scale, shift


# --------------------------------------------------------------------------- #
# pass 0: per-channel [sum; sum of squares] partials (global BN1 stats)
# --------------------------------------------------------------------------- #
def _channel_sums(x2, tile_cap=ROW_TILE_CAP):
    R, C = x2.shape
    tr = _row_tile(R, tile_cap)
    nt = R // tr

    def kernel(x_ref, s_ref):
        xb = x_ref[...].astype(jnp.float32)
        s_ref[...] = jnp.concatenate(
            [jnp.sum(xb, axis=0, keepdims=True),
             jnp.sum(xb * xb, axis=0, keepdims=True)], axis=0)[None]

    partials = pl.pallas_call(
        kernel,
        out_shape=jax.ShapeDtypeStruct((nt, 2, C), jnp.float32),
        grid=(nt,),
        in_specs=[pl.BlockSpec((tr, C), lambda i: (i, 0))],
        out_specs=pl.BlockSpec((1, 2, C), lambda i: (i, 0, 0)),
        compiler_params=pltpu.CompilerParams(
            dimension_semantics=("parallel",),           # per-tile partial stats
            vmem_limit_bytes=VMEM_LIMIT),
        cost_estimate=pl.CostEstimate(
            flops=3 * R * C, transcendentals=0,
            bytes_accessed=x2.dtype.itemsize * R * C + 8 * nt * C),
    )(x2)
    return jnp.sum(partials, axis=0)                     # (2, C) global stats


# --------------------------------------------------------------------------- #
# stage 1: bn1 -> relu -> conv1 (1x1); bf16 output + fused bn2 partial stats
# --------------------------------------------------------------------------- #
def _stage1_conv1(x2, stats_x, g1, b1, w1, tile_cap=ROW_TILE_CAP):
    R, C_in = x2.shape
    C_res = w1.shape[1]
    tr = _row_tile(R, tile_cap)
    nt = R // tr
    inv_r = 1.0 / float(R)

    def kernel(x_ref, sx_ref, g_ref, b_ref, w_ref, t_ref, st_ref):
        scale, shift = _bn_scale_shift(sx_ref[...], g_ref[...], b_ref[...], inv_r)
        a = jnp.maximum(x_ref[...] * scale + shift, 0.0)
        t = jnp.dot(a.astype(jnp.bfloat16), w_ref[...],       # bf16 MXU operands
                    preferred_element_type=jnp.float32)
        t_ref[...] = t.astype(jnp.bfloat16)                   # bf16 inter-stage
        st_ref[...] = jnp.concatenate(                        # f32 partial stats
            [jnp.sum(t, axis=0, keepdims=True),
             jnp.sum(t * t, axis=0, keepdims=True)], axis=0)[None]

    t1, partials = pl.pallas_call(
        kernel,
        out_shape=(jax.ShapeDtypeStruct((R, C_res), jnp.bfloat16),
                   jax.ShapeDtypeStruct((nt, 2, C_res), jnp.float32)),
        grid=(nt,),
        in_specs=[pl.BlockSpec((tr, C_in), lambda i: (i, 0)),
                  pl.BlockSpec((2, C_in), lambda i: (0, 0)),
                  pl.BlockSpec((1, C_in), lambda i: (0, 0)),
                  pl.BlockSpec((1, C_in), lambda i: (0, 0)),
                  pl.BlockSpec((C_in, C_res), lambda i: (0, 0))],
        out_specs=(pl.BlockSpec((tr, C_res), lambda i: (i, 0)),
                   pl.BlockSpec((1, 2, C_res), lambda i: (i, 0, 0))),
        compiler_params=pltpu.CompilerParams(
            dimension_semantics=("parallel",),
            vmem_limit_bytes=VMEM_LIMIT),
        cost_estimate=pl.CostEstimate(
            flops=2 * R * C_in * C_res + 10 * R * C_in,
            transcendentals=0,
            bytes_accessed=4 * R * C_in + 2 * R * C_res),
    )(x2, stats_x, g1, b1, w1)
    return t1, jnp.sum(partials, axis=0)


# --------------------------------------------------------------------------- #
# stage 2: bn2 -> relu -> zero-pad -> conv2 (3x3) as nine accumulating matmuls;
#          bf16 output + fused (stride-masked) bn3 partial stats
# --------------------------------------------------------------------------- #
def _stage2_conv3x3(t1, stats_t1, g2, b2, w2col, mask, N, H, W):
    C_res = t1.shape[1]
    R = N * H * W
    HW = H * W
    inv_r = 1.0 / float(R)

    def kernel(t_ref, st_ref, g_ref, b_ref, w_ref, m_ref, o_ref, so_ref):
        scale, shift = _bn_scale_shift(st_ref[...], g_ref[...], b_ref[...], inv_r)
        a = jnp.maximum(t_ref[...].astype(jnp.float32) * scale + shift, 0.0)
        a3 = a.reshape(H, W, C_res)
        # zero padding via concatenation (cheap, per-image)
        zc = jnp.zeros((H, 1, C_res), jnp.float32)
        zr = jnp.zeros((1, W + 2, C_res), jnp.float32)
        padded = jnp.concatenate(
            [zr, jnp.concatenate([zc, a3, zc], axis=1), zr], axis=0)   # (H+2,W+2,C)
        # three dx-shifted sheets, cast to bf16 ONCE; dy shifts are free
        # leading-axis offsets.  No (HW, 9*C) im2col slab is materialized.
        sheets = [padded[:, dx:dx + W, :].astype(jnp.bfloat16) for dx in range(3)]
        acc = jnp.zeros((HW, C_res), jnp.float32)
        for dy in range(3):
            for dx in range(3):
                tap = sheets[dx][dy:dy + H].reshape(HW, C_res)
                acc = acc + jnp.dot(
                    tap, w_ref[pl.ds((dy * 3 + dx) * C_res, C_res), :],
                    preferred_element_type=jnp.float32)
        o_ref[...] = acc.astype(jnp.bfloat16)                 # bf16 inter-stage
        # bn3 statistics over the stride-S output positions only (fused pass)
        m = m_ref[...]                                        # (HW, 1) {0,1} f32
        so_ref[...] = jnp.concatenate(
            [jnp.sum(acc * m, axis=0, keepdims=True),
             jnp.sum((acc * acc) * m, axis=0, keepdims=True)], axis=0)[None]

    t2_full, partials = pl.pallas_call(
        kernel,
        out_shape=(jax.ShapeDtypeStruct((R, C_res), jnp.bfloat16),
                   jax.ShapeDtypeStruct((N, 2, C_res), jnp.float32)),
        grid=(N,),
        in_specs=[pl.BlockSpec((HW, C_res), lambda n: (n, 0)),
                  pl.BlockSpec((2, C_res), lambda n: (0, 0)),
                  pl.BlockSpec((1, C_res), lambda n: (0, 0)),
                  pl.BlockSpec((1, C_res), lambda n: (0, 0)),
                  pl.BlockSpec((9 * C_res, C_res), lambda n: (0, 0)),
                  pl.BlockSpec((HW, 1), lambda n: (0, 0))],
        out_specs=(pl.BlockSpec((HW, C_res), lambda n: (n, 0)),
                   pl.BlockSpec((1, 2, C_res), lambda n: (n, 0, 0))),
        compiler_params=pltpu.CompilerParams(
            dimension_semantics=("parallel",),               # images independent
            vmem_limit_bytes=VMEM_LIMIT),
        cost_estimate=pl.CostEstimate(
            flops=2 * R * 9 * C_res * C_res + 16 * R * C_res,
            transcendentals=0,
            bytes_accessed=4 * R * C_res + 18 * C_res * C_res),
    )(t1, stats_t1, g2, b2, w2col, mask)
    return t2_full, jnp.sum(partials, axis=0)


# --------------------------------------------------------------------------- #
# stage 3: bn3 -> relu -> conv3 (1x1) + shortcut (conv0 1x1 or identity) add
# --------------------------------------------------------------------------- #
def _stage3_conv1x1_add(t2, stats_t2, g3, b3, w3, xs, w0, tile_cap=ROW_TILE_CAP):
    Ro, C_res = t2.shape
    C_out = w3.shape[1]
    C_in = xs.shape[1]
    conv0_present = w0 is not None
    tr = _row_tile(Ro, tile_cap)
    inv_r = 1.0 / float(Ro)

    def kernel(*refs):
        if conv0_present:
            t_ref, st_ref, g_ref, b_ref, w3_ref, xs_ref, w0_ref, o_ref = refs
        else:
            t_ref, st_ref, g_ref, b_ref, w3_ref, xs_ref, o_ref = refs
        scale, shift = _bn_scale_shift(st_ref[...], g_ref[...], b_ref[...], inv_r)
        a = jnp.maximum(t_ref[...].astype(jnp.float32) * scale + shift, 0.0)
        res = jnp.dot(a.astype(jnp.bfloat16), w3_ref[...],
                      preferred_element_type=jnp.float32)
        if conv0_present:
            sc = jnp.dot(xs_ref[...].astype(jnp.bfloat16), w0_ref[...],
                         preferred_element_type=jnp.float32)
        else:
            sc = xs_ref[...]                                   # identity shortcut
        o_ref[...] = sc + res

    in_specs = [pl.BlockSpec((tr, C_res), lambda i: (i, 0)),
                pl.BlockSpec((2, C_res), lambda i: (0, 0)),
                pl.BlockSpec((1, C_res), lambda i: (0, 0)),
                pl.BlockSpec((1, C_res), lambda i: (0, 0)),
                pl.BlockSpec((C_res, C_out), lambda i: (0, 0)),
                pl.BlockSpec((tr, C_in), lambda i: (i, 0))]
    args = [t2, stats_t2, g3, b3, w3, xs]
    flops = 2 * Ro * C_res * C_out + 10 * Ro * C_res
    if conv0_present:
        in_specs.append(pl.BlockSpec((C_in, C_out), lambda i: (0, 0)))
        args.append(w0)
        flops += 2 * Ro * C_in * C_out

    return pl.pallas_call(
        kernel,
        out_shape=jax.ShapeDtypeStruct((Ro, C_out), jnp.float32),
        grid=(Ro // tr,),
        in_specs=in_specs,
        out_specs=pl.BlockSpec((tr, C_out), lambda i: (i, 0)),
        compiler_params=pltpu.CompilerParams(
            dimension_semantics=("parallel",),
            vmem_limit_bytes=VMEM_LIMIT),
        cost_estimate=pl.CostEstimate(
            flops=flops, transcendentals=0,
            bytes_accessed=2 * Ro * C_res + 4 * Ro * (C_in + C_out)),
    )(*args)


# --------------------------------------------------------------------------- #
# wrapper: NCHW in / NCHW out
# --------------------------------------------------------------------------- #
def resnetv2_bottleneck_forward(x_nchw, params, S):
    N, C_in, H, W = x_nchw.shape
    C_res = params["conv1_w"].shape[0]
    C_out = params["conv3_w"].shape[0]
    conv0_present = (C_in != C_out) or (S > 1)
    Ho = (H - 1) // S + 1
    Wo = (W - 1) // S + 1
    R, Ro = N * H * W, N * Ho * Wo
    assert (H * W) % 8 == 0, "H*W must be sublane (8) aligned"

    # layout glue: NCHW -> NHWC -> (rows, channels)  (channels on the lane axis)
    x_nhwc = jnp.transpose(x_nchw, (0, 2, 3, 1)).astype(jnp.float32)
    x2 = x_nhwc.reshape(R, C_in)

    # weights -> matmul layout; bf16 MXU operands (f32 accumulation in-kernel)
    w1 = jnp.transpose(params["conv1_w"][:, :, 0, 0]).astype(jnp.bfloat16)
    w2col = jnp.transpose(params["conv2_w"], (2, 3, 1, 0)
                          ).reshape(9 * C_res, C_res).astype(jnp.bfloat16)
    w3 = jnp.transpose(params["conv3_w"][:, :, 0, 0]).astype(jnp.bfloat16)
    w0 = None
    if conv0_present:
        w0 = jnp.transpose(params["conv0_w"][:, :, 0, 0]).astype(jnp.bfloat16)

    g1 = params["bn1_g"].reshape(1, C_in).astype(jnp.float32)
    b1 = params["bn1_b"].reshape(1, C_in).astype(jnp.float32)
    g2 = params["bn2_g"].reshape(1, C_res).astype(jnp.float32)
    b2 = params["bn2_b"].reshape(1, C_res).astype(jnp.float32)
    g3 = params["bn3_g"].reshape(1, C_res).astype(jnp.float32)
    b3 = params["bn3_b"].reshape(1, C_res).astype(jnp.float32)

    # mask of stride-S output positions within one HxW image (same for all N)
    mh = (jnp.arange(H) % S) == 0
    mw = (jnp.arange(W) % S) == 0
    mask = (mh[:, None] & mw[None, :]).astype(jnp.float32).reshape(H * W, 1)

    # pass 0: global bn1 batch statistics
    stats_x = _channel_sums(x2)

    # stage 1: bn1 -> relu -> conv1 (1x1), fused bn2-stat partials, bf16 t1
    t1, stats_t1 = _stage1_conv1(x2, stats_x, g1, b1, w1)

    # stage 2: bn2 -> relu -> pad -> conv2 (3x3), fused stride-masked bn3 stats
    t2_full, stats_t2 = _stage2_conv3x3(t1, stats_t1, g2, b2, w2col, mask, N, H, W)

    # spatial stride: strided slice (pure layout glue on bf16), NOT a matmul
    if S > 1:
        t2 = t2_full.reshape(N, H, W, C_res)[:, ::S, ::S, :].reshape(Ro, C_res)
        xs = x_nhwc[:, ::S, ::S, :].reshape(Ro, C_in)
    else:
        t2 = t2_full
        xs = x2

    # stage 3: bn3 -> relu -> conv3 (1x1) + shortcut add
    out2 = _stage3_conv1x1_add(t2, stats_t2, g3, b3, w3, xs, w0)

    # (rows, C_out) -> NHWC -> NCHW
    return jnp.transpose(out2.reshape(N, Ho, Wo, C_out), (0, 3, 1, 2))


# --------------------------------------------------------------------------- #
# parameters + pure-JAX reference (mirrors the PyTorch module, training mode)
# --------------------------------------------------------------------------- #
def init_params(key, C_in, C_res, C_out, S):
    ks = jax.random.split(key, 10)
    p = {
        "bn1_g": jax.random.uniform(ks[0], (C_in,), jnp.float32, 0.5, 1.5),
        "bn1_b": 0.1 * jax.random.normal(ks[1], (C_in,), jnp.float32),
        "conv1_w": jax.random.normal(ks[2], (C_res, C_in, 1, 1), jnp.float32)
                   / jnp.sqrt(C_in),
        "bn2_g": jax.random.uniform(ks[3], (C_res,), jnp.float32, 0.5, 1.5),
        "bn2_b": 0.1 * jax.random.normal(ks[4], (C_res,), jnp.float32),
        "conv2_w": jax.random.normal(ks[5], (C_res, C_res, 3, 3), jnp.float32)
                   / jnp.sqrt(9.0 * C_res),
        "bn3_g": jax.random.uniform(ks[6], (C_res,), jnp.float32, 0.5, 1.5),
        "bn3_b": 0.1 * jax.random.normal(ks[7], (C_res,), jnp.float32),
        "conv3_w": jax.random.normal(ks[8], (C_out, C_res, 1, 1), jnp.float32)
                   / jnp.sqrt(C_res),
    }
    if (C_in != C_out) or (S > 1):
        p["conv0_w"] = jax.random.normal(ks[9], (C_out, C_in, 1, 1),
                                         jnp.float32) / jnp.sqrt(C_in)
    return p


def reference_forward(x, p, S):
    def bn(x, g, b):
        m = jnp.mean(x, axis=(0, 2, 3), keepdims=True)
        v = jnp.mean(x * x, axis=(0, 2, 3), keepdims=True) - m * m
        return ((x - m) / jnp.sqrt(v + EPS) * g.reshape(1, -1, 1, 1)
                + b.reshape(1, -1, 1, 1))

    dn = ("NCHW", "OIHW", "NCHW")
    r = jax.nn.relu(bn(x, p["bn1_g"], p["bn1_b"]))
    r = lax.conv_general_dilated(r, p["conv1_w"], (1, 1),
                                 [(0, 0), (0, 0)], dimension_numbers=dn)
    r = jax.nn.relu(bn(r, p["bn2_g"], p["bn2_b"]))
    r = lax.conv_general_dilated(r, p["conv2_w"], (S, S),
                                 [(1, 1), (1, 1)], dimension_numbers=dn)
    r = jax.nn.relu(bn(r, p["bn3_g"], p["bn3_b"]))
    r = lax.conv_general_dilated(r, p["conv3_w"], (1, 1),
                                 [(0, 0), (0, 0)], dimension_numbers=dn)
    if "conv0_w" in p:
        x = lax.conv_general_dilated(x, p["conv0_w"], (S, S),
                                     [(0, 0), (0, 0)], dimension_numbers=dn)
    return x + r


if __name__ == "__main__":
    key = jax.random.PRNGKey(0)
    kx, kp = jax.random.split(key)

    # small but representative config: downsampling bottleneck (conv0 + stride 2)
    N, C_in, C_res, C_out, H, W, S = 2, 16, 8, 32, 16, 16, 2

    x = jax.random.normal(kx, (N, C_in, H, W), jnp.float32)
    params = init_params(kp, C_in, C_res, C_out, S)

    fwd = jax.jit(resnetv2_bottleneck_forward, static_argnums=2)
    out = jax.block_until_ready(fwd(x, params, S))

    ref = jax.block_until_ready(reference_forward(x, params, S))
    assert out.shape == ref.shape, (out.shape, ref.shape)
    err = float(jnp.max(jnp.abs(out - ref)))
    rel = err / (float(jnp.max(jnp.abs(ref))) + 1e-6)
    # bf16 MXU operands + bf16 inter-stage activations -> compare relative to
    # the output scale
    if rel > 5e-2:
        raise AssertionError(
            f"kernel/reference mismatch: max abs err {err:.4e} (rel {rel:.4e})")

    print("KERNEL_OK")
</pallas_src>

<mosaic_0001>
module attributes {stable_mosaic.version = 11 : i64} {
  func.func @kernel(%arg0: i32, %arg1: memref<512x16xf32, #tpu.memory_space<vmem>>, %arg2: memref<1x2x16xf32, #tpu.memory_space<vmem>>) attributes {dimension_semantics = [#tpu.dimension_semantics<parallel>], iteration_bounds = array<i64: 1>, scalar_prefetch = 0 : i64, scratch_operands = 0 : i64, tpu.core_type = #tpu.core_type<tc>, window_params = [{transform_indices = @transform_0, window_bounds = array<i64: 512, 16>}, {transform_indices = @transform_1, window_bounds = array<i64: 1, 2, 16>}]} {
    %c0 = arith.constant 0 : index
    %c0_0 = arith.constant 0 : index
    %0 = vector.load %arg1[%c0, %c0_0] : memref<512x16xf32, #tpu.memory_space<vmem>>, vector<512x16xf32>
    %cst = arith.constant dense<0.000000e+00> : vector<16xf32>
    %1 = vector.multi_reduction <add>, %0, %cst [0] : vector<512x16xf32> to vector<16xf32>
    %2 = vector.shape_cast %1 : vector<16xf32> to vector<1x16xf32>
    %3 = arith.mulf %0, %0 : vector<512x16xf32>
    %cst_1 = arith.constant dense<0.000000e+00> : vector<16xf32>
    %4 = vector.multi_reduction <add>, %3, %cst_1 [0] : vector<512x16xf32> to vector<16xf32>
    %5 = vector.shape_cast %4 : vector<16xf32> to vector<1x16xf32>
    %6 = tpu.concatenate %2, %5 in 0 : vector<1x16xf32>, vector<1x16xf32> -> vector<2x16xf32>
    %7 = vector.shape_cast %6 : vector<2x16xf32> to vector<1x2x16xf32>
    %c0_2 = arith.constant 0 : index
    %c0_3 = arith.constant 0 : index
    %c0_4 = arith.constant 0 : index
    %8 = vector.load %arg2[%c0_2, %c0_3, %c0_4] : memref<1x2x16xf32, #tpu.memory_space<vmem>>, vector<1x2x16xf32>
    tpu.vector_store %arg2[%c0_2, %c0_3, %c0_4], %7 {strides = array<i32>} : memref<1x2x16xf32, #tpu.memory_space<vmem>>, vector<1x2x16xf32>,
    return
  }
  func.func @transform_0(%arg0: i32) -> (i32, i32) {
    %c0_i32 = arith.constant 0 : i32
    %c0_i32_0 = arith.constant 0 : i32
    return %arg0, %c0_i32 : i32, i32
  }
  func.func @transform_1(%arg0: i32) -> (i32, i32, i32) {
    %c0_i32 = arith.constant 0 : i32
    %c0_i32_0 = arith.constant 0 : i32
    %c0_i32_1 = arith.constant 0 : i32
    return %arg0, %c0_i32, %c0_i32_0 : i32, i32, i32
  }
}

module attributes {stable_mosaic.version = 11 : i64} {
  func.func @kernel(%arg0: i32, %arg1: memref<512x16xf32, #tpu.memory_space<vmem>>, %arg2: memref<2x16xf32, #tpu.memory_space<vmem>>, %arg3: memref<1x16xf32, #tpu.memory_space<vmem>>, %arg4: memref<1x16xf32, #tpu.memory_space<vmem>>, %arg5: memref<16x8xbf16, #tpu.memory_space<vmem>>, %arg6: memref<512x8xbf16, #tpu.memory_space<vmem>>, %arg7: memref<1x2x8xf32, #tpu.memory_space<vmem>>) attributes {dimension_semantics = [#tpu.dimension_semantics<parallel>], iteration_bounds = array<i64: 1>, scalar_prefetch = 0 : i64, scratch_operands = 0 : i64, tpu.core_type = #tpu.core_type<tc>, window_params = [{transform_indices = @transform_0, window_bounds = array<i64: 512, 16>}, {pipeline_mode = #tpu.pipeline_mode<synchronous>, transform_indices = @transform_1, window_bounds = array<i64: 2, 16>}, {pipeline_mode = #tpu.pipeline_mode<synchronous>, transform_indices = @transform_2, window_bounds = array<i64: 1, 16>}, {pipeline_mode = #tpu.pipeline_mode<synchronous>, transform_indices = @transform_3, window_bounds = array<i64: 1, 16>}, {pipeline_mode = #tpu.pipeline_mode<synchronous>, transform_indices = @transform_4, window_bounds = array<i64: 16, 8>}, {transform_indices = @transform_5, window_bounds = array<i64: 512, 8>}, {transform_indices = @transform_6, window_bounds = array<i64: 1, 2, 8>}]} {
    %c0 = arith.constant 0 : index
    %c0_0 = arith.constant 0 : index
    %0 = vector.load %arg2[%c0, %c0_0] : memref<2x16xf32, #tpu.memory_space<vmem>>, vector<2x16xf32>
    %c0_1 = arith.constant 0 : index
    %c0_2 = arith.constant 0 : index
    %1 = vector.load %arg3[%c0_1, %c0_2] : memref<1x16xf32, #tpu.memory_space<vmem>>, vector<1x16xf32>
    %c0_3 = arith.constant 0 : index
    %c0_4 = arith.constant 0 : index
    %2 = vector.load %arg4[%c0_3, %c0_4] : memref<1x16xf32, #tpu.memory_space<vmem>>, vector<1x16xf32>
    %3 = vector.extract_strided_slice %0 {offsets = [0, 0], sizes = [1, 16], strides = [1, 1]} : vector<2x16xf32> to vector<1x16xf32>
    %cst = arith.constant 0.001953125 : f32
    %4 = vector.broadcast %cst : f32 to vector<1x16xf32>
    %5 = arith.mulf %3, %4 : vector<1x16xf32>
    %6 = vector.extract_strided_slice %0 {offsets = [1, 0], sizes = [1, 16], strides = [1, 1]} : vector<2x16xf32> to vector<1x16xf32>
    %cst_5 = arith.constant 0.001953125 : f32
    %7 = vector.broadcast %cst_5 : f32 to vector<1x16xf32>
    %8 = arith.mulf %6, %7 : vector<1x16xf32>
    %9 = arith.mulf %5, %5 : vector<1x16xf32>
    %10 = arith.subf %8, %9 : vector<1x16xf32>
    %cst_6 = arith.constant 0.000000e+00 : f32
    %11 = vector.broadcast %cst_6 : f32 to vector<1x16xf32>
    %12 = arith.maximumf %10, %11 : vector<1x16xf32>
    %cst_7 = arith.constant 9.99999974E-6 : f32
    %13 = vector.broadcast %cst_7 : f32 to vector<1x16xf32>
    %14 = arith.addf %12, %13 : vector<1x16xf32>
    %15 = math.rsqrt %14 : vector<1x16xf32>
    %16 = arith.mulf %1, %15 : vector<1x16xf32>
    %17 = arith.mulf %5, %16 : vector<1x16xf32>
    %18 = arith.subf %2, %17 : vector<1x16xf32>
    %c0_8 = arith.constant 0 : index
    %c0_9 = arith.constant 0 : index
    %19 = vector.load %arg1[%c0_8, %c0_9] : memref<512x16xf32, #tpu.memory_space<vmem>>, vector<512x16xf32>
    %20 = vector.broadcast %16 : vector<1x16xf32> to vector<512x16xf32>
    %21 = arith.mulf %19, %20 : vector<512x16xf32>
    %22 = vector.broadcast %18 : vector<1x16xf32> to vector<512x16xf32>
    %23 = arith.addf %21, %22 : vector<512x16xf32>
    %cst_10 = arith.constant 0.000000e+00 : f32
    %24 = vector.broadcast %cst_10 : f32 to vector<512x16xf32>
    %25 = arith.maximumf %23, %24 : vector<512x16xf32>
    %26 = arith.truncf %25 : vector<512x16xf32> to vector<512x16xbf16>
    %c0_11 = arith.constant 0 : index
    %c0_12 = arith.constant 0 : index
    %27 = vector.load %arg5[%c0_11, %c0_12] : memref<16x8xbf16, #tpu.memory_space<vmem>>, vector<16x8xbf16>
    %cst_13 = arith.constant dense<0.000000e+00> : vector<512x8xf32>
    %28 = tpu.matmul %26, %27, %cst_13 {dimension_numbers = #tpu.dot_dimension_numbers<[1], [0], [0], [1], [0, 0, 1, 1], [], []>} : vector<512x16xbf16>, vector<16x8xbf16>, vector<512x8xf32> -> vector<512x8xf32>
    %29 = arith.truncf %28 : vector<512x8xf32> to vector<512x8xbf16>
    %c0_14 = arith.constant 0 : index
    %c0_15 = arith.constant 0 : index
    %30 = vector.load %arg6[%c0_14, %c0_15] : memref<512x8xbf16, #tpu.memory_space<vmem>>, vector<512x8xbf16>
    tpu.vector_store %arg6[%c0_14, %c0_15], %29 {strides = array<i32>} : memref<512x8xbf16, #tpu.memory_space<vmem>>, vector<512x8xbf16>,
    %cst_16 = arith.constant dense<0.000000e+00> : vector<8xf32>
    %31 = vector.multi_reduction <add>, %28, %cst_16 [0] : vector<512x8xf32> to vector<8xf32>
    %32 = vector.shape_cast %31 : vector<8xf32> to vector<1x8xf32>
    %33 = arith.mulf %28, %28 : vector<512x8xf32>
    %cst_17 = arith.constant dense<0.000000e+00> : vector<8xf32>
    %34 = vector.multi_reduction <add>, %33, %cst_17 [0] : vector<512x8xf32> to vector<8xf32>
    %35 = vector.shape_cast %34 : vector<8xf32> to vector<1x8xf32>
    %36 = tpu.concatenate %32, %35 in 0 : vector<1x8xf32>, vector<1x8xf32> -> vector<2x8xf32>
    %37 = vector.shape_cast %36 : vector<2x8xf32> to vector<1x2x8xf32>
    %c0_18 = arith.constant 0 : index
    %c0_19 = arith.constant 0 : index
    %c0_20 = arith.constant 0 : index
    %38 = vector.load %arg7[%c0_18, %c0_19, %c0_20] : memref<1x2x8xf32, #tpu.memory_space<vmem>>, vector<1x2x8xf32>
    tpu.vector_store %arg7[%c0_18, %c0_19, %c0_20], %37 {strides = array<i32>} : memref<1x2x8xf32, #tpu.memory_space<vmem>>, vector<1x2x8xf32>,
    return
  }
  func.func @transform_0(%arg0: i32) -> (i32, i32) {
    %c0_i32 = arith.constant 0 : i32
    %c0_i32_0 = arith.constant 0 : i32
    return %arg0, %c0_i32 : i32, i32
  }
  func.func @transform_1(%arg0: i32) -> (i32, i32) {
    %c0_i32 = arith.constant 0 : i32
    %c0_i32_0 = arith.constant 0 : i32
    %c0_i32_1 = arith.constant 0 : i32
    return %c0_i32, %c0_i32_0 : i32, i32
  }
  func.func @transform_2(%arg0: i32) -> (i32, i32) {
    %c0_i32 = arith.constant 0 : i32
    %c0_i32_0 = arith.constant 0 : i32
    %c0_i32_1 = arith.constant 0 : i32
    return %c0_i32, %c0_i32_0 : i32, i32
  }
  func.func @transform_3(%arg0: i32) -> (i32, i32) {
    %c0_i32 = arith.constant 0 : i32
    %c0_i32_0 = arith.constant 0 : i32
    %c0_i32_1 = arith.constant 0 : i32
    return %c0_i32, %c0_i32_0 : i32, i32
  }
  func.func @transform_4(%arg0: i32) -> (i32, i32) {
    %c0_i32 = arith.constant 0 : i32
    %c0_i32_0 = arith.constant 0 : i32
    %c0_i32_1 = arith.constant 0 : i32
    return %c0_i32, %c0_i32_0 : i32, i32
  }
  func.func @transform_5(%arg0: i32) -> (i32, i32) {
    %c0_i32 = arith.constant 0 : i32
    %c0_i32_0 = arith.constant 0 : i32
    return %arg0, %c0_i32 : i32, i32
  }
  func.func @transform_6(%arg0: i32) -> (i32, i32, i32) {
    %c0_i32 = arith.constant 0 : i32
    %c0_i32_0 = arith.constant 0 : i32
    %c0_i32_1 = arith.constant 0 : i32
    return %arg0, %c0_i32, %c0_i32_0 : i32, i32, i32
  }
}

module attributes {stable_mosaic.version = 11 : i64} {
  func.func @kernel(%arg0: i32, %arg1: memref<256x8xbf16, #tpu.memory_space<vmem>>, %arg2: memref<2x8xf32, #tpu.memory_space<vmem>>, %arg3: memref<1x8xf32, #tpu.memory_space<vmem>>, %arg4: memref<1x8xf32, #tpu.memory_space<vmem>>, %arg5: memref<72x8xbf16, #tpu.memory_space<vmem>>, %arg6: memref<256x1xf32, #tpu.memory_space<vmem>>, %arg7: memref<256x8xbf16, #tpu.memory_space<vmem>>, %arg8: memref<1x2x8xf32, #tpu.memory_space<vmem>>) attributes {dimension_semantics = [#tpu.dimension_semantics<parallel>], iteration_bounds = array<i64: 2>, scalar_prefetch = 0 : i64, scratch_operands = 0 : i64, tpu.core_type = #tpu.core_type<tc>, window_params = [{transform_indices = @transform_0, window_bounds = array<i64: 256, 8>}, {pipeline_mode = #tpu.pipeline_mode<synchronous>, transform_indices = @transform_1, window_bounds = array<i64: 2, 8>}, {pipeline_mode = #tpu.pipeline_mode<synchronous>, transform_indices = @transform_2, window_bounds = array<i64: 1, 8>}, {pipeline_mode = #tpu.pipeline_mode<synchronous>, transform_indices = @transform_3, window_bounds = array<i64: 1, 8>}, {pipeline_mode = #tpu.pipeline_mode<synchronous>, transform_indices = @transform_4, window_bounds = array<i64: 72, 8>}, {pipeline_mode = #tpu.pipeline_mode<synchronous>, transform_indices = @transform_5, window_bounds = array<i64: 256, 1>}, {transform_indices = @transform_6, window_bounds = array<i64: 256, 8>}, {transform_indices = @transform_7, window_bounds = array<i64: 1, 2, 8>}]} {
    %c0 = arith.constant 0 : index
    %c0_0 = arith.constant 0 : index
    %0 = vector.load %arg2[%c0, %c0_0] : memref<2x8xf32, #tpu.memory_space<vmem>>, vector<2x8xf32>
    %c0_1 = arith.constant 0 : index
    %c0_2 = arith.constant 0 : index
    %1 = vector.load %arg3[%c0_1, %c0_2] : memref<1x8xf32, #tpu.memory_space<vmem>>, vector<1x8xf32>
    %c0_3 = arith.constant 0 : index
    %c0_4 = arith.constant 0 : index
    %2 = vector.load %arg4[%c0_3, %c0_4] : memref<1x8xf32, #tpu.memory_space<vmem>>, vector<1x8xf32>
    %3 = vector.extract_strided_slice %0 {offsets = [0, 0], sizes = [1, 8], strides = [1, 1]} : vector<2x8xf32> to vector<1x8xf32>
    %cst = arith.constant 0.001953125 : f32
    %4 = vector.broadcast %cst : f32 to vector<1x8xf32>
    %5 = arith.mulf %3, %4 : vector<1x8xf32>
    %6 = vector.extract_strided_slice %0 {offsets = [1, 0], sizes = [1, 8], strides = [1, 1]} : vector<2x8xf32> to vector<1x8xf32>
    %cst_5 = arith.constant 0.001953125 : f32
    %7 = vector.broadcast %cst_5 : f32 to vector<1x8xf32>
    %8 = arith.mulf %6, %7 : vector<1x8xf32>
    %9 = arith.mulf %5, %5 : vector<1x8xf32>
    %10 = arith.subf %8, %9 : vector<1x8xf32>
    %cst_6 = arith.constant 0.000000e+00 : f32
    %11 = vector.broadcast %cst_6 : f32 to vector<1x8xf32>
    %12 = arith.maximumf %10, %11 : vector<1x8xf32>
    %cst_7 = arith.constant 9.99999974E-6 : f32
    %13 = vector.broadcast %cst_7 : f32 to vector<1x8xf32>
    %14 = arith.addf %12, %13 : vector<1x8xf32>
    %15 = math.rsqrt %14 : vector<1x8xf32>
    %16 = arith.mulf %1, %15 : vector<1x8xf32>
    %17 = arith.mulf %5, %16 : vector<1x8xf32>
    %18 = arith.subf %2, %17 : vector<1x8xf32>
    %c0_8 = arith.constant 0 : index
    %c0_9 = arith.constant 0 : index
    %19 = vector.load %arg1[%c0_8, %c0_9] : memref<256x8xbf16, #tpu.memory_space<vmem>>, vector<256x8xbf16>
    %20 = arith.extf %19 : vector<256x8xbf16> to vector<256x8xf32>
    %21 = vector.broadcast %16 : vector<1x8xf32> to vector<256x8xf32>
    %22 = arith.mulf %20, %21 : vector<256x8xf32>
    %23 = vector.broadcast %18 : vector<1x8xf32> to vector<256x8xf32>
    %24 = arith.addf %22, %23 : vector<256x8xf32>
    %cst_10 = arith.constant 0.000000e+00 : f32
    %25 = vector.broadcast %cst_10 : f32 to vector<256x8xf32>
    %26 = arith.maximumf %24, %25 : vector<256x8xf32>
    %27 = vector.shape_cast %26 : vector<256x8xf32> to vector<16x16x8xf32>
    %cst_11 = arith.constant 0.000000e+00 : f32
    %28 = vector.broadcast %cst_11 : f32 to vector<16x1x8xf32>
    %cst_12 = arith.constant 0.000000e+00 : f32
    %29 = vector.broadcast %cst_12 : f32 to vector<1x18x8xf32>
    %30 = tpu.concatenate %28, %27, %28 in 1 : vector<16x1x8xf32>, vector<16x16x8xf32>, vector<16x1x8xf32> -> vector<16x18x8xf32>
    %31 = tpu.concatenate %29, %30, %29 in 0 : vector<1x18x8xf32>, vector<16x18x8xf32>, vector<1x18x8xf32> -> vector<18x18x8xf32>
    %32 = vector.extract_strided_slice %31 {offsets = [0, 0, 0], sizes = [18, 16, 8], strides = [1, 1, 1]} : vector<18x18x8xf32> to vector<18x16x8xf32>
    %33 = arith.truncf %32 : vector<18x16x8xf32> to vector<18x16x8xbf16>
    %34 = vector.extract_strided_slice %31 {offsets = [0, 1, 0], sizes = [18, 16, 8], strides = [1, 1, 1]} : vector<18x18x8xf32> to vector<18x16x8xf32>
    %35 = arith.truncf %34 : vector<18x16x8xf32> to vector<18x16x8xbf16>
    %36 = vector.extract_strided_slice %31 {offsets = [0, 2, 0], sizes = [18, 16, 8], strides = [1, 1, 1]} : vector<18x18x8xf32> to vector<18x16x8xf32>
    %37 = arith.truncf %36 : vector<18x16x8xf32> to vector<18x16x8xbf16>
    %cst_13 = arith.constant 0.000000e+00 : f32
    %38 = vector.broadcast %cst_13 : f32 to vector<256x8xf32>
    %39 = vector.extract_strided_slice %33 {offsets = [0, 0, 0], sizes = [16, 16, 8], strides = [1, 1, 1]} : vector<18x16x8xbf16> to vector<16x16x8xbf16>
    %40 = vector.shape_cast %39 : vector<16x16x8xbf16> to vector<256x8xbf16>
    %c0_14 = arith.constant 0 : index
    %c0_15 = arith.constant 0 : index
    %41 = vector.load %arg5[%c0_14, %c0_15] : memref<72x8xbf16, #tpu.memory_space<vmem>>, vector<8x8xbf16>
    %cst_16 = arith.constant dense<0.000000e+00> : vector<256x8xf32>
    %42 = tpu.matmul %40, %41, %cst_16 {dimension_numbers = #tpu.dot_dimension_numbers<[1], [0], [0], [1], [0, 0, 1, 1], [], []>} : vector<256x8xbf16>, vector<8x8xbf16>, vector<256x8xf32> -> vector<256x8xf32>
    %43 = arith.addf %38, %42 : vector<256x8xf32>
    %44 = vector.extract_strided_slice %35 {offsets = [0, 0, 0], sizes = [16, 16, 8], strides = [1, 1, 1]} : vector<18x16x8xbf16> to vector<16x16x8xbf16>
    %45 = vector.shape_cast %44 : vector<16x16x8xbf16> to vector<256x8xbf16>
    %c8 = arith.constant 8 : index
    %c0_17 = arith.constant 0 : index
    %46 = vector.load %arg5[%c8, %c0_17] : memref<72x8xbf16, #tpu.memory_space<vmem>>, vector<8x8xbf16>
    %cst_18 = arith.constant dense<0.000000e+00> : vector<256x8xf32>
    %47 = tpu.matmul %45, %46, %cst_18 {dimension_numbers = #tpu.dot_dimension_numbers<[1], [0], [0], [1], [0, 0, 1, 1], [], []>} : vector<256x8xbf16>, vector<8x8xbf16>, vector<256x8xf32> -> vector<256x8xf32>
    %48 = arith.addf %43, %47 : vector<256x8xf32>
    %49 = vector.extract_strided_slice %37 {offsets = [0, 0, 0], sizes = [16, 16, 8], strides = [1, 1, 1]} : vector<18x16x8xbf16> to vector<16x16x8xbf16>
    %50 = vector.shape_cast %49 : vector<16x16x8xbf16> to vector<256x8xbf16>
    %c16 = arith.constant 16 : index
    %c0_19 = arith.constant 0 : index
    %51 = vector.load %arg5[%c16, %c0_19] : memref<72x8xbf16, #tpu.memory_space<vmem>>, vector<8x8xbf16>
    %cst_20 = arith.constant dense<0.000000e+00> : vector<256x8xf32>
    %52 = tpu.matmul %50, %51, %cst_20 {dimension_numbers = #tpu.dot_dimension_numbers<[1], [0], [0], [1], [0, 0, 1, 1], [], []>} : vector<256x8xbf16>, vector<8x8xbf16>, vector<256x8xf32> -> vector<256x8xf32>
    %53 = arith.addf %48, %52 : vector<256x8xf32>
    %54 = vector.extract_strided_slice %33 {offsets = [1, 0, 0], sizes = [16, 16, 8], strides = [1, 1, 1]} : vector<18x16x8xbf16> to vector<16x16x8xbf16>
    %55 = vector.shape_cast %54 : vector<16x16x8xbf16> to vector<256x8xbf16>
    %c24 = arith.constant 24 : index
    %c0_21 = arith.constant 0 : index
    %56 = vector.load %arg5[%c24, %c0_21] : memref<72x8xbf16, #tpu.memory_space<vmem>>, vector<8x8xbf16>
    %cst_22 = arith.constant dense<0.000000e+00> : vector<256x8xf32>
    %57 = tpu.matmul %55, %56, %cst_22 {dimension_numbers = #tpu.dot_dimension_numbers<[1], [0], [0], [1], [0, 0, 1, 1], [], []>} : vector<256x8xbf16>, vector<8x8xbf16>, vector<256x8xf32> -> vector<256x8xf32>
    %58 = arith.addf %53, %57 : vector<256x8xf32>
    %59 = vector.extract_strided_slice %35 {offsets = [1, 0, 0], sizes = [16, 16, 8], strides = [1, 1, 1]} : vector<18x16x8xbf16> to vector<16x16x8xbf16>
    %60 = vector.shape_cast %59 : vector<16x16x8xbf16> to vector<256x8xbf16>
    %c32 = arith.constant 32 : index
    %c0_23 = arith.constant 0 : index
    %61 = vector.load %arg5[%c32, %c0_23] : memref<72x8xbf16, #tpu.memory_space<vmem>>, vector<8x8xbf16>
    %cst_24 = arith.constant dense<0.000000e+00> : vector<256x8xf32>
    %62 = tpu.matmul %60, %61, %cst_24 {dimension_numbers = #tpu.dot_dimension_numbers<[1], [0], [0], [1], [0, 0, 1, 1], [], []>} : vector<256x8xbf16>, vector<8x8xbf16>, vector<256x8xf32> -> vector<256x8xf32>
    %63 = arith.addf %58, %62 : vector<256x8xf32>
    %64 = vector.extract_strided_slice %37 {offsets = [1, 0, 0], sizes = [16, 16, 8], strides = [1, 1, 1]} : vector<18x16x8xbf16> to vector<16x16x8xbf16>
    %65 = vector.shape_cast %64 : vector<16x16x8xbf16> to vector<256x8xbf16>
    %c40 = arith.constant 40 : index
    %c0_25 = arith.constant 0 : index
    %66 = vector.load %arg5[%c40, %c0_25] : memref<72x8xbf16, #tpu.memory_space<vmem>>, vector<8x8xbf16>
    %cst_26 = arith.constant dense<0.000000e+00> : vector<256x8xf32>
    %67 = tpu.matmul %65, %66, %cst_26 {dimension_numbers = #tpu.dot_dimension_numbers<[1], [0], [0], [1], [0, 0, 1, 1], [], []>} : vector<256x8xbf16>, vector<8x8xbf16>, vector<256x8xf32> -> vector<256x8xf32>
    %68 = arith.addf %63, %67 : vector<256x8xf32>
    %69 = vector.extract_strided_slice %33 {offsets = [2, 0, 0], sizes = [16, 16, 8], strides = [1, 1, 1]} : vector<18x16x8xbf16> to vector<16x16x8xbf16>
    %70 = vector.shape_cast %69 : vector<16x16x8xbf16> to vector<256x8xbf16>
    %c48 = arith.constant 48 : index
    %c0_27 = arith.constant 0 : index
    %71 = vector.load %arg5[%c48, %c0_27] : memref<72x8xbf16, #tpu.memory_space<vmem>>, vector<8x8xbf16>
    %cst_28 = arith.constant dense<0.000000e+00> : vector<256x8xf32>
    %72 = tpu.matmul %70, %71, %cst_28 {dimension_numbers = #tpu.dot_dimension_numbers<[1], [0], [0], [1], [0, 0, 1, 1], [], []>} : vector<256x8xbf16>, vector<8x8xbf16>, vector<256x8xf32> -> vector<256x8xf32>
    %73 = arith.addf %68, %72 : vector<256x8xf32>
    %74 = vector.extract_strided_slice %35 {offsets = [2, 0, 0], sizes = [16, 16, 8], strides = [1, 1, 1]} : vector<18x16x8xbf16> to vector<16x16x8xbf16>
    %75 = vector.shape_cast %74 : vector<16x16x8xbf16> to vector<256x8xbf16>
    %c56 = arith.constant 56 : index
    %c0_29 = arith.constant 0 : index
    %76 = vector.load %arg5[%c56, %c0_29] : memref<72x8xbf16, #tpu.memory_space<vmem>>, vector<8x8xbf16>
    %cst_30 = arith.constant dense<0.000000e+00> : vector<256x8xf32>
    %77 = tpu.matmul %75, %76, %cst_30 {dimension_numbers = #tpu.dot_dimension_numbers<[1], [0], [0], [1], [0, 0, 1, 1], [], []>} : vector<256x8xbf16>, vector<8x8xbf16>, vector<256x8xf32> -> vector<256x8xf32>
    %78 = arith.addf %73, %77 : vector<256x8xf32>
    %79 = vector.extract_strided_slice %37 {offsets = [2, 0, 0], sizes = [16, 16, 8], strides = [1, 1, 1]} : vector<18x16x8xbf16> to vector<16x16x8xbf16>
    %80 = vector.shape_cast %79 : vector<16x16x8xbf16> to vector<256x8xbf16>
    %c64 = arith.constant 64 : index
    %c0_31 = arith.constant 0 : index
    %81 = vector.load %arg5[%c64, %c0_31] : memref<72x8xbf16, #tpu.memory_space<vmem>>, vector<8x8xbf16>
    %cst_32 = arith.constant dense<0.000000e+00> : vector<256x8xf32>
    %82 = tpu.matmul %80, %81, %cst_32 {dimension_numbers = #tpu.dot_dimension_numbers<[1], [0], [0], [1], [0, 0, 1, 1], [], []>} : vector<256x8xbf16>, vector<8x8xbf16>, vector<256x8xf32> -> vector<256x8xf32>
    %83 = arith.addf %78, %82 : vector<256x8xf32>
    %84 = arith.truncf %83 : vector<256x8xf32> to vector<256x8xbf16>
    %c0_33 = arith.constant 0 : index
    %c0_34 = arith.constant 0 : index
    %85 = vector.load %arg7[%c0_33, %c0_34] : memref<256x8xbf16, #tpu.memory_space<vmem>>, vector<256x8xbf16>
    tpu.vector_store %arg7[%c0_33, %c0_34], %84 {strides = array<i32>} : memref<256x8xbf16, #tpu.memory_space<vmem>>, vector<256x8xbf16>,
    %c0_35 = arith.constant 0 : index
    %c0_36 = arith.constant 0 : index
    %86 = vector.load %arg6[%c0_35, %c0_36] : memref<256x1xf32, #tpu.memory_space<vmem>>, vector<256x1xf32>
    %87 = vector.broadcast %86 : vector<256x1xf32> to vector<256x8xf32>
    %88 = arith.mulf %83, %87 : vector<256x8xf32>
    %cst_37 = arith.constant dense<0.000000e+00> : vector<8xf32>
    %89 = vector.multi_reduction <add>, %88, %cst_37 [0] : vector<256x8xf32> to vector<8xf32>
    %90 = vector.shape_cast %89 : vector<8xf32> to vector<1x8xf32>
    %91 = arith.mulf %83, %83 : vector<256x8xf32>
    %92 = vector.broadcast %86 : vector<256x1xf32> to vector<256x8xf32>
    %93 = arith.mulf %91, %92 : vector<256x8xf32>
    %cst_38 = arith.constant dense<0.000000e+00> : vector<8xf32>
    %94 = vector.multi_reduction <add>, %93, %cst_38 [0] : vector<256x8xf32> to vector<8xf32>
    %95 = vector.shape_cast %94 : vector<8xf32> to vector<1x8xf32>
    %96 = tpu.concatenate %90, %95 in 0 : vector<1x8xf32>, vector<1x8xf32> -> vector<2x8xf32>
    %97 = vector.shape_cast %96 : vector<2x8xf32> to vector<1x2x8xf32>
    %c0_39 = arith.constant 0 : index
    %c0_40 = arith.constant 0 : index
    %c0_41 = arith.constant 0 : index
    %98 = vector.load %arg8[%c0_39, %c0_40, %c0_41] : memref<1x2x8xf32, #tpu.memory_space<vmem>>, vector<1x2x8xf32>
    tpu.vector_store %arg8[%c0_39, %c0_40, %c0_41], %97 {strides = array<i32>} : memref<1x2x8xf32, #tpu.memory_space<vmem>>, vector<1x2x8xf32>,
    return
  }
  func.func @transform_0(%arg0: i32) -> (i32, i32) {
    %c0_i32 = arith.constant 0 : i32
    %c0_i32_0 = arith.constant 0 : i32
    return %arg0, %c0_i32 : i32, i32
  }
  func.func @transform_1(%arg0: i32) -> (i32, i32) {
    %c0_i32 = arith.constant 0 : i32
    %c0_i32_0 = arith.constant 0 : i32
    %c0_i32_1 = arith.constant 0 : i32
    return %c0_i32, %c0_i32_0 : i32, i32
  }
  func.func @transform_2(%arg0: i32) -> (i32, i32) {
    %c0_i32 = arith.constant 0 : i32
    %c0_i32_0 = arith.constant 0 : i32
    %c0_i32_1 = arith.constant 0 : i32
    return %c0_i32, %c0_i32_0 : i32, i32
  }
  func.func @transform_3(%arg0: i32) -> (i32, i32) {
    %c0_i32 = arith.constant 0 : i32
    %c0_i32_0 = arith.constant 0 : i32
    %c0_i32_1 = arith.constant 0 : i32
    return %c0_i32, %c0_i32_0 : i32, i32
  }
  func.func @transform_4(%arg0: i32) -> (i32, i32) {
    %c0_i32 = arith.constant 0 : i32
    %c0_i32_0 = arith.constant 0 : i32
    %c0_i32_1 = arith.constant 0 : i32
    return %c0_i32, %c0_i32_0 : i32, i32
  }
  func.func @transform_5(%arg0: i32) -> (i32, i32) {
    %c0_i32 = arith.constant 0 : i32
    %c0_i32_0 = arith.constant 0 : i32
    %c0_i32_1 = arith.constant 0 : i32
    return %c0_i32, %c0_i32_0 : i32, i32
  }
  func.func @transform_6(%arg0: i32) -> (i32, i32) {
    %c0_i32 = arith.constant 0 : i32
    %c0_i32_0 = arith.constant 0 : i32
    return %arg0, %c0_i32 : i32, i32
  }
  func.func @transform_7(%arg0: i32) -> (i32, i32, i32) {
    %c0_i32 = arith.constant 0 : i32
    %c0_i32_0 = arith.constant 0 : i32
    %c0_i32_1 = arith.constant 0 : i32
    return %arg0, %c0_i32, %c0_i32_0 : i32, i32, i32
  }
}

module attributes {stable_mosaic.version = 11 : i64} {
  func.func @kernel(%arg0: i32, %arg1: memref<128x8xbf16, #tpu.memory_space<vmem>>, %arg2: memref<2x8xf32, #tpu.memory_space<vmem>>, %arg3: memref<1x8xf32, #tpu.memory_space<vmem>>, %arg4: memref<1x8xf32, #tpu.memory_space<vmem>>, %arg5: memref<8x32xbf16, #tpu.memory_space<vmem>>, %arg6: memref<128x16xf32, #tpu.memory_space<vmem>>, %arg7: memref<16x32xbf16, #tpu.memory_space<vmem>>, %arg8: memref<128x32xf32, #tpu.memory_space<vmem>>) attributes {dimension_semantics = [#tpu.dimension_semantics<parallel>], iteration_bounds = array<i64: 1>, scalar_prefetch = 0 : i64, scratch_operands = 0 : i64, tpu.core_type = #tpu.core_type<tc>, window_params = [{transform_indices = @transform_0, window_bounds = array<i64: 128, 8>}, {pipeline_mode = #tpu.pipeline_mode<synchronous>, transform_indices = @transform_1, window_bounds = array<i64: 2, 8>}, {pipeline_mode = #tpu.pipeline_mode<synchronous>, transform_indices = @transform_2, window_bounds = array<i64: 1, 8>}, {pipeline_mode = #tpu.pipeline_mode<synchronous>, transform_indices = @transform_3, window_bounds = array<i64: 1, 8>}, {pipeline_mode = #tpu.pipeline_mode<synchronous>, transform_indices = @transform_4, window_bounds = array<i64: 8, 32>}, {transform_indices = @transform_5, window_bounds = array<i64: 128, 16>}, {pipeline_mode = #tpu.pipeline_mode<synchronous>, transform_indices = @transform_6, window_bounds = array<i64: 16, 32>}, {transform_indices = @transform_7, window_bounds = array<i64: 128, 32>}]} {
    %c0 = arith.constant 0 : index
    %c0_0 = arith.constant 0 : index
    %0 = vector.load %arg2[%c0, %c0_0] : memref<2x8xf32, #tpu.memory_space<vmem>>, vector<2x8xf32>
    %c0_1 = arith.constant 0 : index
    %c0_2 = arith.constant 0 : index
    %1 = vector.load %arg3[%c0_1, %c0_2] : memref<1x8xf32, #tpu.memory_space<vmem>>, vector<1x8xf32>
    %c0_3 = arith.constant 0 : index
    %c0_4 = arith.constant 0 : index
    %2 = vector.load %arg4[%c0_3, %c0_4] : memref<1x8xf32, #tpu.memory_space<vmem>>, vector<1x8xf32>
    %3 = vector.extract_strided_slice %0 {offsets = [0, 0], sizes = [1, 8], strides = [1, 1]} : vector<2x8xf32> to vector<1x8xf32>
    %cst = arith.constant 7.812500e-03 : f32
    %4 = vector.broadcast %cst : f32 to vector<1x8xf32>
    %5 = arith.mulf %3, %4 : vector<1x8xf32>
    %6 = vector.extract_strided_slice %0 {offsets = [1, 0], sizes = [1, 8], strides = [1, 1]} : vector<2x8xf32> to vector<1x8xf32>
    %cst_5 = arith.constant 7.812500e-03 : f32
    %7 = vector.broadcast %cst_5 : f32 to vector<1x8xf32>
    %8 = arith.mulf %6, %7 : vector<1x8xf32>
    %9 = arith.mulf %5, %5 : vector<1x8xf32>
    %10 = arith.subf %8, %9 : vector<1x8xf32>
    %cst_6 = arith.constant 0.000000e+00 : f32
    %11 = vector.broadcast %cst_6 : f32 to vector<1x8xf32>
    %12 = arith.maximumf %10, %11 : vector<1x8xf32>
    %cst_7 = arith.constant 9.99999974E-6 : f32
    %13 = vector.broadcast %cst_7 : f32 to vector<1x8xf32>
    %14 = arith.addf %12, %13 : vector<1x8xf32>
    %15 = math.rsqrt %14 : vector<1x8xf32>
    %16 = arith.mulf %1, %15 : vector<1x8xf32>
    %17 = arith.mulf %5, %16 : vector<1x8xf32>
    %18 = arith.subf %2, %17 : vector<1x8xf32>
    %c0_8 = arith.constant 0 : index
    %c0_9 = arith.constant 0 : index
    %19 = vector.load %arg1[%c0_8, %c0_9] : memref<128x8xbf16, #tpu.memory_space<vmem>>, vector<128x8xbf16>
    %20 = arith.extf %19 : vector<128x8xbf16> to vector<128x8xf32>
    %21 = vector.broadcast %16 : vector<1x8xf32> to vector<128x8xf32>
    %22 = arith.mulf %20, %21 : vector<128x8xf32>
    %23 = vector.broadcast %18 : vector<1x8xf32> to vector<128x8xf32>
    %24 = arith.addf %22, %23 : vector<128x8xf32>
    %cst_10 = arith.constant 0.000000e+00 : f32
    %25 = vector.broadcast %cst_10 : f32 to vector<128x8xf32>
    %26 = arith.maximumf %24, %25 : vector<128x8xf32>
    %27 = arith.truncf %26 : vector<128x8xf32> to vector<128x8xbf16>
    %c0_11 = arith.constant 0 : index
    %c0_12 = arith.constant 0 : index
    %28 = vector.load %arg5[%c0_11, %c0_12] : memref<8x32xbf16, #tpu.memory_space<vmem>>, vector<8x32xbf16>
    %cst_13 = arith.constant dense<0.000000e+00> : vector<128x32xf32>
    %29 = tpu.matmul %27, %28, %cst_13 {dimension_numbers = #tpu.dot_dimension_numbers<[1], [0], [0], [1], [0, 0, 1, 1], [], []>} : vector<128x8xbf16>, vector<8x32xbf16>, vector<128x32xf32> -> vector<128x32xf32>
    %c0_14 = arith.constant 0 : index
    %c0_15 = arith.constant 0 : index
    %30 = vector.load %arg6[%c0_14, %c0_15] : memref<128x16xf32, #tpu.memory_space<vmem>>, vector<128x16xf32>
    %31 = arith.truncf %30 : vector<128x16xf32> to vector<128x16xbf16>
    %c0_16 = arith.constant 0 : index
    %c0_17 = arith.constant 0 : index
    %32 = vector.load %arg7[%c0_16, %c0_17] : memref<16x32xbf16, #tpu.memory_space<vmem>>, vector<16x32xbf16>
    %cst_18 = arith.constant dense<0.000000e+00> : vector<128x32xf32>
    %33 = tpu.matmul %31, %32, %cst_18 {dimension_numbers = #tpu.dot_dimension_numbers<[1], [0], [0], [1], [0, 0, 1, 1], [], []>} : vector<128x16xbf16>, vector<16x32xbf16>, vector<128x32xf32> -> vector<128x32xf32>
    %34 = arith.addf %33, %29 : vector<128x32xf32>
    %c0_19 = arith.constant 0 : index
    %c0_20 = arith.constant 0 : index
    %35 = vector.load %arg8[%c0_19, %c0_20] : memref<128x32xf32, #tpu.memory_space<vmem>>, vector<128x32xf32>
    tpu.vector_store %arg8[%c0_19, %c0_20], %34 {strides = array<i32>} : memref<128x32xf32, #tpu.memory_space<vmem>>, vector<128x32xf32>,
    return
  }
  func.func @transform_0(%arg0: i32) -> (i32, i32) {
    %c0_i32 = arith.constant 0 : i32
    %c0_i32_0 = arith.constant 0 : i32
    return %arg0, %c0_i32 : i32, i32
  }
  func.func @transform_1(%arg0: i32) -> (i32, i32) {
    %c0_i32 = arith.constant 0 : i32
    %c0_i32_0 = arith.constant 0 : i32
    %c0_i32_1 = arith.constant 0 : i32
    return %c0_i32, %c0_i32_0 : i32, i32
  }
  func.func @transform_2(%arg0: i32) -> (i32, i32) {
    %c0_i32 = arith.constant 0 : i32
    %c0_i32_0 = arith.constant 0 : i32
    %c0_i32_1 = arith.constant 0 : i32
    return %c0_i32, %c0_i32_0 : i32, i32
  }
  func.func @transform_3(%arg0: i32) -> (i32, i32) {
    %c0_i32 = arith.constant 0 : i32
    %c0_i32_0 = arith.constant 0 : i32
    %c0_i32_1 = arith.constant 0 : i32
    return %c0_i32, %c0_i32_0 : i32, i32
  }
  func.func @transform_4(%arg0: i32) -> (i32, i32) {
    %c0_i32 = arith.constant 0 : i32
    %c0_i32_0 = arith.constant 0 : i32
    %c0_i32_1 = arith.constant 0 : i32
    return %c0_i32, %c0_i32_0 : i32, i32
  }
  func.func @transform_5(%arg0: i32) -> (i32, i32) {
    %c0_i32 = arith.constant 0 : i32
    %c0_i32_0 = arith.constant 0 : i32
    return %arg0, %c0_i32 : i32, i32
  }
  func.func @transform_6(%arg0: i32) -> (i32, i32) {
    %c0_i32 = arith.constant 0 : i32
    %c0_i32_0 = arith.constant 0 : i32
    %c0_i32_1 = arith.constant 0 : i32
    return %c0_i32, %c0_i32_0 : i32, i32
  }
  func.func @transform_7(%arg0: i32) -> (i32, i32) {
    %c0_i32 = arith.constant 0 : i32
    %c0_i32_0 = arith.constant 0 : i32
    return %arg0, %c0_i32 : i32, i32
  }
}

</mosaic_0001>

<bundles_post_ra>
// kernel: resnetv2_bottleneck_forward.4
= control target key start
LH: loop header
LB: loop body
LE: loop exit
PB: predicated region body
PF: predicated region fallthrough
CT: control target
= control target key end

     0   :  { %vm72_vm0 = vcmask 130048   ;;  %vm403_vm1 = vcmask 1040384   ;;  %vm405_vm2 = vcmask 123904   ;;  %s1276_s0 = inlined_call_operand.vmem [shape: f32[512,16], index: 0, kind: input, shape index: {}]   ;;  %s1277_s1 = inlined_call_operand.vmem [shape: f32[1,2,16], index: 1, kind: output, shape index: {}]  }
   0x1   :  { %v424_v0 = vld [vmem:[%s1276_s0] sm:$0xff]  ;;  %v429_v1 = vld [vmem:[%s1276_s0 + $0x8] sm:$0xff]  ;;  %v434_v2 = vld [vmem:[%s1276_s0 + $0x10] sm:$0xff] }
   0x2   :  { %v73_v3 = vsel %vm72_vm0, %v424_v0, 0.0  ;;  %v74_v4 = vsel %vm72_vm0, %v429_v1, 0.0  ;;  %v76_v5 = vsel %vm72_vm0, %v434_v2, 0.0  ;;  %v445_v6 = vld [vmem:[%s1276_s0 + $0x18] sm:$0xff]  ;;  %v452_v9 = vld [vmem:[%s1276_s0 + $0x20] sm:$0xff]  ;;  %v459_v12 = vld [vmem:[%s1276_s0 + $0x28] sm:$0xff] }
   0x3   :  { %v75_v7 = vadd.f32 %v74_v4, %v73_v3  ;;  %v78_v8 = vsel %vm72_vm0, %v445_v6, 0.0  ;;  %v80_v11 = vsel %vm72_vm0, %v452_v9, 0.0  ;;  %v82_v14 = vsel %vm72_vm0, %v459_v12, 0.0  ;;  %v466_v15 = vld [vmem:[%s1276_s0 + $0x30] sm:$0xff]  ;;  %v471_v17 = vld [vmem:[%s1276_s0 + $0x38] sm:$0xff]  ;;  %v476_v18 = vld [vmem:[%s1276_s0 + $0x40] sm:$0xff] }
   0x4   :  { %v84_v19 = vsel %vm72_vm0, %v466_v15, 0.0  ;;  %v483_v20 = vld [vmem:[%s1276_s0 + $0x48] sm:$0xff]  ;;  %v488_v21 = vld [vmem:[%s1276_s0 + $0x50] sm:$0xff]  ;;  %v493_v22 = vld [vmem:[%s1276_s0 + $0x58] sm:$0xff]  ;;  %v86_v24 = vsel %vm72_vm0, %v471_v17, 0.0  ;;  %v88_v25 = vsel %vm72_vm0, %v476_v18, 0.0 }
   0x5   :  { %v77_v10 = vadd.f32 %v76_v5, %v75_v7  ;;  %v502_v26 = vld [vmem:[%s1276_s0 + $0x108] sm:$0xff]  ;;  %v507_v27 = vld [vmem:[%s1276_s0 + $0x110] sm:$0xff]  ;;  %v512_v28 = vld [vmem:[%s1276_s0 + $0x118] sm:$0xff]  ;;  %v90_v29 = vsel %vm72_vm0, %v483_v20, 0.0  ;;  %v92_v30 = vsel %vm72_vm0, %v488_v21, 0.0  ;;  %v520_v31 = vsel %vm72_vm0, %v493_v22, 0.0 }
   0x6   :  { %v525_v32 = vld [vmem:[%s1276_s0 + $0x120] sm:$0xff]  ;;  %v530_v33 = vld [vmem:[%s1276_s0 + $0x128] sm:$0xff]  ;;  %v535_v34 = vld [vmem:[%s1276_s0 + $0x130] sm:$0xff]  ;;  %v539_v36 = vsel %vm72_vm0, %v502_v26, 0.0  ;;  %v543_v37 = vsel %vm72_vm0, %v507_v27, 0.0  ;;  %v547_v38 = vsel %vm72_vm0, %v512_v28, 0.0 }
   0x7   :  { %v79_v13 = vadd.f32 %v78_v8, %v77_v10  ;;  %1296 = vst [vmem:[#allocation2_spill] sm:$0xff] %v539_v36  ;;  %1297 = vst [vmem:[#allocation3_spill] sm:$0xff] %v543_v37  ;;  %v552_v39 = vld [vmem:[%s1276_s0 + $0x138] sm:$0xff]  ;;  %v557_v40 = vld [vmem:[%s1276_s0 + $0x140] sm:$0xff]  ;;  %v566_v42 = vsel %vm72_vm0, %v525_v32, 0.0  ;;  %v570_v43 = vsel %vm72_vm0, %v530_v33, 0.0  ;;  %v208_v36 = vmul.f32 %v434_v2, %v434_v2 }
   0x8   :  { %1298 = vst [vmem:[#allocation4_spill] sm:$0xff] %v547_v38  ;;  %v562_v41 = vld [vmem:[%s1276_s0 + $0x148] sm:$0xff]  ;;  %1299 = vst [vmem:[#allocation5_spill] sm:$0xff] %v566_v42  ;;  %v574_v44 = vsel %vm72_vm0, %v535_v34, 0.0  ;;  %v579_v45 = vld [vmem:[%s1276_s0 + $0x150] sm:$0xff]  ;;  %v593_v49 = vsel %vm72_vm0, %v552_v39, 0.0 }
   0x9   :  { %v81_v16 = vadd.f32 %v80_v11, %v79_v13  ;;  %1300 = vst [vmem:[#allocation6_spill] sm:$0xff] %v570_v43  ;;  %1301 = vst [vmem:[#allocation7_spill] sm:$0xff] %v574_v44  ;;  %v584_v46 = vld [vmem:[%s1276_s0 + $0x158] sm:$0xff]  ;;  %v589_v47 = vld [vmem:[%s1276_s0 + $0x160] sm:$0xff]  ;;  %v597_v50 = vsel %vm72_vm0, %v557_v40, 0.0  ;;  %v601_v51 = vsel %vm72_vm0, %v562_v41, 0.0 }
   0xa   :  { %1302 = vst [vmem:[#allocation8_spill] sm:$0xff] %v593_v49  ;;  %1303 = vst [vmem:[#allocation9_spill] sm:$0xff] %v597_v50  ;;  %v606_v52 = vld [vmem:[%s1276_s0 + $0x168] sm:$0xff]  ;;  %v611_v53 = vld [vmem:[%s1276_s0 + $0x170] sm:$0xff]  ;;  %v620_v55 = vsel %vm72_vm0, %v579_v45, 0.0  ;;  %v624_v56 = vsel %vm72_vm0, %v584_v46, 0.0 }
   0xb   :  { %v83_v23 = vadd.f32 %v82_v14, %v81_v16  ;;  %1304 = vst [vmem:[#allocation10_spill] sm:$0xff] %v601_v51  ;;  %v616_v54 = vld [vmem:[%s1276_s0 + $0x178] sm:$0xff]  ;;  %1305 = vst [vmem:[#allocation11_spill] sm:$0xff] %v620_v55  ;;  %v628_v57 = vsel %vm72_vm0, %v589_v47, 0.0  ;;  %v633_v58 = vld [vmem:[%s1276_s0 + $0x180] sm:$0xff]  ;;  %v647_v62 = vsel %vm72_vm0, %v606_v52, 0.0 }
   0xc   :  { %1306 = vst [vmem:[#allocation12_spill] sm:$0xff] %v624_v56  ;;  %1307 = vst [vmem:[#allocation13_spill] sm:$0xff] %v628_v57  ;;  %v638_v59 = vld [vmem:[%s1276_s0 + $0x188] sm:$0xff]  ;;  %v643_v60 = vld [vmem:[%s1276_s0 + $0x190] sm:$0xff]  ;;  %v651_v63 = vsel %vm72_vm0, %v611_v53, 0.0  ;;  %v655_v3 = vsel %vm72_vm0, %v616_v54, 0.0 }
   0xd   :  { %v85_v35 = vadd.f32 %v84_v19, %v83_v23  ;;  %1308 = vst [vmem:[#allocation14_spill] sm:$0xff] %v647_v62  ;;  %1309 = vst [vmem:[#allocation15_spill] sm:$0xff] %v651_v63  ;;  %v660_v4 = vld [vmem:[%s1276_s0 + $0x198] sm:$0xff]  ;;  %v665_v5 = vld [vmem:[%s1276_s0 + $0x1a0] sm:$0xff]  ;;  %v674_v8 = vsel %vm72_vm0, %v633_v58, 0.0  ;;  %v678_v10 = vsel %vm72_vm0, %v638_v59, 0.0 }
   0xe   :  { %1310 = vst [vmem:[#allocation16_spill] sm:$0xff] %v655_v3  ;;  %v670_v7 = vld [vmem:[%s1276_s0 + $0x1a8] sm:$0xff]  ;;  %1311 = vst [vmem:[#allocation17_spill] sm:$0xff] %v674_v8  ;;  %v682_v11 = vsel %vm72_vm0, %v643_v60, 0.0  ;;  %v687_v13 = vld [vmem:[%s1276_s0 + $0x60] sm:$0xff] }
   0xf   :  { %v87_v48 = vadd.f32 %v86_v24, %v85_v35  ;;  %1312 = vst [vmem:[#allocation18_spill] sm:$0xff] %v678_v10  ;;  %1313 = vst [vmem:[#allocation19_spill] sm:$0xff] %v682_v11  ;;  %v692_v14 = vld [vmem:[%s1276_s0 + $0x1b0] sm:$0xff]  ;;  %v697_v16 = vld [vmem:[%s1276_s0 + $0x1b8] sm:$0xff]  ;;  %v706_v24 = vsel %vm72_vm0, %v660_v4, 0.0  ;;  %v714_v35 = vsel %vm72_vm0, %v670_v7, 0.0 }
  0x10   :  { %v702_v19 = vld [vmem:[%s1276_s0 + $0x1c0] sm:$0xff]  ;;  %1314 = vst [vmem:[#allocation20_spill] sm:$0xff] %v706_v24  ;;  %1316 = vst [vmem:[#allocation22_spill] sm:$0xff] %v714_v35  ;;  %v737_v35 = vsel %vm72_vm0, %v697_v16, 0.0  ;;  %v751_v10 = vld [vmem:[%s1276_s0 + $0x1e8] sm:$0xff] }
  0x11   :  { %v89_v61 = vadd.f32 %v88_v25, %v87_v48  ;;  %v710_v25 = vsel %vm72_vm0, %v665_v5, 0.0  ;;  %v719_v48 = vld [vmem:[%s1276_s0 + $0x1c8] sm:$0xff]  ;;  %1318 = vst [vmem:[#allocation24_spill] sm:$0xff] %v737_v35  ;;  %v741_v24 = vsel %vm72_vm0, %v702_v19, 0.0  ;;  %v746_v11 = vld [vmem:[%s1276_s0 + $0x1e0] sm:$0xff]  ;;  %v773_v63 = vld [vmem:[%s1276_s0 + $0x1f8] sm:$0xff] }
  0x12   :  { %1315 = vst [vmem:[#allocation21_spill] sm:$0xff] %v710_v25  ;;  %v733_v25 = vsel %vm72_vm0, %v692_v14, 0.0  ;;  %1319 = vst [vmem:[#allocation25_spill] sm:$0xff] %v741_v24  ;;  %v760_v8 = vsel %vm72_vm0, %v719_v48, 0.0  ;;  %v795_v57 = vsel %vm72_vm0, %v773_v63, 0.0  ;;  %v824_v55 = vld [vmem:[%s1276_s0 + $0x90] sm:$0xff] }
  0x13   :  { %v91_v23 = vadd.f32 %v90_v29, %v89_v61  ;;  %v724_v29 = vld [vmem:[%s1276_s0 + $0x1d0] sm:$0xff]  ;;  %v729_v61 = vld [vmem:[%s1276_s0 + $0x1d8] sm:$0xff]  ;;  %1317 = vst [vmem:[#allocation23_spill] sm:$0xff] %v733_v25  ;;  %1321 = vst [vmem:[#allocation27_spill] sm:$0xff] %v760_v8  ;;  %v783_v8 = vsel %vm72_vm0, %v751_v10, 0.0 }
  0x14   :  { %v756_v25 = vld [vmem:[%s1276_s0 + $0x1f0] sm:$0xff]  ;;  %v764_v24 = vsel %vm72_vm0, %v724_v29, 0.0  ;;  %v768_v3 = vsel %vm72_vm0, %v729_v61, 0.0  ;;  %1324 = vst [vmem:[#allocation30_spill] sm:$0xff] %v773_v63  ;;  %1326 = vst [vmem:[#allocation32_spill] sm:$0xff] %v783_v8  ;;  %v829_v51 = vld [vmem:[%s1276_s0 + $0x98] sm:$0xff] }
  0x15   :  { %1320 = vst [vmem:[#allocation26_spill] sm:$0xff] %v756_v25  ;;  %v93_v35 = vadd.f32 %v92_v30, %v91_v23  ;;  %1322 = vst [vmem:[#allocation28_spill] sm:$0xff] %v764_v24  ;;  %v96_v30 = vsel %vm72_vm0, %v687_v13, 0.0  ;;  %v779_v23 = vsel %vm72_vm0, %v746_v11, 0.0  ;;  %v787_v24 = vsel %vm72_vm0, %v756_v25, 0.0  ;;  %v22_v8 = vld [vmem:[%s1276_s0 + $0x70] sm:$0xff] }
  0x16   :  { %1323 = vst [vmem:[#allocation29_spill] sm:$0xff] %v768_v3  ;;  %1325 = vst [vmem:[#allocation31_spill] sm:$0xff] %v779_v23  ;;  %v21_v3 = vld [vmem:[%s1276_s0 + $0x68] sm:$0xff]  ;;  %v834_v50 = vld [vmem:[%s1276_s0 + $0xa0] sm:$0xff]  ;;  %v110_v38 = vsel %vm72_vm0, %v829_v51, 0.0 }
  0x17   :  { %1327 = vst [vmem:[#allocation33_spill] sm:$0xff] %v787_v24  ;;  %v95_v62 = vadd.f32 %v520_v31, %v93_v35  ;;  %1328 = vst [vmem:[#allocation34_spill] sm:$0xff] %v795_v57  ;;  %v98_v23 = vsel %vm72_vm0, %v21_v3, 0.0  ;;  %v804_v24 = vld [vmem:[%s1276_s0 + $0x78] sm:$0xff]  ;;  %v809_v31 = vld [vmem:[%s1276_s0 + $0x80] sm:$0xff]  ;;  %v100_v57 = vsel %vm72_vm0, %v22_v8, 0.0 }
  0x18   :  { %1329 = vst [vmem:[#allocation35_spill] sm:$0xff] %v804_v24  ;;  %1330 = vst [vmem:[#allocation36_spill] sm:$0xff] %v809_v31  ;;  %v814_v35 = vld [vmem:[%s1276_s0 + $0x88] sm:$0xff]  ;;  %v850_v42 = vld [vmem:[%s1276_s0 + $0xb0] sm:$0xff]  ;;  %v112_v37 = vsel %vm72_vm0, %v834_v50, 0.0 }
  0x19   :  { %v97_v56 = vadd.f32 %v96_v30, %v95_v62  ;;  %1331 = vst [vmem:[#allocation37_spill] sm:$0xff] %v814_v35  ;;  %v206_v62 = vmul.f32 %v424_v0, %v424_v0  ;;  %v207_v30 = vmul.f32 %v429_v1, %v429_v1  ;;  %1332 = vst [vmem:[#allocation38_spill] sm:$0xff] %v824_v55  ;;  %v102_v0 = vsel %vm72_vm0, %v804_v24, 0.0  ;;  %v845_v43 = vld [vmem:[%s1276_s0 + $0xa8] sm:$0xff]  ;;  %v891_v63 = vld [vmem:[%s1276_s0 + $0xd8] sm:$0xff] }
  0x1a   :  { %1333 = vst [vmem:[#allocation39_spill] sm:$0xff] %v829_v51  ;;  %1334 = vst [vmem:[#allocation40_spill] sm:$0xff] %v834_v50  ;;  %v104_v1 = vsel %vm72_vm0, %v809_v31, 0.0  ;;  %v106_v44 = vsel %vm72_vm0, %v814_v35, 0.0  ;;  %v868_v35 = vld [vmem:[%s1276_s0 + $0xc0] sm:$0xff]  ;;  %v873_v31 = vld [vmem:[%s1276_s0 + $0xc8] sm:$0xff]  ;;  %v209_v24 = vmul.f32 %v445_v6, %v445_v6 }
  0x1b   :  { %v99_v49 = vadd.f32 %v98_v23, %v97_v56  ;;  %1335 = vst [vmem:[#allocation41_spill] sm:$0xff] %v845_v43  ;;  %1336 = vst [vmem:[#allocation42_spill] sm:$0xff] %v850_v42  ;;  %v855_v56 = vld [vmem:[%s1276_s0 + $0xb8] sm:$0xff]  ;;  %v108_v23 = vsel %vm72_vm0, %v824_v55, 0.0  ;;  %v878_v51 = vld [vmem:[%s1276_s0 + $0xd0] sm:$0xff]  ;;  %v114_v50 = vsel %vm72_vm0, %v845_v43, 0.0 }
  0x1c   :  { %1337 = vst [vmem:[#allocation43_spill] sm:$0xff] %v855_v56  ;;  %1338 = vst [vmem:[#allocation44_spill] sm:$0xff] %v868_v35  ;;  %v884_v2 = vsel %vm72_vm0, %v850_v42, 0.0  ;;  %v896_v25 = vld [vmem:[%s1276_s0 + $0xe0] sm:$0xff]  ;;  %v908_v6 = vsel %vm72_vm0, %v873_v31, 0.0  ;;  %v912_v42 = vsel %vm72_vm0, %v878_v51, 0.0 }
  0x1d   :  { %1339 = vst [vmem:[#allocation45_spill] sm:$0xff] %v873_v31  ;;  %1340 = vst [vmem:[#allocation46_spill] sm:$0xff] %v878_v51  ;;  %v101_v55 = vadd.f32 %v100_v57, %v99_v49  ;;  %v900_v49 = vsel %vm72_vm0, %v855_v56, 0.0  ;;  %v904_v57 = vsel %vm72_vm0, %v868_v35, 0.0  ;;  %v917_v43 = vld [vmem:[%s1276_s0 + $0xe8] sm:$0xff]  ;;  %v922_v56 = vld [vmem:[%s1276_s0 + $0xf0] sm:$0xff]  ;;  %v210_v51 = vmul.f32 %v452_v9, %v452_v9 }
  0x1e   :  { %1341 = vst [vmem:[#allocation47_spill] sm:$0xff] %v891_v63  ;;  %1342 = vst [vmem:[#allocation48_spill] sm:$0xff] %v896_v25  ;;  %v930_v31 = vsel %vm72_vm0, %v896_v25, 0.0  ;;  %v213_v25 = vmul.f32 %v471_v17, %v471_v17  ;;  %v214_v9 = vmul.f32 %v476_v18, %v476_v18  ;;  %v239_v17 = vmul.f32 %v502_v26, %v502_v26 }
  0x1f   :  { %1343 = vst [vmem:[#allocation49_spill] sm:$0xff] %v904_v57  ;;  %1344 = vst [vmem:[#allocation50_spill] sm:$0xff] %v908_v6  ;;  %v103_v35 = vadd.f32 %v102_v0, %v101_v55  ;;  %v926_v57 = vsel %vm72_vm0, %v891_v63, 0.0  ;;  %v940_v6 = vsel %vm72_vm0, %v922_v56, 0.0  ;;  %v211_v55 = vmul.f32 %v459_v12, %v459_v12 }
  0x20   :  { %1345 = vst [vmem:[#allocation51_spill] sm:$0xff] %v912_v42  ;;  %1346 = vst [vmem:[#allocation52_spill] sm:$0xff] %v917_v43  ;;  %v936_v42 = vsel %vm72_vm0, %v917_v43, 0.0  ;;  %v212_v0 = vmul.f32 %v466_v15, %v466_v15  ;;  %v215_v43 = vmul.f32 %v483_v20, %v483_v20  ;;  %v218_v12 = vmul.f32 %v687_v13, %v687_v13 }
  0x21   :  { %1347 = vst [vmem:[#allocation53_spill] sm:$0xff] %v922_v56  ;;  %1348 = vst [vmem:[#allocation54_spill] sm:$0xff] %v940_v6  ;;  %v105_v63 = vadd.f32 %v104_v1, %v103_v35  ;;  %v216_v56 = vmul.f32 %v488_v21, %v488_v21  ;;  %v217_v6 = vmul.f32 %v493_v22, %v493_v22 }
  0x22   :  { %v958_v15 = vmul.f32 %v21_v3, %v21_v3  ;;  %v960_v1 = vmul.f32 %v22_v8, %v22_v8  ;;  %v240_v18 = vmul.f32 %v507_v27, %v507_v27  ;;  %v241_v20 = vmul.f32 %v512_v28, %v512_v28 }
  0x23   :  { %v107_v35 = vadd.f32 %v106_v44, %v105_v63  ;;  %v242_v21 = vmul.f32 %v525_v32, %v525_v32  ;;  %v243_v22 = vmul.f32 %v530_v33, %v530_v33  ;;  %v244_v44 = vmul.f32 %v535_v34, %v535_v34 }
  0x24   :  { %v245_v3 = vmul.f32 %v552_v39, %v552_v39  ;;  %v246_v26 = vmul.f32 %v557_v40, %v557_v40  ;;  %v247_v27 = vmul.f32 %v562_v41, %v562_v41  ;;  %v248_v28 = vmul.f32 %v579_v45, %v579_v45 }
  0x25   :  { %v109_v63 = vadd.f32 %v108_v23, %v107_v35  ;;  %v249_v32 = vmul.f32 %v584_v46, %v584_v46  ;;  %v270_v33 = vsel %vm72_vm0, %v206_v62, 0.0  ;;  %v271_v34 = vsel %vm72_vm0, %v207_v30, 0.0 }
  0x26   :  { %v250_v39 = vmul.f32 %v589_v47, %v589_v47  ;;  %v272_v13 = vadd.f32 %v271_v34, %v270_v33  ;;  %v273_v40 = vsel %vm72_vm0, %v208_v36, 0.0  ;;  %v251_v41 = vmul.f32 %v606_v52, %v606_v52  ;;  %v1350_v33 = vld [vmem:[#allocation30_spill] sm:$0xff] }
  0x27   :  { %v111_v8 = vadd.f32 %v110_v38, %v109_v63  ;;  %v252_v45 = vmul.f32 %v611_v53, %v611_v53  ;;  %v253_v46 = vmul.f32 %v616_v54, %v616_v54  ;;  %v275_v62 = vsel %vm72_vm0, %v209_v24, 0.0  ;;  %v1349_v63 = vld [vmem:[#allocation26_spill] sm:$0xff] }
  0x28   :  { %v254_v38 = vmul.f32 %v633_v58, %v633_v58  ;;  %v255_v47 = vmul.f32 %v638_v59, %v638_v59  ;;  %v274_v30 = vadd.f32 %v273_v40, %v272_v13  ;;  %v256_v36 = vmul.f32 %v643_v60, %v643_v60  ;;  %v1351_v40 = vld [vmem:[#allocation49_spill] sm:$0xff] }
  0x29   :  { %v113_v23 = vadd.f32 %v112_v37, %v111_v8  ;;  %v257_v52 = vmul.f32 %v660_v4, %v660_v4  ;;  %v258_v53 = vmul.f32 %v665_v5, %v665_v5  ;;  %v277_v54 = vsel %vm72_vm0, %v210_v51, 0.0 }
  0x2a   :  { %v259_v37 = vmul.f32 %v670_v7, %v670_v7  ;;  %v260_v58 = vmul.f32 %v692_v14, %v692_v14  ;;  %v276_v59 = vadd.f32 %v275_v62, %v274_v30  ;;  %v261_v35 = vmul.f32 %v697_v16, %v697_v16 }
  0x2b   :  { %v115_v24 = vadd.f32 %v114_v50, %v113_v23  ;;  %v262_v60 = vmul.f32 %v702_v19, %v702_v19  ;;  %v263_v4 = vmul.f32 %v719_v48, %v719_v48  ;;  %v279_v5 = vsel %vm72_vm0, %v211_v55, 0.0 }
  0x2c   :  { %v264_v51 = vmul.f32 %v724_v29, %v724_v29  ;;  %v265_v7 = vmul.f32 %v729_v61, %v729_v61  ;;  %v278_v14 = vadd.f32 %v277_v54, %v276_v59  ;;  %v266_v16 = vmul.f32 %v746_v11, %v746_v11 }
  0x2d   :  { %v117_v50 = vadd.f32 %v884_v2, %v115_v24  ;;  %v267_v19 = vmul.f32 %v751_v10, %v751_v10  ;;  %v268_v48 = vmul.f32 %v1349_v63, %v1349_v63  ;;  %v281_v55 = vsel %vm72_vm0, %v212_v0, 0.0  ;;  %v1353_v24 = vld [vmem:[#allocation51_spill] sm:$0xff] }
  0x2e   :  { %v269_v29 = vmul.f32 %v1350_v33, %v1350_v33  ;;  %v280_v34 = vadd.f32 %v279_v5, %v278_v14  ;;  %v283_v61 = vsel %vm72_vm0, %v213_v25, 0.0  ;;  %v285_v8 = vsel %vm72_vm0, %v214_v9, 0.0  ;;  %v1355_v33 = vld [vmem:[#allocation54_spill] sm:$0xff] }
  0x2f   :  { %v119_v2 = vadd.f32 %v900_v49, %v117_v50  ;;  %v287_v11 = vsel %vm72_vm0, %v215_v43, 0.0  ;;  %v289_v13 = vsel %vm72_vm0, %v216_v56, 0.0  ;;  %v291_v10 = vsel %vm72_vm0, %v217_v6, 0.0  ;;  %v1352_v6 = vld [vmem:[#allocation50_spill] sm:$0xff] }
  0x30   :  { %v282_v23 = vadd.f32 %v281_v55, %v280_v34  ;;  %v293_v0 = vsel %vm72_vm0, %v218_v12, 0.0  ;;  %v1041_v49 = vsel %vm72_vm0, %v239_v17, 0.0  ;;  %v1044_v30 = vsel %vm72_vm0, %v240_v18, 0.0  ;;  %v1354_v55 = vld [vmem:[#allocation35_spill] sm:$0xff] }
  0x31   :  { %v121_v62 = vadd.f32 %v1351_v40, %v119_v2  ;;  %v1047_v25 = vsel %vm72_vm0, %v241_v20, 0.0  ;;  %v1050_v43 = vsel %vm72_vm0, %v242_v21, 0.0  ;;  %v1053_v56 = vsel %vm72_vm0, %v243_v22, 0.0 }
  0x32   :  { %v284_v54 = vadd.f32 %v283_v61, %v282_v23  ;;  %v1057_v12 = vsel %vm72_vm0, %v244_v44, 0.0  ;;  %v1060_v17 = vsel %vm72_vm0, %v245_v3, 0.0  ;;  %v1063_v18 = vsel %vm72_vm0, %v246_v26, 0.0  ;;  %v1356_v61 = vld [vmem:[#allocation36_spill] sm:$0xff] }
  0x33   :  { %v123_v9 = vadd.f32 %v1352_v6, %v121_v62  ;;  %v1066_v20 = vsel %vm72_vm0, %v247_v27, 0.0  ;;  %v1069_v21 = vsel %vm72_vm0, %v248_v28, 0.0  ;;  %v1072_v22 = vsel %vm72_vm0, %v249_v32, 0.0 }
  0x34   :  { %v286_v5 = vadd.f32 %v285_v8, %v284_v54  ;;  %v1076_v44 = vsel %vm72_vm0, %v250_v39, 0.0  ;;  %v1079_v3 = vsel %vm72_vm0, %v251_v41, 0.0  ;;  %v1082_v26 = vsel %vm72_vm0, %v252_v45, 0.0 }
  0x35   :  { %v125_v59 = vadd.f32 %v1353_v24, %v123_v9  ;;  %v1085_v27 = vsel %vm72_vm0, %v253_v46, 0.0  ;;  %v1088_v28 = vsel %vm72_vm0, %v254_v38, 0.0  ;;  %v1091_v32 = vsel %vm72_vm0, %v255_v47, 0.0  ;;  %v1358_v9 = vld [vmem:[#allocation38_spill] sm:$0xff] }
  0x36   :  { %v288_v14 = vadd.f32 %v287_v11, %v286_v5  ;;  %v1095_v39 = vsel %vm72_vm0, %v256_v36, 0.0  ;;  %v1098_v41 = vsel %vm72_vm0, %v257_v52, 0.0  ;;  %v1101_v45 = vsel %vm72_vm0, %v258_v53, 0.0  ;;  %v1359_v24 = vld [vmem:[#allocation2_spill] sm:$0xff] }
  0x37   :  { %v127_v50 = vadd.f32 %v926_v57, %v125_v59  ;;  %v1104_v46 = vsel %vm72_vm0, %v259_v37, 0.0  ;;  %v1107_v38 = vsel %vm72_vm0, %v260_v58, 0.0  ;;  %v1110_v47 = vsel %vm72_vm0, %v261_v35, 0.0 }
  0x38   :  { %v290_v63 = vadd.f32 %v289_v13, %v288_v14  ;;  %v1114_v36 = vsel %vm72_vm0, %v262_v60, 0.0  ;;  %v1117_v52 = vsel %vm72_vm0, %v263_v4, 0.0  ;;  %v1120_v53 = vsel %vm72_vm0, %v264_v51, 0.0 }
  0x39   :  { %v129_v57 = vadd.f32 %v930_v31, %v127_v50  ;;  %v1123_v37 = vsel %vm72_vm0, %v265_v7, 0.0  ;;  %v1126_v58 = vsel %vm72_vm0, %v266_v16, 0.0  ;;  %v1129_v35 = vsel %vm72_vm0, %v267_v19, 0.0  ;;  %v1134_v31 = vld [vmem:[%s1276_s0 + $0xf8] sm:$0xff]  ;;  %v1360_v50 = vld [vmem:[#allocation39_spill] sm:$0xff] }
  0x3a   :  { %v292_v4 = vadd.f32 %v291_v10, %v290_v63  ;;  %v1138_v51 = vsel %vm72_vm0, %v268_v48, 0.0  ;;  %v1141_v7 = vsel %vm72_vm0, %v269_v29, 0.0  ;;  %v134_v16 = vsel %vm72_vm0, %v1134_v31, 0.0 }
  0x3b   :  { %v131_v60 = vadd.f32 %v936_v42, %v129_v57  ;;  %v221_v19 = vmul.f32 %v1354_v55, %v1354_v55  ;;  %v295_v2 = vsel %vm72_vm0, %v958_v15, 0.0  ;;  %v1152_v42 = vld [vmem:[%s1276_s0 + $0x100] sm:$0xff]  ;;  %v222_v8 = vmul.f32 %v1356_v61, %v1356_v61  ;;  %v1357_v15 = vld [vmem:[#allocation37_spill] sm:$0xff]  ;;  %v1361_v57 = vld [vmem:[#allocation3_spill] sm:$0xff] }
  0x3c   :  { %v294_v34 = vadd.f32 %v293_v0, %v292_v4  ;;  %v136_v29 = vsel %vm72_vm0, %v1152_v42, 0.0  ;;  %v297_v11 = vsel %vm72_vm0, %v960_v1, 0.0  ;;  %v223_v40 = vmul.f32 %v1357_v15, %v1357_v15  ;;  %v1362_v4 = vld [vmem:[#allocation40_spill] sm:$0xff]  ;;  %v1365_v61 = vld [vmem:[#allocation5_spill] sm:$0xff] }
  0x3d   :  { %v133_v48 = vadd.f32 %v1355_v33, %v131_v60  ;;  %v299_v62 = vsel %vm72_vm0, %v221_v19, 0.0  ;;  %v224_v0 = vmul.f32 %v1358_v9, %v1358_v9  ;;  %v301_v54 = vsel %vm72_vm0, %v222_v8, 0.0  ;;  %v1363_v19 = vld [vmem:[#allocation4_spill] sm:$0xff] }
  0x3e   :  { %v296_v10 = vadd.f32 %v295_v2, %v294_v34  ;;  %v225_v1 = vmul.f32 %v1360_v50, %v1360_v50  ;;  %v303_v14 = vsel %vm72_vm0, %v223_v40, 0.0  ;;  %v1367_v40 = vld [vmem:[#allocation6_spill] sm:$0xff] }
  0x3f   :  { %v135_v13 = vadd.f32 %v134_v16, %v133_v48  ;;  %v226_v16 = vmul.f32 %v1362_v4, %v1362_v4  ;;  %v305_v55 = vsel %vm72_vm0, %v224_v0, 0.0  ;;  %v1364_v48 = vld [vmem:[#allocation41_spill] sm:$0xff] }
  0x40   :  { %v298_v6 = vadd.f32 %v297_v11, %v296_v10  ;;  %v227_v34 = vmul.f32 %v1364_v48, %v1364_v48 }
  0x41   :  { %v137_v23 = vadd.f32 %v136_v29, %v135_v13  ;;  %v307_v29 = vsel %vm72_vm0, %v225_v1, 0.0  ;;  %v1366_v13 = vld [vmem:[#allocation42_spill] sm:$0xff]  ;;  %v309_v15 = vsel %vm72_vm0, %v226_v16, 0.0 }
  0x42   :  { %v300_v5 = vadd.f32 %v299_v62, %v298_v6  ;;  %v228_v10 = vmul.f32 %v1366_v13, %v1366_v13  ;;  %v1368_v6 = vld [vmem:[#allocation43_spill] sm:$0xff]  ;;  %v311_v0 = vsel %vm72_vm0, %v227_v34, 0.0 }
  0x43   :  { %v139_v59 = vadd.f32 %v1359_v24, %v137_v23  ;;  %v229_v9 = vmul.f32 %v1368_v6, %v1368_v6 }
  0x44   :  { %v302_v60 = vadd.f32 %v301_v54, %v300_v5  ;;  %v1369_v54 = vld [vmem:[#allocation7_spill] sm:$0xff]  ;;  %v1370_v5 = vld [vmem:[#allocation44_spill] sm:$0xff]  ;;  %v313_v1 = vsel %vm72_vm0, %v228_v10, 0.0 }
  0x45   :  { %v141_v63 = vadd.f32 %v1361_v57, %v139_v59  ;;  %v230_v50 = vmul.f32 %v1370_v5, %v1370_v5  ;;  %v315_v16 = vsel %vm72_vm0, %v229_v9, 0.0 }
  0x46   :  { %v304_v33 = vadd.f32 %v303_v14, %v302_v60  ;;  %v1371_v14 = vld [vmem:[#allocation8_spill] sm:$0xff]  ;;  %v1372_v60 = vld [vmem:[#allocation45_spill] sm:$0xff] }
  0x47   :  { %v143_v2 = vadd.f32 %v1363_v19, %v141_v63  ;;  %v231_v4 = vmul.f32 %v1372_v60, %v1372_v60  ;;  %v317_v34 = vsel %vm72_vm0, %v230_v50, 0.0 }
  0x48   :  { %v306_v11 = vadd.f32 %v305_v55, %v304_v33  ;;  %v1373_v55 = vld [vmem:[#allocation9_spill] sm:$0xff]  ;;  %v1374_v33 = vld [vmem:[#allocation46_spill] sm:$0xff] }
  0x49   :  { %v145_v8 = vadd.f32 %v1365_v61, %v143_v2  ;;  %v232_v48 = vmul.f32 %v1374_v33, %v1374_v33  ;;  %v319_v10 = vsel %vm72_vm0, %v231_v4, 0.0 }
  0x4a   :  { %v308_v23 = vadd.f32 %v307_v29, %v306_v11  ;;  %v1375_v29 = vld [vmem:[#allocation10_spill] sm:$0xff]  ;;  %v1376_v11 = vld [vmem:[#allocation47_spill] sm:$0xff] }
  0x4b   :  { %v147_v62 = vadd.f32 %v1367_v40, %v145_v8  ;;  %v233_v13 = vmul.f32 %v1376_v11, %v1376_v11  ;;  %v321_v9 = vsel %vm72_vm0, %v232_v48, 0.0  ;;  %v1384_v48 = vld [vmem:[#allocation15_spill] sm:$0xff]  ;;  %v1385_v11 = vld [vmem:[#allocation16_spill] sm:$0xff] }
  0x4c   :  { %v310_v59 = vadd.f32 %v309_v15, %v308_v23  ;;  %v1377_v15 = vld [vmem:[#allocation11_spill] sm:$0xff]  ;;  %v1378_v23 = vld [vmem:[#allocation48_spill] sm:$0xff] }
  0x4d   :  { %v149_v24 = vadd.f32 %v1369_v54, %v147_v62  ;;  %v234_v6 = vmul.f32 %v1378_v23, %v1378_v23  ;;  %v323_v50 = vsel %vm72_vm0, %v233_v13, 0.0 }
  0x4e   :  { %v312_v63 = vadd.f32 %v311_v0, %v310_v59  ;;  %v1379_v0 = vld [vmem:[#allocation12_spill] sm:$0xff] }
  0x4f   :  { %v151_v57 = vadd.f32 %v1371_v14, %v149_v24  ;;  %v1380_v59 = vld [vmem:[#allocation52_spill] sm:$0xff]  ;;  %v325_v4 = vsel %vm72_vm0, %v234_v6, 0.0  ;;  %v1387_v6 = vld [vmem:[#allocation18_spill] sm:$0xff] }
  0x50   :  { %v314_v2 = vadd.f32 %v313_v1, %v312_v63  ;;  %v235_v5 = vmul.f32 %v1380_v59, %v1380_v59  ;;  %v1381_v1 = vld [vmem:[#allocation13_spill] sm:$0xff] }
  0x51   :  { %v153_v19 = vadd.f32 %v1373_v55, %v151_v57  ;;  %v1382_v63 = vld [vmem:[#allocation53_spill] sm:$0xff] }
  0x52   :  { %v316_v8 = vadd.f32 %v315_v16, %v314_v2  ;;  %v236_v60 = vmul.f32 %v1382_v63, %v1382_v63  ;;  %v1383_v16 = vld [vmem:[#allocation14_spill] sm:$0xff]  ;;  %v237_v2 = vmul.f32 %v1134_v31, %v1134_v31  ;;  %v327_v33 = vsel %vm72_vm0, %v235_v5, 0.0  ;;  %v1389_v5 = vld [vmem:[#allocation20_spill] sm:$0xff] }
  0x53   :  { %v155_v61 = vadd.f32 %v1375_v29, %v153_v19  ;;  %v1391_v63 = vld [vmem:[#allocation22_spill] sm:$0xff] }
  0x54   :  { %v318_v62 = vadd.f32 %v317_v34, %v316_v8  ;;  %v329_v8 = vsel %vm72_vm0, %v236_v60, 0.0 }
  0x55   :  { %v157_v40 = vadd.f32 %v1377_v15, %v155_v61  ;;  %v238_v61 = vmul.f32 %v1152_v42, %v1152_v42  ;;  %v331_v15 = vsel %vm72_vm0, %v237_v2, 0.0  ;;  %v1393_v2 = vld [vmem:[#allocation24_spill] sm:$0xff] }
  0x56   :  { %v320_v24 = vadd.f32 %v319_v10, %v318_v62 }
  0x57   :  { %v159_v54 = vadd.f32 %v1379_v0, %v157_v40  ;;  %v1386_v40 = vld [vmem:[#allocation17_spill] sm:$0xff]  ;;  %v333_v31 = vsel %vm72_vm0, %v238_v61, 0.0  ;;  %v1395_v61 = vld [vmem:[#allocation27_spill] sm:$0xff] }
  0x58   :  { %v322_v57 = vadd.f32 %v321_v9, %v320_v24 }
  0x59   :  { %v161_v14 = vadd.f32 %v1381_v1, %v159_v54  ;;  %v1388_v54 = vld [vmem:[#allocation19_spill] sm:$0xff]  ;;  %v1390_v1 = vld [vmem:[#allocation21_spill] sm:$0xff] }
  0x5a   :  { %v324_v19 = vadd.f32 %v323_v50, %v322_v57 }
  0x5b   :  { %v163_v55 = vadd.f32 %v1383_v16, %v161_v14  ;;  %v1392_v16 = vld [vmem:[#allocation23_spill] sm:$0xff] }
  0x5c   :  { %v326_v29 = vadd.f32 %v325_v4, %v324_v19 }
  0x5d   :  { %v165_v34 = vadd.f32 %v1384_v48, %v163_v55 }
  0x5e   :  { %v328_v10 = vadd.f32 %v327_v33, %v326_v29 }
  0x5f   :  { %v167_v13 = vadd.f32 %v1385_v11, %v165_v34  ;;  %v1394_v34 = vld [vmem:[#allocation25_spill] sm:$0xff]  ;;  %v1396_v11 = vld [vmem:[#allocation28_spill] sm:$0xff] }
  0x60   :  { %v330_v23 = vadd.f32 %v329_v8, %v328_v10  ;;  %v1397_v10 = vld [vmem:[#allocation29_spill] sm:$0xff] }
  0x61   :  { %v169_v62 = vadd.f32 %v1386_v40, %v167_v13  ;;  %v1398_v40 = vld [vmem:[#allocation31_spill] sm:$0xff] }
  0x62   :  { %v332_v0 = vadd.f32 %v331_v15, %v330_v23  ;;  %v1399_v23 = vld [vmem:[#allocation32_spill] sm:$0xff] }
  0x63   :  { %v171_v9 = vadd.f32 %v1387_v6, %v169_v62  ;;  %v1400_v6 = vld [vmem:[#allocation33_spill] sm:$0xff] }
  0x64   :  { %v334_v59 = vadd.f32 %v333_v31, %v332_v0  ;;  %v1401_v0 = vld [vmem:[#allocation34_spill] sm:$0xff] }
  0x65   :  { %v173_v24 = vadd.f32 %v1388_v54, %v171_v9 }
  0x66   :  { %v336_v50 = vadd.f32 %v1041_v49, %v334_v59 }
  0x67   :  { %v175_v42 = vadd.f32 %v1389_v5, %v173_v24 }
  0x68   :  { %v338_v57 = vadd.f32 %v1044_v30, %v336_v50 }
  0x69   :  { %v177_v14 = vadd.f32 %v1390_v1, %v175_v42 }
  0x6a   :  { %v340_v4 = vadd.f32 %v1047_v25, %v338_v57 }
  0x6b   :  { %v179_v60 = vadd.f32 %v1391_v63, %v177_v14 }
  0x6c   :  { %v342_v19 = vadd.f32 %v1050_v43, %v340_v4 }
  0x6d   :  { %v181_v55 = vadd.f32 %v1392_v16, %v179_v60 }
  0x6e   :  { %v344_v48 = vadd.f32 %v1053_v56, %v342_v19 }
  0x6f   :  { %v183_v33 = vadd.f32 %v1393_v2, %v181_v55 }
  0x70   :  { %v346_v49 = vadd.f32 %v1057_v12, %v344_v48 }
  0x71   :  { %v185_v29 = vadd.f32 %v1394_v34, %v183_v33 }
  0x72   :  { %v348_v30 = vadd.f32 %v1060_v17, %v346_v49 }
  0x73   :  { %v187_v8 = vadd.f32 %v1395_v61, %v185_v29 }
  0x74   :  { %v350_v25 = vadd.f32 %v1063_v18, %v348_v30 }
  0x75   :  { %v189_v13 = vadd.f32 %v1396_v11, %v187_v8 }
  0x76   :  { %v352_v43 = vadd.f32 %v1066_v20, %v350_v25 }
  0x77   :  { %v191_v15 = vadd.f32 %v1397_v10, %v189_v13 }
  0x78   :  { %v354_v56 = vadd.f32 %v1069_v21, %v352_v43 }
  0x79   :  { %v193_v62 = vadd.f32 %v1398_v40, %v191_v15 }
  0x7a   :  { %v356_v12 = vadd.f32 %v1072_v22, %v354_v56 }
  0x7b   :  { %v195_v31 = vadd.f32 %v1399_v23, %v193_v62 }
  0x7c   :  { %v358_v17 = vadd.f32 %v1076_v44, %v356_v12 }
  0x7d   :  { %v197_v9 = vadd.f32 %v1400_v6, %v195_v31 }
  0x7e   :  { %v360_v18 = vadd.f32 %v1079_v3, %v358_v17 }
  0x7f   :  { %v199_v54 = vadd.f32 %v1401_v0, %v197_v9 }
  0x80   :  { %v362_v24 = vadd.f32 %v1082_v26, %v360_v18 }
  0x81   :  { %v200_v1 = vrot.slane %v199_v54, 4 }
  0x82   :  { %v364_v20 = vadd.f32 %v1085_v27, %v362_v24 }
  0x84   :  { %v366_v59 = vadd.f32 %v1088_v28, %v364_v20 }
  0x86   :  { %v368_v21 = vadd.f32 %v1091_v32, %v366_v59 }
  0x88   :  { %v370_v5 = vadd.f32 %v1095_v39, %v368_v21  ;;  %v201_v39 = vadd.f32 %v200_v1, %v199_v54 }
  0x8a   :  { %v372_v22 = vadd.f32 %v1098_v41, %v370_v5  ;;  %v202_v14 = vrot.slane %v201_v39, 2 }
  0x8c   :  { %v374_v42 = vadd.f32 %v1101_v45, %v372_v22 }
  0x8e   :  { %v376_v44 = vadd.f32 %v1104_v46, %v374_v42 }
  0x90   :  { %v378_v50 = vadd.f32 %v1107_v38, %v376_v44 }
  0x92   :  { %v380_v3 = vadd.f32 %v1110_v47, %v378_v50  ;;  %v203_v47 = vadd.f32 %v202_v14, %v201_v39 }
  0x94   :  { %v382_v26 = vadd.f32 %v1114_v36, %v380_v3  ;;  %v204_v63 = vrot.slane %v203_v47, 1 }
  0x96   :  { %v384_v27 = vadd.f32 %v1117_v52, %v382_v26  ;;  %v205_v4 = vadd.f32 %v204_v63, %v203_v47 }
  0x98   :  { %v386_v28 = vadd.f32 %v1120_v53, %v384_v27 }
  0x9a   :  { %v388_v32 = vadd.f32 %v1123_v37, %v386_v28 }
  0x9c   :  { %v390_v41 = vadd.f32 %v1126_v58, %v388_v32 }
  0x9e   :  { %v392_v45 = vadd.f32 %v1129_v35, %v390_v41 }
  0xa0   :  { %v394_v46 = vadd.f32 %v1138_v51, %v392_v45 }
  0xa2   :  { %v396_v38 = vadd.f32 %v1141_v7, %v394_v46 }
  0xa4   :  { %v397_v57 = vrot.slane %v396_v38, 4 }
  0xa6   :  { %v398_v36 = vadd.f32 %v397_v57, %v396_v38 }
  0xa8   :  { %v399_v52 = vrot.slane %v398_v36, 2 }
  0xaa   :  { %v400_v60 = vadd.f32 %v399_v52, %v398_v36 }
  0xac   :  { %v401_v53 = vrot.slane %v400_v60, 1 }
  0xae   :  { %v402_v37 = vadd.f32 %v401_v53, %v400_v60 }
  0xb0   :  { %v404_v16 = vsel %vm403_vm1, %v205_v4, %v402_v37 }
  0xb1   :  { %406 = vst.msk [vmem:[%s1277_s1] sm:$0x3] %vm405_vm2, %v404_v16 }

// kernel: resnetv2_bottleneck_forward.5
= control target key start
LH: loop header
LB: loop body
LE: loop exit
PB: predicated region body
PF: predicated region fallthrough
CT: control target
= control target key end

     0   :  { %v1679_v8 = vmov 1966171168   ;;  %v39_v10 = vlaneseq  ;;  %vm363_vm0 = vcmask 130048   ;;  %vm1005_vm1 = vcmask 60416   ;;  %s2750_s4 = inlined_call_operand.vmem [shape: bf16[16,8], index: 4, kind: input, shape index: {}]   ;;  %s2751_s1 = inlined_call_operand.vmem [shape: f32[2,16], index: 1, kind: input, shape index: {}]   ;;  %s2752_s2 = inlined_call_operand.vmem [shape: f32[1,16], index: 2, kind: input, shape index: {}]   ;;  %s2753_s0 = inlined_call_operand.vmem [shape: f32[512,16], index: 0, kind: input, shape index: {}]   ;;  %s2754_s3 = inlined_call_operand.vmem [shape: f32[1,16], index: 3, kind: input, shape index: {}]   ;;  %s2755_s5 = inlined_call_operand.vmem [shape: bf16[512,8], index: 5, kind: output, shape index: {0}]   ;;  %s2756_s6 = inlined_call_operand.vmem [shape: f32[1,2,8], index: 6, kind: output, shape index: {1}]  }
   0x1   :  { %v1676_v0 = vld [vmem:[%s2750_s4] sm:$0xff]   ;;  %v37_v9 = vunpack.c.l.s4 %v1679_v8  ;;  %v56_v23 = vld [vmem:[%s2753_s0 + $0x8] sm:$0xff]  ;;  %v57_v24 = vld [vmem:[%s2753_s0 + $0x10] sm:$0xff]  ;;  %vm1070_vm2 = vcmask 64512   ;;  %vm1401_vm3 = vcmask 1040384   ;;  %vm1403_vm4 = vcmask 58368  }
   0x2   :  { %v23_v1 = vld [vmem:[%s2751_s1] sm:$0x3]  ;;  %1607 = vmatprep.subr.bf16.mxu0 %v1676_v0  ;;  %1673 = vmatprep.subr.bf16.mxu1 %v1676_v0  ;;  %v40_v12 = vshrl.u32 %v39_v10, 7  ;;  %v58_v25 = vld [vmem:[%s2753_s0 + $0x18] sm:$0xff]  ;;  %v60_v29 = vld [vmem:[%s2753_s0 + $0x28] sm:$0xff] }
   0x3   :  { %v26_v2 = vmul.f32 0.001953125, %v23_v1  ;;  %1608 = vmatpush3.bf16.msra.mxu0 %v1676_v0  ;;  %1674 = vmatpush3.bf16.msra.mxu1 %v1676_v0  ;;  %v38_v11 = vunpack.c.0.s8 %v37_v9  ;;  %v24_v17 = vld [vmem:[%s2752_s2] sm:$0x1]  ;;  %v61_v30 = vld [vmem:[%s2753_s0 + $0x30] sm:$0xff]  ;;  %v62_v31 = vld [vmem:[%s2753_s0 + $0x38] sm:$0xff] }
   0x4   :  { %v122_v19 = vsub.s32 0, %v40_v12  ;;  %v25_v20 = vld [vmem:[%s2754_s3] sm:$0x1]  ;;  %v64_v37 = vld [vmem:[%s2753_s0 + $0x48] sm:$0xff]  ;;  %v65_v60 = vld [vmem:[%s2753_s0 + $0x50] sm:$0xff] }
   0x5   :  { %v27_v3 = vmul.f32 %v26_v2, %v26_v2  ;;  %v41_v13 = vsub.s32 %v38_v11, %v40_v12  ;;  %v55_v22 = vld [vmem:[%s2753_s0] sm:$0xff]  ;;  %v66_v61 = vld [vmem:[%s2753_s0 + $0x58] sm:$0xff]  ;;  %v72_v12 = vld [vmem:[%s2753_s0 + $0x88] sm:$0xff] }
   0x6   :  { %v59_v28 = vld [vmem:[%s2753_s0 + $0x20] sm:$0xff]  ;;  %v70_v8 = vld [vmem:[%s2753_s0 + $0x78] sm:$0xff] }
   0x7   :  { %v29_v4 = vrot.slane %v27_v3, 7  ;;  %v63_v36 = vld [vmem:[%s2753_s0 + $0x40] sm:$0xff]  ;;  %v68_v3 = vld [vmem:[%s2753_s0 + $0x68] sm:$0xff] }
   0x8   :  { %v71_v9 = vld [vmem:[%s2753_s0 + $0x80] sm:$0xff] }
   0x9   :  { %v31_v5 = vsub.f32 %v26_v2, %v29_v4 }
   0xb   :  { %v32_v6 = vmax.f32 %v31_v5, 0.0 }
   0xd   :  { %v33_v7 = vadd.f32 1e-05, %v32_v6 }
   0xf   :  { %1677 = vrsqrt.f32 %v33_v7  ;;  %v69_v7 = vld [vmem:[%s2753_s0 + $0x70] sm:$0xff] }
  0x19   :  { %v1678_v14 = vpop.eup %1677 }
  0x1a   :  { %v42_v15 = vrot.slane %v1678_v14, %v41_v13 }
  0x1c   :  { %v43_v16 = vcombine.high %v42_v15, %v42_v15 }
  0x1e   :  { %v50_v18 = vrot.slane %v43_v16, %v41_v13 }
  0x20   :  { %v52_v21 = vmul.f32 %v50_v18, %v24_v17  ;;  %v73_v17 = vld [vmem:[%s2753_s0 + $0x90] sm:$0xff]  ;;  %v74_v18 = vld [vmem:[%s2753_s0 + $0x98] sm:$0xff] }
  0x22   :  { %v53_v26 = vmul.f32 %v52_v21, %v26_v2  ;;  %v1739_v27 = vrot.slane %v52_v21, %v122_v19  ;;  %v67_v2 = vld [vmem:[%s2753_s0 + $0x60] sm:$0xff] }
  0x24   :  { %v54_v32 = vsub.f32 %v25_v20, %v53_v26  ;;  %v125_v33 = vmul.f32 %v1739_v27, %v55_v22  ;;  %v126_v34 = vmul.f32 %v1739_v27, %v56_v23  ;;  %v127_v35 = vmul.f32 %v1739_v27, %v57_v24  ;;  %v75_v22 = vld [vmem:[%s2753_s0 + $0xa0] sm:$0xff] }
  0x25   :  { %v128_v38 = vmul.f32 %v1739_v27, %v58_v25  ;;  %v129_v39 = vmul.f32 %v1739_v27, %v59_v28  ;;  %v130_v40 = vmul.f32 %v1739_v27, %v60_v29  ;;  %v131_v41 = vmul.f32 %v1739_v27, %v61_v30  ;;  %v76_v25 = vld [vmem:[%s2753_s0 + $0xa8] sm:$0xff] }
  0x26   :  { %v1766_v42 = vrot.slane %v54_v32, %v122_v19  ;;  %v132_v43 = vmul.f32 %v1739_v27, %v62_v31  ;;  %v133_v44 = vmul.f32 %v1739_v27, %v63_v36  ;;  %v134_v45 = vmul.f32 %v1739_v27, %v64_v37  ;;  %v78_v36 = vld [vmem:[%s2753_s0 + $0xb8] sm:$0xff] }
  0x27   :  { %v135_v10 = vmul.f32 %v1739_v27, %v65_v60  ;;  %v136_v11 = vmul.f32 %v1739_v27, %v66_v61  ;;  %v137_v15 = vmul.f32 %v1739_v27, %v67_v2  ;;  %v138_v16 = vmul.f32 %v1739_v27, %v68_v3 }
  0x28   :  { %v195_v46 = vadd.f32 %v1766_v42, %v125_v33  ;;  %v196_v47 = vadd.f32 %v1766_v42, %v126_v34  ;;  %v197_v48 = vadd.f32 %v1766_v42, %v127_v35  ;;  %v198_v49 = vadd.f32 %v1766_v42, %v128_v38  ;;  %v77_v35 = vld [vmem:[%s2753_s0 + $0xb0] sm:$0xff] }
  0x29   :  { %v199_v50 = vadd.f32 %v1766_v42, %v129_v39  ;;  %v200_v51 = vadd.f32 %v1766_v42, %v130_v40  ;;  %v201_v52 = vadd.f32 %v1766_v42, %v131_v41  ;;  %v202_v53 = vadd.f32 %v1766_v42, %v132_v43  ;;  %v79_v41 = vld [vmem:[%s2753_s0 + $0xc0] sm:$0xff] }
  0x2a   :  { %v259_v54 = vmax.f32 %v195_v46, 0.0  ;;  %v260_v55 = vmax.f32 %v196_v47, 0.0  ;;  %v261_v56 = vmax.f32 %v197_v48, 0.0  ;;  %v262_v57 = vmax.f32 %v198_v49, 0.0 }
  0x2b   :  { %v263_v58 = vmax.f32 %v199_v50, 0.0  ;;  %v264_v59 = vmax.f32 %v200_v51, 0.0  ;;  %v203_v0 = vadd.f32 %v1766_v42, %v133_v44  ;;  %v204_v1 = vadd.f32 %v1766_v42, %v134_v45  ;;  %v80_v50 = vld [vmem:[%s2753_s0 + $0xc8] sm:$0xff] }
  0x2c   :  { %v323_v62 = vpack.c.bf16 %v260_v55, %v259_v54  ;;  %v324_v63 = vpack.c.bf16 %v262_v57, %v261_v56  ;;  %v265_v5 = vmax.f32 %v201_v52, 0.0  ;;  %v266_v6 = vmax.f32 %v202_v53, 0.0 }
  0x2d   :  { %v325_v4 = vpack.c.bf16 %v264_v59, %v263_v58  ;;  %v267_v13 = vmax.f32 %v203_v0, 0.0  ;;  %v268_v14 = vmax.f32 %v204_v1, 0.0  ;;  %v139_v19 = vmul.f32 %v1739_v27, %v69_v7  ;;  %v81_v59 = vld [vmem:[%s2753_s0 + $0xd0] sm:$0xff]  ;;  %v82_v0 = vld [vmem:[%s2753_s0 + $0xd8] sm:$0xff] }
  0x2e   :  { %1609 = vmatprep.mubr.msk.bf16.mxu0 %vm363_vm0, %v323_v62  ;;  %v140_v20 = vmul.f32 %v1739_v27, %v70_v8  ;;  %v141_v21 = vmul.f32 %v1739_v27, %v71_v9  ;;  %v326_v23 = vpack.c.bf16 %v266_v6, %v265_v5  ;;  %v142_v24 = vmul.f32 %v1739_v27, %v72_v12  ;;  %v87_v8 = vld [vmem:[%s2753_s0 + $0x100] sm:$0xff]  ;;  %v88_v12 = vld [vmem:[%s2753_s0 + $0x108] sm:$0xff] }
  0x2f   :  { %1610 = vmatmul.mubr.msk.bf16.vlgmr.msra.gmra.mrb[0].mxu0 %vm363_vm0, %v324_v63  ;;  %v205_v26 = vadd.f32 %v1766_v42, %v135_v10  ;;  %v206_v28 = vadd.f32 %v1766_v42, %v136_v11  ;;  %v143_v29 = vmul.f32 %v1739_v27, %v73_v17  ;;  %v144_v30 = vmul.f32 %v1739_v27, %v74_v18  ;;  %v83_v11 = vld [vmem:[%s2753_s0 + $0xe0] sm:$0xff]  ;;  %v89_v17 = vld [vmem:[%s2753_s0 + $0x110] sm:$0xff]  ;;  %v90_v18 = vld [vmem:[%s2753_s0 + $0x118] sm:$0xff] }
  0x30   :  { %1613 = vmatprep.mubr.msk.bf16.mxu0 %vm363_vm0, %v325_v4  ;;  %v327_v31 = vpack.c.bf16 %v268_v14, %v267_v13  ;;  %v207_v32 = vadd.f32 %v1766_v42, %v137_v15  ;;  %v208_v33 = vadd.f32 %v1766_v42, %v138_v16  ;;  %v145_v34 = vmul.f32 %v1739_v27, %v75_v22  ;;  %v84_v22 = vld [vmem:[%s2753_s0 + $0xe8] sm:$0xff] }
  0x31   :  { %v209_v37 = vadd.f32 %v1766_v42, %v139_v19  ;;  %v210_v38 = vadd.f32 %v1766_v42, %v140_v20  ;;  %v211_v39 = vadd.f32 %v1766_v42, %v141_v21  ;;  %v146_v40 = vmul.f32 %v1739_v27, %v76_v25 }
  0x32   :  { %v212_v43 = vadd.f32 %v1766_v42, %v142_v24  ;;  %v213_v44 = vadd.f32 %v1766_v42, %v143_v29  ;;  %v214_v45 = vadd.f32 %v1766_v42, %v144_v30  ;;  %v215_v46 = vadd.f32 %v1766_v42, %v145_v34  ;;  %v91_v24 = vld [vmem:[%s2753_s0 + $0x120] sm:$0xff]  ;;  %v92_v30 = vld [vmem:[%s2753_s0 + $0x128] sm:$0xff] }
  0x33   :  { %v216_v47 = vadd.f32 %v1766_v42, %v146_v40  ;;  %v147_v48 = vmul.f32 %v1739_v27, %v77_v35  ;;  %v148_v49 = vmul.f32 %v1739_v27, %v78_v36  ;;  %v269_v51 = vmax.f32 %v205_v26, 0.0  ;;  %v93_v35 = vld [vmem:[%s2753_s0 + $0x130] sm:$0xff]  ;;  %v94_v40 = vld [vmem:[%s2753_s0 + $0x138] sm:$0xff] }
  0x34   :  { %v270_v52 = vmax.f32 %v206_v28, 0.0  ;;  %v271_v53 = vmax.f32 %v207_v32, 0.0  ;;  %v149_v54 = vmul.f32 %v1739_v27, %v79_v41  ;;  %v272_v55 = vmax.f32 %v208_v33, 0.0 }
  0x35   :  { %v273_v56 = vmax.f32 %v209_v37, 0.0  ;;  %v274_v57 = vmax.f32 %v210_v38, 0.0  ;;  %v275_v58 = vmax.f32 %v211_v39, 0.0  ;;  %v276_v60 = vmax.f32 %v212_v43, 0.0 }
  0x36   :  { %v277_v61 = vmax.f32 %v213_v44, 0.0  ;;  %v278_v62 = vmax.f32 %v214_v45, 0.0  ;;  %v150_v63 = vmul.f32 %v1739_v27, %v80_v50  ;;  %v279_v1 = vmax.f32 %v215_v46, 0.0  ;;  %v95_v46 = vld [vmem:[%s2753_s0 + $0x140] sm:$0xff] }
  0x37   :  { %1614 = vmatmul.mubr.msk.bf16.gmra.mrb[4].mxu0 %vm363_vm0, %v326_v23  ;;  %v280_v2 = vmax.f32 %v216_v47, 0.0  ;;  %v1869_v3 = vadd.f32 %v1766_v42, %v147_v48  ;;  %v1872_v4 = vadd.f32 %v1766_v42, %v148_v49  ;;  %v328_v5 = vpack.c.bf16 %v270_v52, %v269_v51  ;;  %v96_v51 = vld [vmem:[%s2753_s0 + $0x148] sm:$0xff] }
  0x38   :  { %1617 = vmatprep.mubr.msk.bf16.mxu0 %vm363_vm0, %v327_v31  ;;  %v1875_v6 = vadd.f32 %v1766_v42, %v149_v54  ;;  %v151_v7 = vmul.f32 %v1739_v27, %v81_v59  ;;  %v329_v9 = vpack.c.bf16 %v272_v55, %v271_v53  ;;  %v152_v10 = vmul.f32 %v1739_v27, %v82_v0 }
  0x39   :  { %v330_v13 = vpack.c.bf16 %v274_v57, %v273_v56  ;;  %v331_v14 = vpack.c.bf16 %v276_v60, %v275_v58  ;;  %v1888_v15 = vpack.c.bf16 %v278_v62, %v277_v61  ;;  %v1891_v16 = vadd.f32 %v1766_v42, %v150_v63  ;;  %v97_v56 = vld [vmem:[%s2753_s0 + $0x150] sm:$0xff]  ;;  %v98_v57 = vld [vmem:[%s2753_s0 + $0x158] sm:$0xff]  ;;  %v99_v62 = vld [vmem:[%s2753_s0 + $0x160] sm:$0xff] }
  0x3a   :  { %v1899_v19 = vpack.c.bf16 %v280_v2, %v279_v1  ;;  %v281_v20 = vmax.f32 %v1869_v3, 0.0  ;;  %v282_v21 = vmax.f32 %v1872_v4, 0.0  ;;  %v157_v23 = vmul.f32 %v1739_v27, %v87_v8 }
  0x3b   :  { %v283_v25 = vmax.f32 %v1875_v6, 0.0  ;;  %v1913_v26 = vadd.f32 %v1766_v42, %v151_v7  ;;  %v153_v28 = vmul.f32 %v1739_v27, %v83_v11  ;;  %v158_v29 = vmul.f32 %v1739_v27, %v88_v12  ;;  %v85_v7 = vld [vmem:[%s2753_s0 + $0xf0] sm:$0xff] }
  0x3c   :  { %v1922_v31 = vadd.f32 %v1766_v42, %v152_v10  ;;  %v227_v32 = vadd.f32 %v1766_v42, %v157_v23  ;;  %v159_v33 = vmul.f32 %v1739_v27, %v89_v17  ;;  %v160_v34 = vmul.f32 %v1739_v27, %v90_v18  ;;  %v101_v12 = vld [vmem:[%s2753_s0 + $0x170] sm:$0xff]  ;;  %v102_v23 = vld [vmem:[%s2753_s0 + $0x178] sm:$0xff] }
  0x3d   :  { %v284_v36 = vmax.f32 %v1891_v16, 0.0  ;;  %v154_v37 = vmul.f32 %v1739_v27, %v84_v22  ;;  %v228_v38 = vadd.f32 %v1766_v42, %v158_v29  ;;  %v161_v39 = vmul.f32 %v1739_v27, %v91_v24  ;;  %v86_v24 = vld [vmem:[%s2753_s0 + $0xf8] sm:$0xff] }
  0x3e   :  { %v291_v41 = vmax.f32 %v227_v32, 0.0  ;;  %v229_v43 = vadd.f32 %v1766_v42, %v159_v33  ;;  %v230_v44 = vadd.f32 %v1766_v42, %v160_v34  ;;  %v162_v45 = vmul.f32 %v1739_v27, %v92_v30  ;;  %v103_v32 = vld [vmem:[%s2753_s0 + $0x180] sm:$0xff] }
  0x3f   :  { %1618 = vmatmul.mubr.msk.bf16.gmra.mrb[8].mxu0 %vm363_vm0, %v328_v5  ;;  %v1944_v47 = vadd.f32 %v1766_v42, %v153_v28  ;;  %v292_v48 = vmax.f32 %v228_v38, 0.0  ;;  %v231_v49 = vadd.f32 %v1766_v42, %v161_v39  ;;  %v163_v50 = vmul.f32 %v1739_v27, %v93_v35  ;;  %v100_v5 = vld [vmem:[%s2753_s0 + $0x168] sm:$0xff] }
  0x40   :  { %1621 = vmatprep.mubr.msk.bf16.mxu0 %vm363_vm0, %v329_v9  ;;  %v293_v52 = vmax.f32 %v229_v43, 0.0  ;;  %v294_v53 = vmax.f32 %v230_v44, 0.0  ;;  %v232_v54 = vadd.f32 %v1766_v42, %v162_v45  ;;  %v164_v55 = vmul.f32 %v1739_v27, %v94_v40  ;;  %v104_v44 = vld [vmem:[%s2753_s0 + $0x188] sm:$0xff] }
  0x41   :  { %v339_v58 = vpack.c.bf16 %v292_v48, %v291_v41  ;;  %v295_v59 = vmax.f32 %v231_v49, 0.0  ;;  %v233_v60 = vadd.f32 %v1766_v42, %v163_v50  ;;  %v165_v61 = vmul.f32 %v1739_v27, %v95_v46 }
  0x42   :  { %v340_v63 = vpack.c.bf16 %v294_v53, %v293_v52  ;;  %v296_v0 = vmax.f32 %v232_v54, 0.0  ;;  %v234_v1 = vadd.f32 %v1766_v42, %v164_v55  ;;  %v166_v2 = vmul.f32 %v1739_v27, %v96_v51  ;;  %v105_v55 = vld [vmem:[%s2753_s0 + $0x190] sm:$0xff] }
  0x43   :  { %1641 = vmatprep.mubr.msk.bf16.mxu1 %vm363_vm0, %v339_v58  ;;  %v297_v8 = vmax.f32 %v233_v60, 0.0  ;;  %v235_v9 = vadd.f32 %v1766_v42, %v165_v61  ;;  %v167_v10 = vmul.f32 %v1739_v27, %v97_v56  ;;  %v168_v11 = vmul.f32 %v1739_v27, %v98_v57  ;;  %v109_v56 = vld [vmem:[%s2753_s0 + $0x1b0] sm:$0xff]  ;;  %v106_v57 = vld [vmem:[%s2753_s0 + $0x198] sm:$0xff]  ;;  %v108_v61 = vld [vmem:[%s2753_s0 + $0x1a8] sm:$0xff] }
  0x44   :  { %1642 = vmatmul.mubr.msk.bf16.vlgmr.msra.gmra.mrb[0].mxu1 %vm363_vm0, %v340_v63  ;;  %v298_v17 = vmax.f32 %v234_v1, 0.0  ;;  %v236_v18 = vadd.f32 %v1766_v42, %v166_v2  ;;  %v169_v22 = vmul.f32 %v1739_v27, %v99_v62  ;;  %v170_v30 = vmul.f32 %v1739_v27, %v100_v5  ;;  %v112_v63 = vld [vmem:[%s2753_s0 + $0x1c8] sm:$0xff] }
  0x45   :  { %v299_v28 = vmax.f32 %v235_v9, 0.0  ;;  %v237_v29 = vadd.f32 %v1766_v42, %v167_v10  ;;  %v155_v33 = vmul.f32 %v1739_v27, %v85_v7  ;;  %v171_v38 = vmul.f32 %v1739_v27, %v101_v12  ;;  %v113_v7 = vld [vmem:[%s2753_s0 + $0x1d0] sm:$0xff] }
  0x46   :  { %v300_v34 = vmax.f32 %v236_v18, 0.0  ;;  %v239_v35 = vadd.f32 %v1766_v42, %v169_v22  ;;  %v285_v39 = vmax.f32 %v1913_v26, 0.0  ;;  %v286_v40 = vmax.f32 %v1922_v31, 0.0 }
  0x47   :  { %1622 = vmatmul.mubr.msk.bf16.gmra.mrb[12].mxu0 %vm363_vm0, %v330_v13  ;;  %v341_v13 = vpack.c.bf16 %v296_v0, %v295_v59  ;;  %v240_v41 = vadd.f32 %v1766_v42, %v170_v30  ;;  %v172_v43 = vmul.f32 %v1739_v27, %v102_v23  ;;  %v2008_v45 = vadd.f32 %v1766_v42, %v154_v37 }
  0x48   :  { %1625 = vmatprep.mubr.msk.bf16.mxu0 %vm363_vm0, %v331_v14  ;;  %v238_v14 = vadd.f32 %v1766_v42, %v168_v11  ;;  %v156_v46 = vmul.f32 %v1739_v27, %v86_v24  ;;  %v342_v48 = vpack.c.bf16 %v298_v17, %v297_v8  ;;  %v173_v49 = vmul.f32 %v1739_v27, %v103_v32  ;;  %v114_v8 = vld [vmem:[%s2753_s0 + $0x1d8] sm:$0xff]  ;;  %v116_v24 = vld [vmem:[%s2753_s0 + $0x1e8] sm:$0xff]  ;;  %v117_v32 = vld [vmem:[%s2753_s0 + $0x1f0] sm:$0xff] }
  0x49   :  { %1645 = vmatprep.mubr.msk.bf16.mxu1 %vm363_vm0, %v341_v13  ;;  %v343_v50 = vpack.c.bf16 %v300_v34, %v299_v28  ;;  %v301_v26 = vmax.f32 %v237_v29, 0.0  ;;  %v2013_v31 = vadd.f32 %v1766_v42, %v171_v38  ;;  %v334_v52 = vpack.c.bf16 %v282_v21, %v281_v20  ;;  %v115_v13 = vld [vmem:[%s2753_s0 + $0x1e0] sm:$0xff] }
  0x4a   :  { %v302_v51 = vmax.f32 %v238_v14, 0.0  ;;  %v303_v53 = vmax.f32 %v239_v35, 0.0  ;;  %v304_v54 = vmax.f32 %v240_v41, 0.0  ;;  %v174_v37 = vmul.f32 %v1739_v27, %v104_v44 }
  0x4b   :  { %v335_v3 = vpack.c.bf16 %v284_v36, %v283_v25  ;;  %v287_v4 = vmax.f32 %v1944_v47, 0.0  ;;  %v2034_v20 = vadd.f32 %v1766_v42, %v155_v33  ;;  %v2037_v21 = vadd.f32 %v1766_v42, %v172_v43  ;;  %v107_v47 = vld [vmem:[%s2753_s0 + $0x1a0] sm:$0xff] }
  0x4c   :  { %v2047_v6 = vpack.c.bf16 %v286_v40, %v285_v39  ;;  %v288_v16 = vmax.f32 %v2008_v45, 0.0  ;;  %v2051_v25 = vadd.f32 %v1766_v42, %v156_v46  ;;  %1646 = vmatmul.mubr.msk.bf16.gmra.mrb[4].mxu1 %vm363_vm0, %v342_v48  ;;  %v2055_v36 = vadd.f32 %v1766_v42, %v173_v49  ;;  %v118_v39 = vld [vmem:[%s2753_s0 + $0x1f8] sm:$0xff] }
  0x4d   :  { %1649 = vmatprep.mubr.msk.bf16.mxu1 %vm363_vm0, %v343_v50  ;;  %v344_v58 = vpack.c.bf16 %v302_v51, %v301_v26  ;;  %v305_v59 = vmax.f32 %v2013_v31, 0.0  ;;  %v175_v60 = vmul.f32 %v1739_v27, %v105_v55  ;;  %v179_v62 = vmul.f32 %v1739_v27, %v109_v56 }
  0x4e   :  { %v345_v0 = vpack.c.bf16 %v304_v54, %v303_v53  ;;  %v244_v1 = vadd.f32 %v1766_v42, %v174_v37  ;;  %v176_v2 = vmul.f32 %v1739_v27, %v106_v57  ;;  %v306_v9 = vmax.f32 %v2037_v21, 0.0 }
  0x4f   :  { %1626 = vmatmul.mubr.msk.bf16.gmra.mrb[16].mxu0 %vm363_vm0, %v1888_v15  ;;  %v110_v15 = vld [vmem:[%s2753_s0 + $0x1b8] sm:$0xff]  ;;  %v177_v10 = vmul.f32 %v1739_v27, %v107_v47  ;;  %v249_v11 = vadd.f32 %v1766_v42, %v179_v62  ;;  %v307_v17 = vmax.f32 %v2055_v36, 0.0  ;;  %v178_v18 = vmul.f32 %v1739_v27, %v108_v61 }
  0x50   :  { %1629 = vmatprep.mubr.msk.bf16.mxu0 %vm363_vm0, %v1899_v19  ;;  %v111_v19 = vld [vmem:[%s2753_s0 + $0x1c0] sm:$0xff]  ;;  %v180_v5 = vmul.f32 %v1739_v27, %v110_v15  ;;  %v182_v23 = vmul.f32 %v1739_v27, %v112_v63  ;;  %v183_v14 = vmul.f32 %v1739_v27, %v113_v7  ;;  %v184_v30 = vmul.f32 %v1739_v27, %v114_v8 }
  0x51   :  { %v181_v12 = vmul.f32 %v1739_v27, %v111_v19  ;;  %v313_v28 = vmax.f32 %v249_v11, 0.0  ;;  %v308_v33 = vmax.f32 %v244_v1, 0.0  ;;  %v185_v38 = vmul.f32 %v1739_v27, %v115_v13 }
  0x52   :  { %v250_v22 = vadd.f32 %v1766_v42, %v180_v5  ;;  %v252_v35 = vadd.f32 %v1766_v42, %v182_v23  ;;  %v253_v41 = vadd.f32 %v1766_v42, %v183_v14  ;;  %v254_v43 = vadd.f32 %v1766_v42, %v184_v30 }
  0x53   :  { %v251_v29 = vadd.f32 %v1766_v42, %v181_v12  ;;  %v186_v44 = vmul.f32 %v1739_v27, %v116_v24  ;;  %v255_v48 = vadd.f32 %v1766_v42, %v185_v38  ;;  %v187_v49 = vmul.f32 %v1739_v27, %v117_v32 }
  0x54   :  { %v314_v34 = vmax.f32 %v250_v22, 0.0  ;;  %1650 = vmatmul.mubr.msk.bf16.gmra.mrb[8].mxu1 %vm363_vm0, %v344_v58  ;;  %v316_v46 = vmax.f32 %v252_v35, 0.0  ;;  %v317_v50 = vmax.f32 %v253_v41, 0.0  ;;  %v318_v26 = vmax.f32 %v254_v43, 0.0 }
  0x55   :  { %v315_v40 = vmax.f32 %v251_v29, 0.0  ;;  %1653 = vmatprep.mubr.msk.bf16.mxu1 %vm363_vm0, %v345_v0  ;;  %v256_v51 = vadd.f32 %v1766_v42, %v186_v44  ;;  %v188_v31 = vmul.f32 %v1739_v27, %v118_v39  ;;  %v319_v54 = vmax.f32 %v255_v48, 0.0 }
  0x56   :  { %v350_v45 = vpack.c.bf16 %v314_v34, %v313_v28  ;;  %v257_v37 = vadd.f32 %v1766_v42, %v187_v49  ;;  %v245_v55 = vadd.f32 %v1766_v42, %v175_v60  ;;  %v352_v56 = vpack.c.bf16 %v318_v26, %v317_v50 }
  0x57   :  { %1630 = vmatmul.mubr.msk.bf16.gmra.mrb[20].mxu0 %vm363_vm0, %v334_v52  ;;  %v337_v52 = vpack.c.bf16 %v288_v16, %v287_v4  ;;  %v351_v53 = vpack.c.bf16 %v316_v46, %v315_v40  ;;  %v258_v21 = vadd.f32 %v1766_v42, %v188_v31  ;;  %v346_v57 = vpack.c.bf16 %v306_v9, %v305_v59 }
  0x58   :  { %1633 = vmatprep.mubr.msk.bf16.mxu0 %vm363_vm0, %v335_v3  ;;  %v320_v3 = vmax.f32 %v256_v51, 0.0  ;;  %v246_v15 = vadd.f32 %v1766_v42, %v176_v2  ;;  %v247_v36 = vadd.f32 %v1766_v42, %v177_v10  ;;  %v321_v47 = vmax.f32 %v257_v37, 0.0 }
  0x59   :  { %v347_v19 = vpack.c.bf16 %v308_v33, %v307_v17  ;;  %v248_v27 = vadd.f32 %v1766_v42, %v178_v18  ;;  %v322_v16 = vmax.f32 %v258_v21, 0.0  ;;  %v289_v58 = vmax.f32 %v2034_v20, 0.0 }
  0x5a   :  { %v353_v4 = vpack.c.bf16 %v320_v3, %v319_v54  ;;  %v290_v60 = vmax.f32 %v2051_v25, 0.0  ;;  %v309_v59 = vmax.f32 %v245_v55, 0.0  ;;  %v310_v62 = vmax.f32 %v246_v15, 0.0 }
  0x5b   :  { %v354_v61 = vpack.c.bf16 %v322_v16, %v321_v47  ;;  %v311_v63 = vmax.f32 %v247_v36, 0.0  ;;  %v312_v42 = vmax.f32 %v248_v27, 0.0 }
  0x5c   :  { %1654 = vmatmul.mubr.msk.bf16.gmra.mrb[12].mxu1 %vm363_vm0, %v346_v57  ;;  %v338_v0 = vpack.c.bf16 %v290_v60, %v289_v58  ;;  %v348_v1 = vpack.c.bf16 %v310_v62, %v309_v59 }
  0x5d   :  { %1657 = vmatprep.mubr.msk.bf16.mxu1 %vm363_vm0, %v347_v19  ;;  %v349_v2 = vpack.c.bf16 %v312_v42, %v311_v63 }
  0x5f   :  { %1634 = vmatmul.mubr.msk.bf16.gmra.mrb[24].mxu0 %vm363_vm0, %v2047_v6 }
  0x60   :  { %1637 = vmatprep.mubr.msk.bf16.mxu0 %vm363_vm0, %v337_v52 }
  0x64   :  { %1658 = vmatmul.mubr.msk.bf16.gmra.mrb[16].mxu1 %vm363_vm0, %v348_v1 }
  0x65   :  { %1661 = vmatprep.mubr.msk.bf16.mxu1 %vm363_vm0, %v349_v2 }
  0x67   :  { %1638 = vmatmul.mubr.msk.bf16.gmra.mrb[28].mxu0 %vm363_vm0, %v338_v0 }
  0x6c   :  { %1662 = vmatmul.mubr.msk.bf16.gmra.mrb[20].mxu1 %vm363_vm0, %v350_v45 }
  0x6d   :  { %1665 = vmatprep.mubr.msk.bf16.mxu1 %vm363_vm0, %v351_v53 }
  0x74   :  { %1666 = vmatmul.mubr.msk.bf16.gmra.mrb[24].mxu1 %vm363_vm0, %v352_v56 }
  0x75   :  { %1669 = vmatprep.mubr.msk.bf16.mxu1 %vm363_vm0, %v353_v4 }
  0x7c   :  { %1670 = vmatmul.mubr.msk.bf16.gmra.mrb[28].mxu1 %vm363_vm0, %v354_v61 }
 0x102   :  { %v1611_v20 = vpop.f32.mrb[0].mxu0 }
 0x103   :  { %v1512_v6 = vpack.c.bf16 %v1611_v20, %v1611_v20  ;;  %v494_v25 = vpop.f32.mrb[1].mxu0  ;;  %v1206_v9 = vmul.f32 %v1611_v20, %v1611_v20  ;;  %v1074_v24 = vsel %vm1070_vm2, %v1611_v20, 0.0 }
 0x104   :  { %v1510_v5 = vpack.c.bf16 %v494_v25, %v494_v25  ;;  %v1204_v7 = vmul.f32 %v494_v25, %v494_v25  ;;  %v1612_v8 = vpop.f32.mrb[2].mxu0  ;;  %v1071_v12 = vsel %vm1070_vm2, %v494_v25, 0.0 }
 0x105   :  { %1008 = vst.msk [vmem:[%s2755_s5 + $0x8] sm:$0xf] %vm1005_vm1, %v1512_v6  ;;  %v1513_v10 = vpack.c.bf16 %v1612_v8, %v1612_v8  ;;  %v497_v11 = vpop.f32.mrb[3].mxu0  ;;  %v1207_v22 = vmul.f32 %v1612_v8, %v1612_v8  ;;  %v1271_v32 = vsel %vm1070_vm2, %v1206_v9, 0.0  ;;  %v1076_v34 = vsel %vm1070_vm2, %v1612_v8, 0.0 }
 0x106   :  { %1006 = vst.msk [vmem:[%s2755_s5] sm:$0xf] %vm1005_vm1, %v1510_v5  ;;  %v1511_v13 = vpack.c.bf16 %v497_v11, %v497_v11  ;;  %v1072_v17 = vsel %vm1070_vm2, %v497_v11, 0.0  ;;  %v1205_v18 = vmul.f32 %v497_v11, %v497_v11  ;;  %v1268_v28 = vsel %vm1070_vm2, %v1204_v7, 0.0 }
 0x107   :  { %1009 = vst.msk [vmem:[%s2755_s5 + $0xc] sm:$0xf] %vm1005_vm1, %v1513_v10  ;;  %v1073_v23 = vadd.f32 %v1072_v17, %v1071_v12  ;;  %v1273_v35 = vsel %vm1070_vm2, %v1207_v22, 0.0 }
 0x108   :  { %1007 = vst.msk [vmem:[%s2755_s5 + $0x4] sm:$0xf] %vm1005_vm1, %v1511_v13  ;;  %v1269_v29 = vsel %vm1070_vm2, %v1205_v18, 0.0 }
 0x109   :  { %v1075_v14 = vadd.f32 %v1074_v24, %v1073_v23  ;;  %v1270_v30 = vadd.f32 %v1269_v29, %v1268_v28 }
 0x10a   :  { %v1615_v33 = vpop.f32.mrb[4].mxu0 }
 0x10b   :  { %v1272_v38 = vadd.f32 %v1271_v32, %v1270_v30  ;;  %v1516_v39 = vpack.c.bf16 %v1615_v33, %v1615_v33  ;;  %v510_v40 = vpop.f32.mrb[5].mxu0  ;;  %v1077_v43 = vadd.f32 %v1076_v34, %v1075_v14  ;;  %v1210_v52 = vmul.f32 %v1615_v33, %v1615_v33 }
 0x10c   :  { %v1514_v41 = vpack.c.bf16 %v510_v40, %v510_v40  ;;  %v1078_v44 = vsel %vm1070_vm2, %v510_v40, 0.0  ;;  %v1208_v45 = vmul.f32 %v510_v40, %v510_v40  ;;  %v1616_v46 = vpop.f32.mrb[6].mxu0  ;;  %v1082_v56 = vsel %vm1070_vm2, %v1615_v33, 0.0 }
 0x10d   :  { %1012 = vst.msk [vmem:[%s2755_s5 + $0x18] sm:$0xf] %vm1005_vm1, %v1516_v39  ;;  %v1274_v48 = vadd.f32 %v1273_v35, %v1272_v38  ;;  %v1517_v49 = vpack.c.bf16 %v1616_v46, %v1616_v46  ;;  %v513_v50 = vpop.f32.mrb[7].mxu0  ;;  %v1079_v26 = vadd.f32 %v1078_v44, %v1077_v43  ;;  %v1211_v3 = vmul.f32 %v1616_v46, %v1616_v46 }
 0x10e   :  { %1010 = vst.msk [vmem:[%s2755_s5 + $0x10] sm:$0xf] %vm1005_vm1, %v1514_v41  ;;  %v1275_v51 = vsel %vm1070_vm2, %v1208_v45, 0.0  ;;  %v1515_v31 = vpack.c.bf16 %v513_v50, %v513_v50  ;;  %v1080_v54 = vsel %vm1070_vm2, %v513_v50, 0.0  ;;  %v1209_v37 = vmul.f32 %v513_v50, %v513_v50 }
 0x10f   :  { %v1276_v53 = vadd.f32 %v1275_v51, %v1274_v48  ;;  %1013 = vst.msk [vmem:[%s2755_s5 + $0x1c] sm:$0xf] %vm1005_vm1, %v1517_v49  ;;  %v1081_v55 = vadd.f32 %v1080_v54, %v1079_v26  ;;  %v1279_v47 = vsel %vm1070_vm2, %v1210_v52, 0.0  ;;  %v1084_v19 = vsel %vm1070_vm2, %v1616_v46, 0.0 }
 0x110   :  { %1011 = vst.msk [vmem:[%s2755_s5 + $0x14] sm:$0xf] %vm1005_vm1, %v1515_v31  ;;  %v1277_v21 = vsel %vm1070_vm2, %v1209_v37, 0.0  ;;  %v1281_v62 = vsel %vm1070_vm2, %v1211_v3, 0.0 }
 0x111   :  { %v1083_v57 = vadd.f32 %v1082_v56, %v1081_v55  ;;  %v1278_v15 = vadd.f32 %v1277_v21, %v1276_v53 }
 0x112   :  { %v1619_v36 = vpop.f32.mrb[8].mxu0 }
 0x113   :  { %v1520_v27 = vpack.c.bf16 %v1619_v36, %v1619_v36  ;;  %v526_v4 = vpop.f32.mrb[9].mxu0  ;;  %v1280_v16 = vadd.f32 %v1279_v47, %v1278_v15  ;;  %v1085_v60 = vadd.f32 %v1084_v19, %v1083_v57  ;;  %v1214_v6 = vmul.f32 %v1619_v36, %v1619_v36 }
 0x114   :  { %v1518_v58 = vpack.c.bf16 %v526_v4, %v526_v4  ;;  %v1086_v61 = vsel %vm1070_vm2, %v526_v4, 0.0  ;;  %v1620_v59 = vpop.f32.mrb[10].mxu0  ;;  %v1212_v63 = vmul.f32 %v526_v4, %v526_v4  ;;  %v1090_v10 = vsel %vm1070_vm2, %v1619_v36, 0.0 }
 0x115   :  { %1016 = vst.msk [vmem:[%s2755_s5 + $0x28] sm:$0xf] %vm1005_vm1, %v1520_v27  ;;  %v1521_v42 = vpack.c.bf16 %v1620_v59, %v1620_v59  ;;  %v529_v0 = vpop.f32.mrb[11].mxu0  ;;  %v1087_v1 = vadd.f32 %v1086_v61, %v1085_v60  ;;  %v1282_v2 = vadd.f32 %v1281_v62, %v1280_v16  ;;  %v1215_v11 = vmul.f32 %v1620_v59, %v1620_v59 }
 0x116   :  { %1014 = vst.msk [vmem:[%s2755_s5 + $0x20] sm:$0xf] %vm1005_vm1, %v1518_v58  ;;  %v1519_v20 = vpack.c.bf16 %v529_v0, %v529_v0  ;;  %v1283_v25 = vsel %vm1070_vm2, %v1212_v63, 0.0  ;;  %v1088_v5 = vsel %vm1070_vm2, %v529_v0, 0.0  ;;  %v1213_v7 = vmul.f32 %v529_v0, %v529_v0 }
 0x117   :  { %1017 = vst.msk [vmem:[%s2755_s5 + $0x2c] sm:$0xf] %vm1005_vm1, %v1521_v42  ;;  %v1284_v8 = vadd.f32 %v1283_v25, %v1282_v2  ;;  %v1089_v9 = vadd.f32 %v1088_v5, %v1087_v1  ;;  %v1287_v22 = vsel %vm1070_vm2, %v1214_v6, 0.0  ;;  %v1092_v23 = vsel %vm1070_vm2, %v1620_v59, 0.0  ;;  %v2210_v29 = vpop.f32.mrb[0].mxu1 }
 0x118   :  { %1015 = vst.msk [vmem:[%s2755_s5 + $0x24] sm:$0xf] %vm1005_vm1, %v1519_v20  ;;  %v1285_v12 = vsel %vm1070_vm2, %v1213_v7, 0.0  ;;  %v2213_v35 = vpop.f32.mrb[1].mxu1  ;;  %v1289_v38 = vsel %vm1070_vm2, %v1215_v11, 0.0  ;;  %v1544_v31 = vpack.c.bf16 %v2210_v29, %v2210_v29 }
 0x119   :  { %v1091_v13 = vadd.f32 %v1090_v10, %v1089_v9  ;;  %v1286_v17 = vadd.f32 %v1285_v12, %v1284_v8  ;;  %v2220_v43 = vpop.f32.mrb[2].mxu1  ;;  %v1542_v56 = vpack.c.bf16 %v2213_v35, %v2213_v35 }
 0x11a   :  { %v1623_v18 = vpop.f32.mrb[12].mxu0  ;;  %v2226_v49 = vpop.f32.mrb[3].mxu1  ;;  %1040 = vst.msk [vmem:[%s2755_s5 + $0x88] sm:$0xf] %vm1005_vm1, %v1544_v31  ;;  %v1545_v15 = vpack.c.bf16 %v2220_v43, %v2220_v43 }
 0x11b   :  { %v1524_v24 = vpack.c.bf16 %v1623_v18, %v1623_v18  ;;  %v542_v28 = vpop.f32.mrb[13].mxu0  ;;  %v1288_v14 = vadd.f32 %v1287_v22, %v1286_v17  ;;  %v1093_v32 = vadd.f32 %v1092_v23, %v1091_v13  ;;  %v1218_v44 = vmul.f32 %v1623_v18, %v1623_v18  ;;  %1038 = vst.msk [vmem:[%s2755_s5 + $0x80] sm:$0xf] %vm1005_vm1, %v1542_v56 }
 0x11c   :  { %v1522_v30 = vpack.c.bf16 %v542_v28, %v542_v28  ;;  %v1094_v33 = vsel %vm1070_vm2, %v542_v28, 0.0  ;;  %v1624_v34 = vpop.f32.mrb[14].mxu0  ;;  %v1216_v39 = vmul.f32 %v542_v28, %v542_v28  ;;  %v1098_v54 = vsel %vm1070_vm2, %v1623_v18, 0.0  ;;  %1041 = vst.msk [vmem:[%s2755_s5 + $0x8c] sm:$0xf] %vm1005_vm1, %v1545_v15 }
 0x11d   :  { %1020 = vst.msk [vmem:[%s2755_s5 + $0x38] sm:$0xf] %vm1005_vm1, %v1524_v24  ;;  %v1525_v40 = vpack.c.bf16 %v1624_v34, %v1624_v34  ;;  %v545_v41 = vpop.f32.mrb[15].mxu0  ;;  %v1095_v45 = vadd.f32 %v1094_v33, %v1093_v32  ;;  %v1290_v46 = vadd.f32 %v1289_v38, %v1288_v14  ;;  %v1219_v37 = vmul.f32 %v1624_v34, %v1624_v34 }
 0x11e   :  { %1018 = vst.msk [vmem:[%s2755_s5 + $0x30] sm:$0xf] %vm1005_vm1, %v1522_v30  ;;  %v1523_v48 = vpack.c.bf16 %v545_v41, %v545_v41  ;;  %v1291_v50 = vsel %vm1070_vm2, %v1216_v39, 0.0  ;;  %v1096_v26 = vsel %vm1070_vm2, %v545_v41, 0.0  ;;  %v1217_v51 = vmul.f32 %v545_v41, %v545_v41 }
 0x11f   :  { %1021 = vst.msk [vmem:[%s2755_s5 + $0x3c] sm:$0xf] %vm1005_vm1, %v1525_v40  ;;  %v1292_v52 = vadd.f32 %v1291_v50, %v1290_v46  ;;  %v1097_v53 = vadd.f32 %v1096_v26, %v1095_v45  ;;  %v1295_v36 = vsel %vm1070_vm2, %v1218_v44, 0.0  ;;  %v1100_v47 = vsel %vm1070_vm2, %v1624_v34, 0.0  ;;  %v2256_v4 = vpop.f32.mrb[4].mxu1 }
 0x120   :  { %1019 = vst.msk [vmem:[%s2755_s5 + $0x34] sm:$0xf] %vm1005_vm1, %v1523_v48  ;;  %v1293_v55 = vsel %vm1070_vm2, %v1217_v51, 0.0  ;;  %v2263_v62 = vpop.f32.mrb[5].mxu1  ;;  %v1297_v63 = vsel %vm1070_vm2, %v1219_v37, 0.0  ;;  %v1543_v22 = vpack.c.bf16 %v2226_v49, %v2226_v49  ;;  %v1548_v14 = vpack.c.bf16 %v2256_v4, %v2256_v4 }
 0x121   :  { %v1099_v3 = vadd.f32 %v1098_v54, %v1097_v53  ;;  %v1294_v21 = vadd.f32 %v1293_v55, %v1292_v52  ;;  %v2270_v2 = vpop.f32.mrb[6].mxu1 }
 0x122   :  { %v1627_v57 = vpop.f32.mrb[16].mxu0  ;;  %v2276_v5 = vpop.f32.mrb[7].mxu1  ;;  %1039 = vst.msk [vmem:[%s2755_s5 + $0x84] sm:$0xf] %vm1005_vm1, %v1543_v22  ;;  %1044 = vst.msk [vmem:[%s2755_s5 + $0x98] sm:$0xf] %vm1005_vm1, %v1548_v14 }
 0x123   :  { %v1528_v19 = vpack.c.bf16 %v1627_v57, %v1627_v57  ;;  %v558_v27 = vpop.f32.mrb[17].mxu0  ;;  %v1296_v16 = vadd.f32 %v1295_v36, %v1294_v21  ;;  %v1101_v60 = vadd.f32 %v1100_v47, %v1099_v3  ;;  %v1222_v7 = vmul.f32 %v1627_v57, %v1627_v57 }
 0x124   :  { %v1526_v58 = vpack.c.bf16 %v558_v27, %v558_v27  ;;  %v1102_v61 = vsel %vm1070_vm2, %v558_v27, 0.0  ;;  %v1628_v59 = vpop.f32.mrb[18].mxu0  ;;  %v1220_v42 = vmul.f32 %v558_v27, %v558_v27  ;;  %v1106_v13 = vsel %vm1070_vm2, %v1627_v57, 0.0 }
 0x125   :  { %1024 = vst.msk [vmem:[%s2755_s5 + $0x48] sm:$0xf] %vm1005_vm1, %v1528_v19  ;;  %v1529_v0 = vpack.c.bf16 %v1628_v59, %v1628_v59  ;;  %v561_v1 = vpop.f32.mrb[19].mxu0  ;;  %v1103_v20 = vadd.f32 %v1102_v61, %v1101_v60  ;;  %v1298_v6 = vadd.f32 %v1297_v63, %v1296_v16  ;;  %v1223_v17 = vmul.f32 %v1628_v59, %v1628_v59 }
 0x126   :  { %1022 = vst.msk [vmem:[%s2755_s5 + $0x40] sm:$0xf] %vm1005_vm1, %v1526_v58  ;;  %v1527_v25 = vpack.c.bf16 %v561_v1, %v561_v1  ;;  %v1299_v8 = vsel %vm1070_vm2, %v1220_v42, 0.0  ;;  %v1104_v9 = vsel %vm1070_vm2, %v561_v1, 0.0  ;;  %v1221_v10 = vmul.f32 %v561_v1, %v561_v1 }
 0x127   :  { %1025 = vst.msk [vmem:[%s2755_s5 + $0x4c] sm:$0xf] %vm1005_vm1, %v1529_v0  ;;  %v1300_v11 = vadd.f32 %v1299_v8, %v1298_v6  ;;  %v1105_v12 = vadd.f32 %v1104_v9, %v1103_v20  ;;  %v1303_v30 = vsel %vm1070_vm2, %v1222_v7, 0.0  ;;  %v1108_v32 = vsel %vm1070_vm2, %v1628_v59, 0.0  ;;  %v2300_v38 = vpop.f32.mrb[8].mxu1 }
 0x128   :  { %1023 = vst.msk [vmem:[%s2755_s5 + $0x44] sm:$0xf] %vm1005_vm1, %v1527_v25  ;;  %v1301_v18 = vsel %vm1070_vm2, %v1221_v10, 0.0  ;;  %v2307_v46 = vpop.f32.mrb[9].mxu1  ;;  %v1305_v48 = vsel %vm1070_vm2, %v1223_v17, 0.0  ;;  %v1546_v27 = vpack.c.bf16 %v2263_v62, %v2263_v62  ;;  %v1549_v61 = vpack.c.bf16 %v2270_v2, %v2270_v2 }
 0x129   :  { %v1107_v23 = vadd.f32 %v1106_v13, %v1105_v12  ;;  %v1302_v24 = vadd.f32 %v1301_v18, %v1300_v11  ;;  %v2314_v31 = vpop.f32.mrb[10].mxu1 }
 0x12a   :  { %v1631_v28 = vpop.f32.mrb[20].mxu0  ;;  %v2320_v37 = vpop.f32.mrb[11].mxu1  ;;  %1042 = vst.msk [vmem:[%s2755_s5 + $0x90] sm:$0xf] %vm1005_vm1, %v1546_v27  ;;  %1045 = vst.msk [vmem:[%s2755_s5 + $0x9c] sm:$0xf] %vm1005_vm1, %v1549_v61 }
 0x12b   :  { %v1532_v33 = vpack.c.bf16 %v1631_v28, %v1631_v28  ;;  %v574_v34 = vpop.f32.mrb[21].mxu0  ;;  %v1304_v39 = vadd.f32 %v1303_v30, %v1302_v24  ;;  %v1109_v41 = vadd.f32 %v1108_v32, %v1107_v23  ;;  %v1226_v55 = vmul.f32 %v1631_v28, %v1631_v28 }
 0x12c   :  { %v1530_v40 = vpack.c.bf16 %v574_v34, %v574_v34  ;;  %v1110_v44 = vsel %vm1070_vm2, %v574_v34, 0.0  ;;  %v1632_v45 = vpop.f32.mrb[22].mxu0  ;;  %v1224_v50 = vmul.f32 %v574_v34, %v574_v34  ;;  %v1114_v36 = vsel %vm1070_vm2, %v1631_v28, 0.0 }
 0x12d   :  { %1028 = vst.msk [vmem:[%s2755_s5 + $0x58] sm:$0xf] %vm1005_vm1, %v1532_v33  ;;  %v1533_v26 = vpack.c.bf16 %v1632_v45, %v1632_v45  ;;  %v577_v51 = vpop.f32.mrb[23].mxu0  ;;  %v1111_v52 = vadd.f32 %v1110_v44, %v1109_v41  ;;  %v1306_v53 = vadd.f32 %v1305_v48, %v1304_v39  ;;  %v1227_v47 = vmul.f32 %v1632_v45, %v1632_v45 }
 0x12e   :  { %1026 = vst.msk [vmem:[%s2755_s5 + $0x50] sm:$0xf] %vm1005_vm1, %v1530_v40  ;;  %v1531_v54 = vpack.c.bf16 %v577_v51, %v577_v51  ;;  %v1307_v56 = vsel %vm1070_vm2, %v1224_v50, 0.0  ;;  %v1112_v3 = vsel %vm1070_vm2, %v577_v51, 0.0  ;;  %v1225_v21 = vmul.f32 %v577_v51, %v577_v51 }
 0x12f   :  { %1029 = vst.msk [vmem:[%s2755_s5 + $0x5c] sm:$0xf] %vm1005_vm1, %v1533_v26  ;;  %v1308_v57 = vadd.f32 %v1307_v56, %v1306_v53  ;;  %v1113_v15 = vadd.f32 %v1112_v3, %v1111_v52  ;;  %v1311_v59 = vsel %vm1070_vm2, %v1226_v55, 0.0  ;;  %v1116_v63 = vsel %vm1070_vm2, %v1632_v45, 0.0  ;;  %v2344_v1 = vpop.f32.mrb[12].mxu1 }
 0x130   :  { %1027 = vst.msk [vmem:[%s2755_s5 + $0x54] sm:$0xf] %vm1005_vm1, %v1531_v54  ;;  %v1309_v19 = vsel %vm1070_vm2, %v1225_v21, 0.0  ;;  %v2351_v9 = vpop.f32.mrb[13].mxu1  ;;  %v1313_v10 = vsel %vm1070_vm2, %v1227_v47, 0.0  ;;  %v1547_v44 = vpack.c.bf16 %v2276_v5, %v2276_v5  ;;  %v1552_v26 = vpack.c.bf16 %v2300_v38, %v2300_v38 }
 0x131   :  { %v1115_v16 = vadd.f32 %v1114_v36, %v1113_v15  ;;  %v1310_v58 = vadd.f32 %v1309_v19, %v1308_v57  ;;  %v2358_v17 = vpop.f32.mrb[14].mxu1 }
 0x132   :  { %v1635_v60 = vpop.f32.mrb[24].mxu0  ;;  %v2364_v24 = vpop.f32.mrb[15].mxu1  ;;  %1043 = vst.msk [vmem:[%s2755_s5 + $0x94] sm:$0xf] %vm1005_vm1, %v1547_v44  ;;  %1048 = vst.msk [vmem:[%s2755_s5 + $0xa8] sm:$0xf] %vm1005_vm1, %v1552_v26  ;;  %v1237_v44 = vmul.f32 %v2226_v49, %v2226_v49 }
 0x133   :  { %v1536_v42 = vpack.c.bf16 %v1635_v60, %v1635_v60  ;;  %v590_v0 = vpop.f32.mrb[25].mxu0  ;;  %v1312_v20 = vadd.f32 %v1311_v59, %v1310_v58  ;;  %v1117_v25 = vadd.f32 %v1116_v63, %v1115_v16  ;;  %v1230_v28 = vmul.f32 %v1635_v60, %v1635_v60 }
 0x134   :  { %v1534_v6 = vpack.c.bf16 %v590_v0, %v590_v0  ;;  %v1118_v7 = vsel %vm1070_vm2, %v590_v0, 0.0  ;;  %v1636_v8 = vpop.f32.mrb[26].mxu0  ;;  %v1228_v11 = vmul.f32 %v590_v0, %v590_v0  ;;  %v1122_v39 = vsel %vm1070_vm2, %v1635_v60, 0.0 }
 0x135   :  { %1032 = vst.msk [vmem:[%s2755_s5 + $0x68] sm:$0xf] %vm1005_vm1, %v1536_v42  ;;  %v1537_v12 = vpack.c.bf16 %v1636_v8, %v1636_v8  ;;  %v593_v13 = vpop.f32.mrb[27].mxu0  ;;  %v1119_v18 = vadd.f32 %v1118_v7, %v1117_v25  ;;  %v1314_v22 = vadd.f32 %v1313_v10, %v1312_v20  ;;  %v1231_v40 = vmul.f32 %v1636_v8, %v1636_v8 }
 0x136   :  { %1030 = vst.msk [vmem:[%s2755_s5 + $0x60] sm:$0xf] %vm1005_vm1, %v1534_v6  ;;  %v1535_v23 = vpack.c.bf16 %v593_v13, %v593_v13  ;;  %v1315_v14 = vsel %vm1070_vm2, %v1228_v11, 0.0  ;;  %v1120_v30 = vsel %vm1070_vm2, %v593_v13, 0.0  ;;  %v1229_v32 = vmul.f32 %v593_v13, %v593_v13 }
 0x137   :  { %1033 = vst.msk [vmem:[%s2755_s5 + $0x6c] sm:$0xf] %vm1005_vm1, %v1537_v12  ;;  %v1316_v33 = vadd.f32 %v1315_v14, %v1314_v22  ;;  %v1121_v34 = vadd.f32 %v1120_v30, %v1119_v18  ;;  %v1319_v51 = vsel %vm1070_vm2, %v1230_v28, 0.0  ;;  %v1124_v52 = vsel %vm1070_vm2, %v1636_v8, 0.0  ;;  %v2388_v55 = vpop.f32.mrb[16].mxu1 }
 0x138   :  { %1031 = vst.msk [vmem:[%s2755_s5 + $0x64] sm:$0xf] %vm1005_vm1, %v1535_v23  ;;  %v1317_v41 = vsel %vm1070_vm2, %v1229_v32, 0.0  ;;  %v2395_v36 = vpop.f32.mrb[17].mxu1  ;;  %v1321_v47 = vsel %vm1070_vm2, %v1231_v40, 0.0  ;;  %v1236_v8 = vmul.f32 %v2213_v35, %v2213_v35  ;;  %v1550_v13 = vpack.c.bf16 %v2307_v46, %v2307_v46 }
 0x139   :  { %v1123_v45 = vadd.f32 %v1122_v39, %v1121_v34  ;;  %v1318_v48 = vadd.f32 %v1317_v41, %v1316_v33  ;;  %v2402_v58 = vpop.f32.mrb[18].mxu1  ;;  %v1553_v23 = vpack.c.bf16 %v2314_v31, %v2314_v31  ;;  %v1134_v30 = vsel %vm1070_vm2, %v2213_v35, 0.0 }
 0x13a   :  { %v1639_v50 = vpop.f32.mrb[28].mxu0  ;;  %v2408_v63 = vpop.f32.mrb[19].mxu1  ;;  %1046 = vst.msk [vmem:[%s2755_s5 + $0xa0] sm:$0xf] %vm1005_vm1, %v1550_v13  ;;  %v1551_v32 = vpack.c.bf16 %v2320_v37, %v2320_v37  ;;  %v1331_v41 = vsel %vm1070_vm2, %v1236_v8, 0.0  ;;  %v1561_v8 = vpack.c.bf16 %v2402_v58, %v2402_v58 }
 0x13b   :  { %v1540_v53 = vpack.c.bf16 %v1639_v50, %v1639_v50  ;;  %v606_v54 = vpop.f32.mrb[29].mxu0  ;;  %v1320_v56 = vadd.f32 %v1319_v51, %v1318_v48  ;;  %v1125_v21 = vadd.f32 %v1124_v52, %v1123_v45  ;;  %v1234_v42 = vmul.f32 %v1639_v50, %v1639_v50  ;;  %1049 = vst.msk [vmem:[%s2755_s5 + $0xac] sm:$0xf] %vm1005_vm1, %v1553_v23 }
 0x13c   :  { %v1538_v3 = vpack.c.bf16 %v606_v54, %v606_v54  ;;  %v1126_v57 = vsel %vm1070_vm2, %v606_v54, 0.0  ;;  %v1640_v15 = vpop.f32.mrb[30].mxu0  ;;  %v1232_v19 = vmul.f32 %v606_v54, %v606_v54  ;;  %v1130_v10 = vsel %vm1070_vm2, %v1639_v50, 0.0  ;;  %1047 = vst.msk [vmem:[%s2755_s5 + $0xa4] sm:$0xf] %vm1005_vm1, %v1551_v32 }
 0x13d   :  { %1036 = vst.msk [vmem:[%s2755_s5 + $0x78] sm:$0xf] %vm1005_vm1, %v1540_v53  ;;  %v1541_v27 = vpack.c.bf16 %v1640_v15, %v1640_v15  ;;  %v609_v16 = vpop.f32.mrb[31].mxu0  ;;  %v1127_v60 = vadd.f32 %v1126_v57, %v1125_v21  ;;  %v1322_v61 = vadd.f32 %v1321_v47, %v1320_v56  ;;  %v1235_v11 = vmul.f32 %v1640_v15, %v1640_v15 }
 0x13e   :  { %1034 = vst.msk [vmem:[%s2755_s5 + $0x70] sm:$0xf] %vm1005_vm1, %v1538_v3  ;;  %v1539_v59 = vpack.c.bf16 %v609_v16, %v609_v16  ;;  %v1323_v0 = vsel %vm1070_vm2, %v1232_v19, 0.0  ;;  %v1128_v20 = vsel %vm1070_vm2, %v609_v16, 0.0  ;;  %v1233_v6 = vmul.f32 %v609_v16, %v609_v16  ;;  %1057 = vst.msk [vmem:[%s2755_s5 + $0xcc] sm:$0xf] %vm1005_vm1, %v1561_v8 }
 0x13f   :  { %1037 = vst.msk [vmem:[%s2755_s5 + $0x7c] sm:$0xf] %vm1005_vm1, %v1541_v27  ;;  %v1324_v25 = vadd.f32 %v1323_v0, %v1322_v61  ;;  %v1129_v7 = vadd.f32 %v1128_v20, %v1127_v60  ;;  %v1327_v28 = vsel %vm1070_vm2, %v1234_v42, 0.0  ;;  %v1132_v14 = vsel %vm1070_vm2, %v1640_v15, 0.0  ;;  %v2438_v33 = vpop.f32.mrb[20].mxu1 }
 0x140   :  { %1035 = vst.msk [vmem:[%s2755_s5 + $0x74] sm:$0xf] %vm1005_vm1, %v1539_v59  ;;  %v1325_v12 = vsel %vm1070_vm2, %v1233_v6, 0.0  ;;  %v2444_v40 = vpop.f32.mrb[21].mxu1  ;;  %v1329_v35 = vsel %vm1070_vm2, %v1235_v11, 0.0  ;;  %v1556_v45 = vpack.c.bf16 %v2344_v1, %v2344_v1  ;;  %v1554_v51 = vpack.c.bf16 %v2351_v9, %v2351_v9 }
 0x141   :  { %v1131_v18 = vadd.f32 %v1130_v10, %v1129_v7  ;;  %v1326_v22 = vadd.f32 %v1325_v12, %v1324_v25  ;;  %v2456_v48 = vpop.f32.mrb[22].mxu1  ;;  %v1238_v53 = vmul.f32 %v2210_v29, %v2210_v29  ;;  %v1136_v54 = vsel %vm1070_vm2, %v2226_v49, 0.0 }
 0x142   :  { %v2460_v52 = vpop.f32.mrb[23].mxu1  ;;  %1052 = vst.msk [vmem:[%s2755_s5 + $0xb8] sm:$0xf] %vm1005_vm1, %v1556_v45  ;;  %v1557_v56 = vpack.c.bf16 %v2358_v17, %v2358_v17  ;;  %v1138_v3 = vsel %vm1070_vm2, %v2210_v29, 0.0  ;;  %1050 = vst.msk [vmem:[%s2755_s5 + $0xb0] sm:$0xf] %vm1005_vm1, %v1554_v51  ;;  %v1239_v49 = vmul.f32 %v2220_v43, %v2220_v43  ;;  %v1240_v47 = vmul.f32 %v2263_v62, %v2263_v62 }
 0x143   :  { %v1328_v34 = vadd.f32 %v1327_v28, %v1326_v22  ;;  %v1133_v39 = vadd.f32 %v1132_v14, %v1131_v18  ;;  %v1333_v15 = vsel %vm1070_vm2, %v1237_v44, 0.0  ;;  %v1555_v29 = vpack.c.bf16 %v2364_v24, %v2364_v24 }
 0x144   :  { %1053 = vst.msk [vmem:[%s2755_s5 + $0xbc] sm:$0xf] %vm1005_vm1, %v1557_v56  ;;  %v1560_v16 = vpack.c.bf16 %v2388_v55, %v2388_v55  ;;  %v1335_v60 = vsel %vm1070_vm2, %v1238_v53, 0.0  ;;  %v1140_v61 = vsel %vm1070_vm2, %v2220_v43, 0.0  ;;  %v1142_v59 = vsel %vm1070_vm2, %v2263_v62, 0.0 }
 0x145   :  { %v1135_v50 = vadd.f32 %v1134_v30, %v1133_v39  ;;  %v1330_v26 = vadd.f32 %v1329_v35, %v1328_v34  ;;  %1051 = vst.msk [vmem:[%s2755_s5 + $0xb4] sm:$0xf] %vm1005_vm1, %v1555_v29  ;;  %v1558_v42 = vpack.c.bf16 %v2395_v36, %v2395_v36  ;;  %v1337_v62 = vsel %vm1070_vm2, %v1239_v49, 0.0 }
 0x146   :  { %1056 = vst.msk [vmem:[%s2755_s5 + $0xc8] sm:$0xf] %vm1005_vm1, %v1560_v16  ;;  %v1339_v25 = vsel %vm1070_vm2, %v1240_v47, 0.0  ;;  %v1241_v7 = vmul.f32 %v2276_v5, %v2276_v5  ;;  %v1559_v13 = vpack.c.bf16 %v2408_v63, %v2408_v63  ;;  %v1242_v22 = vmul.f32 %v2256_v4, %v2256_v4 }
 0x147   :  { %v1332_v21 = vadd.f32 %v1331_v41, %v1330_v26  ;;  %v1137_v57 = vadd.f32 %v1136_v54, %v1135_v50  ;;  %v2502_v0 = vpop.f32.mrb[24].mxu1  ;;  %1054 = vst.msk [vmem:[%s2755_s5 + $0xc0] sm:$0xf] %vm1005_vm1, %v1558_v42  ;;  %v1144_v23 = vsel %vm1070_vm2, %v2276_v5, 0.0  ;;  %v1564_v28 = vpack.c.bf16 %v2438_v33, %v2438_v33 }
 0x148   :  { %v2508_v43 = vpop.f32.mrb[25].mxu1  ;;  %v1146_v14 = vsel %vm1070_vm2, %v2256_v4, 0.0  ;;  %1055 = vst.msk [vmem:[%s2755_s5 + $0xc4] sm:$0xf] %vm1005_vm1, %v1559_v13  ;;  %v1243_v5 = vmul.f32 %v2270_v2, %v2270_v2  ;;  %v1341_v34 = vsel %vm1070_vm2, %v1241_v7, 0.0  ;;  %v1244_v39 = vmul.f32 %v2307_v46, %v2307_v46 }
 0x149   :  { %v1139_v19 = vadd.f32 %v1138_v3, %v1137_v57  ;;  %v1334_v27 = vadd.f32 %v1333_v15, %v1332_v21  ;;  %v2520_v10 = vpop.f32.mrb[26].mxu1  ;;  %1060 = vst.msk [vmem:[%s2755_s5 + $0xd8] sm:$0xf] %vm1005_vm1, %v1564_v28  ;;  %v1562_v4 = vpack.c.bf16 %v2444_v40, %v2444_v40  ;;  %v1565_v44 = vpack.c.bf16 %v2456_v48, %v2456_v48 }
 0x14a   :  { %v2524_v18 = vpop.f32.mrb[27].mxu1  ;;  %v1343_v45 = vsel %vm1070_vm2, %v1242_v22, 0.0  ;;  %v1148_v50 = vsel %vm1070_vm2, %v2270_v2, 0.0  ;;  %v1150_v26 = vsel %vm1070_vm2, %v2307_v46, 0.0  ;;  %v1563_v51 = vpack.c.bf16 %v2460_v52, %v2460_v52 }
 0x14b   :  { %v1336_v20 = vadd.f32 %v1335_v60, %v1334_v27  ;;  %v1141_v6 = vadd.f32 %v1140_v61, %v1139_v19  ;;  %1058 = vst.msk [vmem:[%s2755_s5 + $0xd0] sm:$0xf] %vm1005_vm1, %v1562_v4  ;;  %1061 = vst.msk [vmem:[%s2755_s5 + $0xdc] sm:$0xf] %vm1005_vm1, %v1565_v44  ;;  %v1345_v46 = vsel %vm1070_vm2, %v1243_v5, 0.0  ;;  %v1347_v3 = vsel %vm1070_vm2, %v1244_v39, 0.0 }
 0x14c   :  { %v1245_v21 = vmul.f32 %v2320_v37, %v2320_v37  ;;  %1059 = vst.msk [vmem:[%s2755_s5 + $0xd4] sm:$0xf] %vm1005_vm1, %v1563_v51  ;;  %v1568_v57 = vpack.c.bf16 %v2502_v0, %v2502_v0  ;;  %v1566_v29 = vpack.c.bf16 %v2508_v43, %v2508_v43  ;;  %v1246_v27 = vmul.f32 %v2300_v38, %v2300_v38 }
 0x14d   :  { %v1143_v11 = vadd.f32 %v1142_v59, %v1141_v6  ;;  %v1338_v12 = vadd.f32 %v1337_v62, %v1336_v20  ;;  %v1152_v16 = vsel %vm1070_vm2, %v2320_v37, 0.0  ;;  %v1569_v60 = vpack.c.bf16 %v2520_v10, %v2520_v10 }
 0x14e   :  { %1064 = vst.msk [vmem:[%s2755_s5 + $0xe8] sm:$0xf] %vm1005_vm1, %v1568_v57  ;;  %v1154_v61 = vsel %vm1070_vm2, %v2300_v38, 0.0  ;;  %1062 = vst.msk [vmem:[%s2755_s5 + $0xe0] sm:$0xf] %vm1005_vm1, %v1566_v29  ;;  %v1247_v37 = vmul.f32 %v2314_v31, %v2314_v31  ;;  %v1349_v20 = vsel %vm1070_vm2, %v1245_v21, 0.0  ;;  %v1248_v6 = vmul.f32 %v2351_v9, %v2351_v9 }
 0x14f   :  { %v1340_v30 = vadd.f32 %v1339_v25, %v1338_v12  ;;  %v1145_v32 = vadd.f32 %v1144_v23, %v1143_v11  ;;  %v2566_v53 = vpop.f32.mrb[28].mxu1  ;;  %1065 = vst.msk [vmem:[%s2755_s5 + $0xec] sm:$0xf] %vm1005_vm1, %v1569_v60  ;;  %v1567_v38 = vpack.c.bf16 %v2524_v18, %v2524_v18  ;;  %v1351_v8 = vsel %vm1070_vm2, %v1246_v27, 0.0 }
 0x150   :  { %v2572_v2 = vpop.f32.mrb[29].mxu1  ;;  %v1572_v7 = vpack.c.bf16 %v2566_v53, %v2566_v53  ;;  %v1156_v11 = vsel %vm1070_vm2, %v2314_v31, 0.0  ;;  %v1158_v12 = vsel %vm1070_vm2, %v2351_v9, 0.0  ;;  %v1353_v31 = vsel %vm1070_vm2, %v1247_v37, 0.0 }
 0x151   :  { %v1147_v35 = vadd.f32 %v1146_v14, %v1145_v32  ;;  %v1342_v41 = vadd.f32 %v1341_v34, %v1340_v30  ;;  %v2584_v49 = vpop.f32.mrb[30].mxu1  ;;  %1063 = vst.msk [vmem:[%s2755_s5 + $0xe4] sm:$0xf] %vm1005_vm1, %v1567_v38  ;;  %v1570_v13 = vpack.c.bf16 %v2572_v2, %v2572_v2  ;;  %v1355_v28 = vsel %vm1070_vm2, %v1248_v6, 0.0 }
 0x152   :  { %v2588_v19 = vpop.f32.mrb[31].mxu1  ;;  %1068 = vst.msk [vmem:[%s2755_s5 + $0xf8] sm:$0xf] %vm1005_vm1, %v1572_v7  ;;  %v1249_v9 = vmul.f32 %v2364_v24, %v2364_v24  ;;  %v1573_v14 = vpack.c.bf16 %v2584_v49, %v2584_v49  ;;  %v1250_v34 = vmul.f32 %v2344_v1, %v2344_v1  ;;  %v1160_v39 = vsel %vm1070_vm2, %v2364_v24, 0.0 }
 0x153   :  { %v1344_v54 = vadd.f32 %v1343_v45, %v1342_v41  ;;  %v1149_v56 = vadd.f32 %v1148_v50, %v1147_v35  ;;  %1066 = vst.msk [vmem:[%s2755_s5 + $0xf0] sm:$0xf] %vm1005_vm1, %v1570_v13  ;;  %v1571_v5 = vpack.c.bf16 %v2588_v19, %v2588_v19  ;;  %v1162_v41 = vsel %vm1070_vm2, %v2344_v1, 0.0 }
 0x154   :  { %1069 = vst.msk [vmem:[%s2755_s5 + $0xfc] sm:$0xf] %vm1005_vm1, %v1573_v14  ;;  %v1251_v44 = vmul.f32 %v2358_v17, %v2358_v17  ;;  %v1357_v24 = vsel %vm1070_vm2, %v1249_v9, 0.0  ;;  %v1252_v45 = vmul.f32 %v2395_v36, %v2395_v36  ;;  %v1359_v51 = vsel %vm1070_vm2, %v1250_v34, 0.0 }
 0x155   :  { %v1151_v15 = vadd.f32 %v1150_v26, %v1149_v56  ;;  %v1346_v47 = vadd.f32 %v1345_v46, %v1344_v54  ;;  %1067 = vst.msk [vmem:[%s2755_s5 + $0xf4] sm:$0xf] %vm1005_vm1, %v1571_v5  ;;  %v1164_v54 = vsel %vm1070_vm2, %v2358_v17, 0.0  ;;  %v1166_v56 = vsel %vm1070_vm2, %v2395_v36, 0.0 }
 0x156   :  { %v1363_v21 = vsel %vm1070_vm2, %v1252_v45, 0.0  ;;  %v1253_v57 = vmul.f32 %v2408_v63, %v2408_v63  ;;  %v1254_v29 = vmul.f32 %v2388_v55, %v2388_v55  ;;  %v1168_v17 = vsel %vm1070_vm2, %v2408_v63, 0.0 }
 0x157   :  { %v1348_v59 = vadd.f32 %v1347_v3, %v1346_v47  ;;  %v1153_v42 = vadd.f32 %v1152_v16, %v1151_v15  ;;  %v1361_v3 = vsel %vm1070_vm2, %v1251_v44, 0.0  ;;  %v1170_v36 = vsel %vm1070_vm2, %v2388_v55, 0.0 }
 0x158   :  { %v1255_v60 = vmul.f32 %v2402_v58, %v2402_v58  ;;  %v1172_v63 = vsel %vm1070_vm2, %v2402_v58, 0.0  ;;  %v1174_v6 = vsel %vm1070_vm2, %v2444_v40, 0.0  ;;  %v1257_v7 = vmul.f32 %v2460_v52, %v2460_v52 }
 0x159   :  { %v1155_v62 = vadd.f32 %v1154_v61, %v1153_v42  ;;  %v1350_v25 = vadd.f32 %v1349_v20, %v1348_v59  ;;  %v1365_v61 = vsel %vm1070_vm2, %v1253_v57, 0.0  ;;  %v1256_v59 = vmul.f32 %v2444_v40, %v2444_v40 }
 0x15a   :  { %v1367_v20 = vsel %vm1070_vm2, %v1254_v29, 0.0  ;;  %v1176_v58 = vsel %vm1070_vm2, %v2460_v52, 0.0  ;;  %v1178_v40 = vsel %vm1070_vm2, %v2438_v33, 0.0  ;;  %v1180_v52 = vsel %vm1070_vm2, %v2456_v48, 0.0 }
 0x15b   :  { %v1352_v22 = vadd.f32 %v1351_v8, %v1350_v25  ;;  %v1157_v23 = vadd.f32 %v1156_v11, %v1155_v62  ;;  %v1369_v62 = vsel %vm1070_vm2, %v1255_v60, 0.0  ;;  %v1371_v25 = vsel %vm1070_vm2, %v1256_v59, 0.0 }
 0x15c   :  { %v1262_v44 = vmul.f32 %v2502_v0, %v2502_v0 }
 0x15d   :  { %v1159_v30 = vadd.f32 %v1158_v12, %v1157_v23  ;;  %v1354_v32 = vadd.f32 %v1353_v31, %v1352_v22  ;;  %v1258_v12 = vmul.f32 %v2438_v33, %v2438_v33  ;;  %v1259_v23 = vmul.f32 %v2456_v48, %v2456_v48 }
 0x15e   :  { %v1373_v31 = vsel %vm1070_vm2, %v1257_v7, 0.0  ;;  %v1184_v48 = vsel %vm1070_vm2, %v2524_v18, 0.0 }
 0x15f   :  { %v1356_v4 = vadd.f32 %v1355_v28, %v1354_v32  ;;  %v1161_v35 = vadd.f32 %v1160_v39, %v1159_v30  ;;  %v1260_v28 = vmul.f32 %v2508_v43, %v2508_v43  ;;  %v1375_v30 = vsel %vm1070_vm2, %v1258_v12, 0.0 }
 0x160   :  { %v1182_v32 = vsel %vm1070_vm2, %v2508_v43, 0.0  ;;  %v1377_v34 = vsel %vm1070_vm2, %v1259_v23, 0.0  ;;  %v1186_v43 = vsel %vm1070_vm2, %v2502_v0, 0.0 }
 0x161   :  { %v1163_v50 = vadd.f32 %v1162_v41, %v1161_v35  ;;  %v1358_v26 = vadd.f32 %v1357_v24, %v1356_v4  ;;  %v1379_v39 = vsel %vm1070_vm2, %v1260_v28, 0.0  ;;  %v1261_v4 = vmul.f32 %v2524_v18, %v2524_v18 }
 0x162   :  { %v1188_v18 = vsel %vm1070_vm2, %v2520_v10, 0.0 }
 0x163   :  { %v1360_v46 = vadd.f32 %v1359_v51, %v1358_v26  ;;  %v1165_v1 = vadd.f32 %v1164_v54, %v1163_v50  ;;  %v1263_v50 = vmul.f32 %v2520_v10, %v2520_v10  ;;  %v1381_v26 = vsel %vm1070_vm2, %v1261_v4, 0.0 }
 0x164   :  { %v1264_v51 = vmul.f32 %v2572_v2, %v2572_v2  ;;  %v1192_v10 = vsel %vm1070_vm2, %v2588_v19, 0.0 }
 0x165   :  { %v1167_v15 = vadd.f32 %v1166_v56, %v1165_v1  ;;  %v1362_v47 = vadd.f32 %v1361_v3, %v1360_v46  ;;  %v1383_v46 = vsel %vm1070_vm2, %v1262_v44, 0.0  ;;  %v1190_v1 = vsel %vm1070_vm2, %v2572_v2, 0.0 }
 0x166   :  { %v1387_v57 = vsel %vm1070_vm2, %v1264_v51, 0.0  ;;  %v1194_v2 = vsel %vm1070_vm2, %v2566_v53, 0.0 }
 0x167   :  { %v1364_v27 = vadd.f32 %v1363_v21, %v1362_v47  ;;  %v1169_v16 = vadd.f32 %v1168_v17, %v1167_v15  ;;  %v1385_v21 = vsel %vm1070_vm2, %v1263_v50, 0.0  ;;  %v1265_v15 = vmul.f32 %v2588_v19, %v2588_v19 }
 0x168   :  { %v1266_v17 = vmul.f32 %v2566_v53, %v2566_v53 }
 0x169   :  { %v1171_v42 = vadd.f32 %v1170_v36, %v1169_v16  ;;  %v1366_v37 = vadd.f32 %v1365_v61, %v1364_v27  ;;  %v1267_v36 = vmul.f32 %v2584_v49, %v2584_v49  ;;  %v1389_v60 = vsel %vm1070_vm2, %v1265_v15, 0.0 }
 0x16b   :  { %v1368_v38 = vadd.f32 %v1367_v20, %v1366_v37  ;;  %v1173_v55 = vadd.f32 %v1172_v63, %v1171_v42  ;;  %v1391_v42 = vsel %vm1070_vm2, %v1266_v17, 0.0  ;;  %v1196_v37 = vsel %vm1070_vm2, %v2584_v49, 0.0 }
 0x16c   :  { %v1393_v19 = vsel %vm1070_vm2, %v1267_v36, 0.0 }
 0x16d   :  { %v1175_v8 = vadd.f32 %v1174_v6, %v1173_v55  ;;  %v1370_v11 = vadd.f32 %v1369_v62, %v1368_v38 }
 0x16f   :  { %v1372_v13 = vadd.f32 %v1371_v25, %v1370_v11  ;;  %v1177_v22 = vadd.f32 %v1176_v58, %v1175_v8 }
 0x171   :  { %v1179_v9 = vadd.f32 %v1178_v40, %v1177_v22  ;;  %v1374_v14 = vadd.f32 %v1373_v31, %v1372_v13 }
 0x173   :  { %v1376_v5 = vadd.f32 %v1375_v30, %v1374_v14  ;;  %v1181_v33 = vadd.f32 %v1180_v52, %v1179_v9 }
 0x175   :  { %v1183_v35 = vadd.f32 %v1182_v32, %v1181_v33  ;;  %v1378_v41 = vadd.f32 %v1377_v34, %v1376_v5 }
 0x177   :  { %v1380_v24 = vadd.f32 %v1379_v39, %v1378_v41  ;;  %v1185_v45 = vadd.f32 %v1184_v48, %v1183_v35 }
 0x179   :  { %v1187_v54 = vadd.f32 %v1186_v43, %v1185_v45  ;;  %v1382_v56 = vadd.f32 %v1381_v26, %v1380_v24 }
 0x17b   :  { %v1384_v3 = vadd.f32 %v1383_v46, %v1382_v56  ;;  %v1189_v0 = vadd.f32 %v1188_v18, %v1187_v54 }
 0x17d   :  { %v1191_v47 = vadd.f32 %v1190_v1, %v1189_v0  ;;  %v1386_v29 = vadd.f32 %v1385_v21, %v1384_v3 }
 0x17f   :  { %v1388_v27 = vadd.f32 %v1387_v57, %v1386_v29  ;;  %v1193_v16 = vadd.f32 %v1192_v10, %v1191_v47 }
 0x181   :  { %v1195_v61 = vadd.f32 %v1194_v2, %v1193_v16  ;;  %v1390_v59 = vadd.f32 %v1389_v60, %v1388_v27 }
 0x183   :  { %v1197_v20 = vadd.f32 %v1196_v37, %v1195_v61  ;;  %v1392_v63 = vadd.f32 %v1391_v42, %v1390_v59 }
 0x185   :  { %v1198_v6 = vrot.slane %v1197_v20, 4  ;;  %v1394_v38 = vadd.f32 %v1393_v19, %v1392_v63 }
 0x187   :  { %v1199_v55 = vadd.f32 %v1198_v6, %v1197_v20  ;;  %v1395_v53 = vrot.slane %v1394_v38, 4 }
 0x189   :  { %v1200_v62 = vrot.slane %v1199_v55, 2  ;;  %v1396_v25 = vadd.f32 %v1395_v53, %v1394_v38 }
 0x18b   :  { %v1201_v7 = vadd.f32 %v1200_v62, %v1199_v55  ;;  %v1397_v8 = vrot.slane %v1396_v25, 2 }
 0x18d   :  { %v1202_v11 = vrot.slane %v1201_v7, 1  ;;  %v1398_v12 = vadd.f32 %v1397_v8, %v1396_v25 }
 0x18f   :  { %v1399_v58 = vrot.slane %v1398_v12, 1  ;;  %v1203_v13 = vadd.f32 %v1202_v11, %v1201_v7 }
 0x191   :  { %v1400_v22 = vadd.f32 %v1399_v58, %v1398_v12 }
 0x193   :  { %v1402_v49 = vsel %vm1401_vm3, %v1203_v13, %v1400_v22 }
 0x194   :  { %1404 = vst.msk [vmem:[%s2756_s6] sm:$0x3] %vm1403_vm4, %v1402_v49 }

// kernel: resnetv2_bottleneck_forward.7
= control target key start
LH: loop header
LB: loop body
LE: loop exit
PB: predicated region body
PF: predicated region fallthrough
CT: control target
= control target key end

     0   :  { %vm186_vm0 = vcmask 1043456   ;;  %vm319_vm1 = vcmask 130048   ;;  %s825_s0 = inlined_call_operand.vmem [shape: bf16[128,8], index: 0, kind: input, shape index: {}]   ;;  %s826_s1 = inlined_call_operand.vmem [shape: f32[2,8], index: 1, kind: input, shape index: {}]   ;;  %s827_s2 = inlined_call_operand.vmem [shape: f32[1,8], index: 2, kind: input, shape index: {}]   ;;  %s828_s3 = inlined_call_operand.vmem [shape: f32[1,8], index: 3, kind: input, shape index: {}]   ;;  %s829_s4 = inlined_call_operand.vmem [shape: bf16[8,32], index: 4, kind: input, shape index: {}]   ;;  %s830_s5 = inlined_call_operand.vmem [shape: f32[128,16], index: 5, kind: input, shape index: {}]   ;;  %s831_s6 = inlined_call_operand.vmem [shape: bf16[16,32], index: 6, kind: input, shape index: {}]   ;;  %s832_s7 = inlined_call_operand.hbm [shape: f32[128,32], index: 7, kind: output, shape index: {}]  }
   0x1   :  { %v605_v0 = vld [vmem:[%s831_s6] sm:$0xff]   ;;  %v288_v3 = vld [vmem:[%s830_s5 + $0x8] sm:$0xff]  ;;  %v289_v6 = vld [vmem:[%s830_s5 + $0x10] sm:$0xff] }
   0x2   :  { %v160_v1 = vld [vmem:[%s829_s4] sm:$0xf]  ;;  %566 = vmatprep.subr.bf16.mxu0 %v605_v0  ;;  %v290_v7 = vld [vmem:[%s830_s5 + $0x18] sm:$0xff]  ;;  %v292_v12 = vld [vmem:[%s830_s5 + $0x28] sm:$0xff] }
   0x3   :  { %v287_v2 = vld [vmem:[%s830_s5] sm:$0xff]  ;;  %600 = vmatprep.subr.msk.bf16.mxu1 %vm186_vm0, %v160_v1  ;;  %v188_v5 = vsel %vm186_vm0, %v160_v1, 0  ;;  %567 = vmatpush3.bf16.msra.mxu0 %v605_v0  ;;  %v304_v9 = vpack.c.bf16 %v290_v7, %v289_v6  ;;  %v293_v16 = vld [vmem:[%s830_s5 + $0x30] sm:$0xff]  ;;  %v294_v17 = vld [vmem:[%s830_s5 + $0x38] sm:$0xff] }
   0x4   :  { %v303_v4 = vpack.c.bf16 %v288_v3, %v287_v2  ;;  %v28_v8 = vld [vmem:[%s826_s1] sm:$0x3]  ;;  %549 = vmatpush3.bf16.msra.mxu1 %v188_v5  ;;  %v296_v19 = vld [vmem:[%s830_s5 + $0x48] sm:$0xff]  ;;  %v306_v21 = vpack.c.bf16 %v294_v17, %v293_v16 }
   0x5   :  { %v31_v10 = vmul.f32 0.0078125, %v28_v8  ;;  %v291_v11 = vld [vmem:[%s830_s5 + $0x20] sm:$0xff] }
   0x6   :  { %568 = vmatprep.mubr.msk.bf16.mxu0 %vm319_vm1, %v303_v4  ;;  %v305_v14 = vpack.c.bf16 %v292_v12, %v291_v11  ;;  %v295_v18 = vld [vmem:[%s830_s5 + $0x40] sm:$0xff] }
   0x7   :  { %v32_v13 = vmul.f32 %v31_v10, %v31_v10  ;;  %569 = vmatmul.mubr.msk.bf16.vlgmr.msra.gmra.mrb[0].mxu0 %vm319_vm1, %v304_v9 }
   0x8   :  { %572 = vmatprep.mubr.msk.bf16.mxu0 %vm319_vm1, %v305_v14 }
   0x9   :  { %v34_v15 = vrot.slane %v32_v13, 7 }
   0xb   :  { %v36_v20 = vsub.f32 %v31_v10, %v34_v15 }
   0xc   :  { %12 = vsyncpa [#allocation3], 0  ;;  %v307_v23 = vpack.c.bf16 %v296_v19, %v295_v18  ;;  %v632_v25 = vmov 1966171168   ;;  %v44_v27 = vlaneseq  ;;  %v297_v28 = vld [vmem:[%s830_s5 + $0x50] sm:$0xff]  ;;  %v298_v29 = vld [vmem:[%s830_s5 + $0x58] sm:$0xff] }
   0xd   :  { %v37_v22 = vmax.f32 %v36_v20, 0.0  ;;  %v42_v26 = vunpack.c.l.s4 %v632_v25  ;;  %v299_v30 = vld [vmem:[%s830_s5 + $0x60] sm:$0xff]  ;;  %v300_v31 = vld [vmem:[%s830_s5 + $0x68] sm:$0xff]  ;;  %v308_v34 = vpack.c.bf16 %v298_v29, %v297_v28  ;;  %v301_v37 = vld [vmem:[%s830_s5 + $0x70] sm:$0xff]  ;;  %vm161_vm2 = vcmask 64512  }
   0xe   :  { %v45_v33 = vshrl.u32 %v44_v27, 7  ;;  %v309_v35 = vpack.c.bf16 %v300_v31, %v299_v30  ;;  %v302_v38 = vld [vmem:[%s830_s5 + $0x78] sm:$0xff]  ;;  %v29_v43 = vld [vmem:[%s827_s2] sm:$0x1]  ;;  %v523_v45 = vld [vmem:[%s825_s0 + $0x8] sm:$0xff]   ;;  %vm441_vm3 = vcmask 261120  }
   0xf   :  { %v38_v24 = vadd.f32 1e-05, %v37_v22  ;;  %573 = vmatmul.mubr.msk.bf16.gmra.mrb[4].mxu0 %vm319_vm1, %v306_v21  ;;  %v43_v32 = vunpack.c.0.s8 %v42_v26  ;;  %v310_v41 = vpack.c.bf16 %v302_v38, %v301_v37  ;;  %v492_v44 = vld [vmem:[%s825_s0] sm:$0xff]   ;;  %v524_v48 = vld [vmem:[%s825_s0 + $0x10] sm:$0xff]   ;;  %v497_v52 = vunpack.c.l.bf16 %v523_v45  ;;  %v525_v53 = vld [vmem:[%s825_s0 + $0x18] sm:$0xff]  }
  0x10   :  { %576 = vmatprep.mubr.msk.bf16.mxu0 %vm319_vm1, %v307_v23  ;;  %v95_v47 = vsub.s32 0, %v45_v33  ;;  %v493_v50 = vunpack.c.l.bf16 %v492_v44  ;;  %v494_v51 = vunpack.c.h.bf16 %v492_v44  ;;  %v526_v54 = vld [vmem:[%s825_s0 + $0x20] sm:$0xff]   ;;  %v498_v56 = vunpack.c.h.bf16 %v523_v45  ;;  %v527_v1 = vld [vmem:[%s825_s0 + $0x28] sm:$0xff]   ;;  %v528_v12 = vld [vmem:[%s825_s0 + $0x30] sm:$0xff]  }
  0x11   :  { %606 = vrsqrt.f32 %v38_v24  ;;  %v46_v36 = vsub.s32 %v43_v32, %v45_v33  ;;  %v30_v55 = vld [vmem:[%s828_s3] sm:$0x1]  ;;  %v501_v57 = vunpack.c.l.bf16 %v524_v48  ;;  %v502_v58 = vunpack.c.h.bf16 %v524_v48 }
  0x12   :  { %v505_v61 = vunpack.c.l.bf16 %v525_v53  ;;  %v506_v62 = vunpack.c.h.bf16 %v525_v53  ;;  %v509_v63 = vunpack.c.l.bf16 %v526_v54  ;;  %v510_v0 = vunpack.c.h.bf16 %v526_v54 }
  0x13   :  { %v514_v11 = vunpack.c.h.bf16 %v527_v1  ;;  %v517_v23 = vunpack.c.l.bf16 %v528_v12  ;;  %v518_v24 = vunpack.c.h.bf16 %v528_v12 }
  0x17   :  { %577 = vmatmul.mubr.msk.bf16.gmra.mrb[8].mxu0 %vm319_vm1, %v308_v34 }
  0x18   :  { %580 = vmatprep.mubr.msk.bf16.mxu0 %vm319_vm1, %v309_v35 }
  0x1b   :  { %v607_v39 = vpop.eup %606 }
  0x1c   :  { %v47_v40 = vrot.slane %v607_v39, %v46_v36 }
  0x1e   :  { %v48_v42 = vcombine.high %v47_v40, %v47_v40 }
  0x1f   :  { %581 = vmatmul.mubr.msk.bf16.gmra.mrb[12].mxu0 %vm319_vm1, %v310_v41 }
  0x20   :  { %v55_v46 = vrot.slane %v48_v42, %v46_v36  ;;  %v529_v42 = vld [vmem:[%s825_s0 + $0x38] sm:$0xff]   ;;  %s633_s0 = smov [#allocation2]  }
  0x21   :  { %s463_s27 = sshll.u32 %s633_s0, 4  ;;  %s464_s27 = int_to_ptr.vmem [resolvable:$true] %s463_s27 }
  0x22   :  { %v57_v49 = vmul.f32 %v55_v46, %v29_v43  ;;  %s608_s28 = scalar_lea.vmem %s464_s27, 2048  ;;  %p613_p1 = scmp.lt.s32.totalorder %s464_s27, %s464_s27 }
  0x23   :  { %p609_p0 = scmp.ne.s32.totalorder %s464_s27, %s608_s28  ;;  %p614_p2 = scmp.lt.s32.totalorder %s608_s28, %s608_s28 }
  0x24   :  { %v58_v59 = vmul.f32 %v57_v49, %v31_v10  ;;  %v762_v60 = vrot.slane %v57_v49, %v95_v47  ;;  %v513_v10 = vunpack.c.l.bf16 %v527_v1 }
  0x25   :  { %p615_p3 = por %p614_p2, %p613_p1 }
  0x26   :  { %v59_v2 = vsub.f32 %v30_v55, %v58_v59  ;;  %v98_v3 = vmul.f32 %v493_v50, %v762_v60  ;;  %v99_v4 = vmul.f32 %v494_v51, %v762_v60  ;;  %v100_v5 = vmul.f32 %v497_v52, %v762_v60 }
  0x27   :  { %v101_v6 = vmul.f32 %v498_v56, %v762_v60  ;;  %v102_v7 = vmul.f32 %v501_v57, %v762_v60  ;;  %v103_v8 = vmul.f32 %v502_v58, %v762_v60  ;;  %v104_v13 = vmul.f32 %v505_v61, %v762_v60  ;;  %p616_p4 = pnand %p615_p3, %p609_p0 }
  0x28   :  { %v118_v9 = vrot.slane %v59_v2, %v95_v47  ;;  %v105_v14 = vmul.f32 %v506_v62, %v762_v60  ;;  %v106_v15 = vmul.f32 %v509_v63, %v762_v60  ;;  %v107_v16 = vmul.f32 %v510_v0, %v762_v60 }
  0x29   :  { %v108_v40 = vmul.f32 %v513_v10, %v762_v60  ;;  %v109_v41 = vmul.f32 %v514_v11, %v762_v60  ;;  %v110_v45 = vmul.f32 %v517_v23, %v762_v60  ;;  %v111_v46 = vmul.f32 %v518_v24, %v762_v60 }
  0x2a   :  { %v120_v17 = vadd.f32 %v118_v9, %v98_v3  ;;  %v121_v18 = vadd.f32 %v118_v9, %v99_v4  ;;  %v122_v19 = vadd.f32 %v118_v9, %v100_v5  ;;  %v123_v20 = vadd.f32 %v118_v9, %v101_v6 }
  0x2b   :  { %v124_v21 = vadd.f32 %v118_v9, %v102_v7  ;;  %v125_v22 = vadd.f32 %v118_v9, %v103_v8  ;;  %v126_v31 = vadd.f32 %v118_v9, %v104_v13  ;;  %v127_v32 = vadd.f32 %v118_v9, %v105_v14 }
  0x2c   :  { %v136_v25 = vmax.f32 %v120_v17, 0.0  ;;  %v137_v26 = vmax.f32 %v121_v18, 0.0  ;;  %v138_v27 = vmax.f32 %v122_v19, 0.0  ;;  %v139_v28 = vmax.f32 %v123_v20, 0.0 }
  0x2d   :  { %v140_v29 = vmax.f32 %v124_v21, 0.0  ;;  %v141_v30 = vmax.f32 %v125_v22, 0.0  ;;  %v128_v35 = vadd.f32 %v118_v9, %v106_v15  ;;  %v129_v36 = vadd.f32 %v118_v9, %v107_v16 }
  0x2e   :  { %v152_v33 = vpack.c.bf16 %v137_v26, %v136_v25  ;;  %v153_v34 = vpack.c.bf16 %v139_v28, %v138_v27  ;;  %v142_v38 = vmax.f32 %v126_v31, 0.0  ;;  %v143_v39 = vmax.f32 %v127_v32, 0.0 }
  0x2f   :  { %v154_v37 = vpack.c.bf16 %v141_v30, %v140_v29  ;;  %v144_v43 = vmax.f32 %v128_v35, 0.0  ;;  %v145_v44 = vmax.f32 %v129_v36, 0.0  ;;  %v521_v47 = vunpack.c.l.bf16 %v529_v42 }
  0x30   :  { %550 = vmatprep.mubr.msk.bf16.mxu1 %vm161_vm2, %v152_v33  ;;  %v155_v48 = vpack.c.bf16 %v143_v39, %v142_v38  ;;  %v130_v49 = vadd.f32 %v118_v9, %v108_v40  ;;  %v131_v50 = vadd.f32 %v118_v9, %v109_v41  ;;  %v522_v51 = vunpack.c.h.bf16 %v529_v42 }
  0x31   :  { %551 = vmatmul.mubr.msk.bf16.vlgmr.msra.gmra.mrb[0].mxu1 %vm161_vm2, %v153_v34  ;;  %v156_v52 = vpack.c.bf16 %v145_v44, %v144_v43  ;;  %v132_v53 = vadd.f32 %v118_v9, %v110_v45  ;;  %v133_v54 = vadd.f32 %v118_v9, %v111_v46  ;;  %v112_v57 = vmul.f32 %v521_v47, %v762_v60 }
  0x32   :  { %554 = vmatprep.mubr.msk.bf16.mxu1 %vm161_vm2, %v154_v37  ;;  %v146_v55 = vmax.f32 %v130_v49, 0.0  ;;  %v147_v56 = vmax.f32 %v131_v50, 0.0  ;;  %v113_v58 = vmul.f32 %v522_v51, %v762_v60 }
  0x33   :  { %v148_v59 = vmax.f32 %v132_v53, 0.0  ;;  %v149_v61 = vmax.f32 %v133_v54, 0.0  ;;  %v134_v63 = vadd.f32 %v118_v9, %v112_v57 }
  0x34   :  { %v157_v62 = vpack.c.bf16 %v147_v56, %v146_v55  ;;  %v135_v0 = vadd.f32 %v118_v9, %v113_v58 }
  0x35   :  { %v158_v1 = vpack.c.bf16 %v149_v61, %v148_v59  ;;  %v150_v2 = vmax.f32 %v134_v63, 0.0 }
  0x36   :  { %v151_v3 = vmax.f32 %v135_v0, 0.0 }
  0x38   :  { %v159_v4 = vpack.c.bf16 %v151_v3, %v150_v2 }
  0x39   :  { %555 = vmatmul.mubr.msk.bf16.gmra.mrb[4].mxu1 %vm161_vm2, %v155_v48 }
  0x3a   :  { %558 = vmatprep.mubr.msk.bf16.mxu1 %vm161_vm2, %v156_v52 }
  0x41   :  { %559 = vmatmul.mubr.msk.bf16.gmra.mrb[8].mxu1 %vm161_vm2, %v157_v62 }
  0x42   :  { %562 = vmatprep.mubr.msk.bf16.mxu1 %vm161_vm2, %v158_v1 }
  0x49   :  { %563 = vmatmul.mubr.msk.bf16.gmra.mrb[12].mxu1 %vm161_vm2, %v159_v4 }
  0xda   :  { %v570_v5 = vpop.f32.mrb[0].mxu0 }
  0xdb   :  { %v378_v6 = vpop.f32.mrb[1].mxu0 }
  0xdc   :  { %v571_v60 = vpop.f32.mrb[2].mxu0 }
  0xdd   :  { %v381_v7 = vpop.f32.mrb[3].mxu0 }
  0xe2   :  { %v574_v8 = vpop.f32.mrb[4].mxu0 }
  0xe3   :  { %v394_v10 = vpop.f32.mrb[5].mxu0 }
  0xe4   :  { %v575_v11 = vpop.f32.mrb[6].mxu0 }
  0xe5   :  { %v397_v12 = vpop.f32.mrb[7].mxu0 }
  0xea   :  { %v578_v13 = vpop.f32.mrb[8].mxu0 }
  0xeb   :  { %v410_v9 = vpop.f32.mrb[9].mxu0 }
  0xec   :  { %v579_v14 = vpop.f32.mrb[10].mxu0 }
  0xed   :  { %v413_v15 = vpop.f32.mrb[11].mxu0 }
  0xf2   :  { %v582_v16 = vpop.f32.mrb[12].mxu0 }
  0xf3   :  { %v426_v17 = vpop.f32.mrb[13].mxu0 }
  0xf4   :  { %v583_v18 = vpop.f32.mrb[14].mxu0 }
  0xf5   :  { %v429_v19 = vpop.f32.mrb[15].mxu0 }
 0x104   :  { %v552_v20 = vpop.f32.mrb[0].mxu1 }
 0x105   :  { %v387_v21 = vadd.f32 %v570_v5, %v552_v20  ;;  %v224_v22 = vpop.f32.mrb[1].mxu1 }
 0x106   :  { %v379_v23 = vadd.f32 %v378_v6, %v224_v22  ;;  %v553_v24 = vpop.f32.mrb[2].mxu1 }
 0x107   :  { %444 = vst.msk [vmem:[#allocation2 + $0x10] sm:$0xff] %vm441_vm3, %v387_v21  ;;  %v390_v25 = vadd.f32 %v571_v60, %v553_v24  ;;  %v227_v26 = vpop.f32.mrb[3].mxu1 }
 0x108   :  { %442 = vst.msk [vmem:[#allocation2] sm:$0xff] %vm441_vm3, %v379_v23  ;;  %v382_v27 = vadd.f32 %v381_v7, %v227_v26 }
 0x109   :  { %445 = vst.msk [vmem:[#allocation2 + $0x18] sm:$0xff] %vm441_vm3, %v390_v25 }
 0x10a   :  { %443 = vst.msk [vmem:[#allocation2 + $0x8] sm:$0xff] %vm441_vm3, %v382_v27 }
 0x10c   :  { %v556_v28 = vpop.f32.mrb[4].mxu1 }
 0x10d   :  { %v403_v29 = vadd.f32 %v574_v8, %v556_v28  ;;  %v240_v30 = vpop.f32.mrb[5].mxu1 }
 0x10e   :  { %v395_v31 = vadd.f32 %v394_v10, %v240_v30  ;;  %v557_v32 = vpop.f32.mrb[6].mxu1 }
 0x10f   :  { %448 = vst.msk [vmem:[#allocation2 + $0x30] sm:$0xff] %vm441_vm3, %v403_v29  ;;  %v406_v33 = vadd.f32 %v575_v11, %v557_v32  ;;  %v243_v34 = vpop.f32.mrb[7].mxu1 }
 0x110   :  { %446 = vst.msk [vmem:[#allocation2 + $0x20] sm:$0xff] %vm441_vm3, %v395_v31  ;;  %v398_v35 = vadd.f32 %v397_v12, %v243_v34 }
 0x111   :  { %449 = vst.msk [vmem:[#allocation2 + $0x38] sm:$0xff] %vm441_vm3, %v406_v33 }
 0x112   :  { %447 = vst.msk [vmem:[#allocation2 + $0x28] sm:$0xff] %vm441_vm3, %v398_v35 }
 0x114   :  { %v560_v36 = vpop.f32.mrb[8].mxu1 }
 0x115   :  { %v419_v37 = vadd.f32 %v578_v13, %v560_v36  ;;  %v256_v38 = vpop.f32.mrb[9].mxu1 }
 0x116   :  { %v411_v39 = vadd.f32 %v410_v9, %v256_v38  ;;  %v561_v40 = vpop.f32.mrb[10].mxu1 }
 0x117   :  { %452 = vst.msk [vmem:[#allocation2 + $0x50] sm:$0xff] %vm441_vm3, %v419_v37  ;;  %v422_v41 = vadd.f32 %v579_v14, %v561_v40  ;;  %v259_v42 = vpop.f32.mrb[11].mxu1 }
 0x118   :  { %450 = vst.msk [vmem:[#allocation2 + $0x40] sm:$0xff] %vm441_vm3, %v411_v39  ;;  %v414_v43 = vadd.f32 %v413_v15, %v259_v42 }
 0x119   :  { %453 = vst.msk [vmem:[#allocation2 + $0x58] sm:$0xff] %vm441_vm3, %v422_v41 }
 0x11a   :  { %451 = vst.msk [vmem:[#allocation2 + $0x48] sm:$0xff] %vm441_vm3, %v414_v43 }
 0x11c   :  { %v564_v44 = vpop.f32.mrb[12].mxu1 }
 0x11d   :  { %v435_v45 = vadd.f32 %v582_v16, %v564_v44  ;;  %v272_v46 = vpop.f32.mrb[13].mxu1 }
 0x11e   :  { %v427_v47 = vadd.f32 %v426_v17, %v272_v46  ;;  %v565_v48 = vpop.f32.mrb[14].mxu1 }
 0x11f   :  { %456 = vst.msk [vmem:[#allocation2 + $0x70] sm:$0xff] %vm441_vm3, %v435_v45  ;;  %v438_v49 = vadd.f32 %v583_v18, %v565_v48  ;;  %v275_v50 = vpop.f32.mrb[15].mxu1 }
 0x120   :  { %454 = vst.msk [vmem:[#allocation2 + $0x60] sm:$0xff] %vm441_vm3, %v427_v47  ;;  %v430_v51 = vadd.f32 %v429_v19, %v275_v50 }
 0x121   :  { %457 = vst.msk [vmem:[#allocation2 + $0x78] sm:$0xff] %vm441_vm3, %v438_v49 }
 0x122   :  { %455 = vst.msk [vmem:[#allocation2 + $0x68] sm:$0xff] %vm441_vm3, %v430_v51 }
 0x123   :  { %619 = shalt.err (!%p616_p4)
}
 0x124   :  { %s620_s8 = scalar_lea.hbm %s832_s7, 2048 }
 0x125   :  { %p621_p5 = scmp.ne.s32.totalorder %s832_s7, %s620_s8  ;;  %p624_p6 = scmp.lt.u32.totalorder %s620_s8, %s832_s7 }
 0x127   :  { %p626_p7 = pnand %p624_p6, %p621_p5 }
 0x129   :  { %629 = shalt.err (!%p626_p7)
}
 0x12a   :  { %s634_s4 = smov 128   ;;  %s635_s12 = smov 8  }
 0x12b   :  { %469 = dma.vmem_to_hbm [thread:$0]  %s464_s27, 2048, %s832_s7, [#allocation3], %s634_s4, %s634_s4, %s635_s12  }
 0x12c   :  { %630 = dma.done.wait [#allocation3], 2048  }
 0x12d   :  { %631 = vsyncadd [#allocation3], 4294965248 }
 0x12e   :  { %473 = vsyncpa [#allocation3], 1 }

// kernel: resnetv2_bottleneck_forward.6
= control target key start
LH: loop header
LB: loop body
LE: loop exit
PB: predicated region body
PF: predicated region fallthrough
CT: control target
= control target key end

     0   :  { %s4592_s24 = smov 0   ;;  %s5835_s0 = inlined_call_operand.vmem [shape: bf16[512,8], index: 0, kind: input, shape index: {}]   ;;  %s5836_s1 = inlined_call_operand.vmem [shape: f32[2,8], index: 1, kind: input, shape index: {}]   ;;  %s5837_s2 = inlined_call_operand.vmem [shape: f32[1,8], index: 2, kind: input, shape index: {}]   ;;  %s5838_s3 = inlined_call_operand.vmem [shape: f32[1,8], index: 3, kind: input, shape index: {}]   ;;  %s5839_s4 = inlined_call_operand.vmem [shape: bf16[72,8], index: 4, kind: input, shape index: {}]   ;;  %s5840_s5 = inlined_call_operand.vmem [shape: f32[256,1], index: 5, kind: input, shape index: {}]   ;;  %s5841_s6 = inlined_call_operand.vmem [shape: bf16[512,8], index: 6, kind: output, shape index: {0}]   ;;  %s5842_s7 = inlined_call_operand.vmem [shape: f32[2,2,8], index: 7, kind: output, shape index: {1}]  }
   0x1 LB: > { %s4598_s25 = sadd.s32 4294967295, %s4547_s24   ;;  %p3505_p0 = scmp.ge.s32.totalorder %s4547_s24, 1  ;;  %s4547_s24 = sphi %s4592_s24, %s18_s24  }
   0x2   : > { %p241_p1 = scmp.lt.s32.totalorder %s4547_s24, 3 }
   0x4   : > { %p242_p2 = pnand %p3505_p0, %p241_p1 }
   0x6   : > { %245 = sbr.rel (%p242_p2) target bundleno = 607 (0x25f), region = 44 }
   0xd   : > { %v882_v0 = vld [vmem:[%s5839_s4 + $0x4] sm:$0xf]  ;;  %vm932_vm0 = vcmask 1043456   ;;  %v1828_v1 = vld [vmem:[%s5839_s4 + $0x10] sm:$0xf]  ;;  %v4549_v4 = vmov 0   ;;  %v310_v17 = vlaneseq }
   0xe   : > { %4515 = vmatprep.subr.msk.bf16.mxu1 %vm932_vm0, %v882_v0  ;;  %4519 = vmatprep.subr.msk.bf16.mxu0 %vm932_vm0, %v1828_v1  ;;  %v934_v2 = vsel %vm932_vm0, %v882_v0, 0  ;;  %v4612_v3 = vsel %vm932_vm0, %v1828_v1, 0  ;;  %v4614_v5 = vrot.slane %v4549_v4, 1  ;;  %vm883_vm1 = vcmask 64512   ;;  %v294_v6 = vld [vmem:[%s5836_s1] sm:$0x3] }
   0xf   : > { %5845 = vst [vmem:[#allocation2_spill] sm:$0xff] %v4612_v3  ;;  %3952 = vmatpush3.bf16.msra.mxu1 %v934_v2  ;;  %4088 = vmatpush3.bf16.msra.mxu0 %v4612_v3  ;;  %v4622_v7 = vmul.f32 0.001953125, %v294_v6  ;;  %v692_v8 = vld [vmem:[%s5839_s4] sm:$0xf]  ;;  %v2033_v10 = vld [vmem:[%s5839_s4 + $0x14] sm:$0xf] }
  0x10   : > { %5846 = vst [vmem:[#allocation3_spill] sm:$0xff] %v4614_v5  ;;  %3953 = vmatprep.mubr.msk.bf16.mxu1 %vm883_vm1, %v4614_v5  ;;  %4536 = vset.pattern.permute.xlu0 %v4549_v4  ;;  %s3506_s13 = sshll.u32 %s4598_s25, 5  ;;  %v4550_v15 = vmov 1966171168   ;;  %v4639_v19 = vshrl.u32 %v310_v17, 7  ;;  %v4668_v29 = vsel %vm932_vm0, %v692_v8, 0 }
  0x11   : > { %4537 = vset.pattern.permute.xlu1 %v4549_v4  ;;  %v298_v9 = vmul.f32 %v4622_v7, %v4622_v7  ;;  %4516 = vmatprep.subr.msk.bf16.mxu1 %vm932_vm0, %v692_v8  ;;  %p278_p3 = scmp.lt.s32.totalorder %s3506_s13, 63  ;;  %v308_v16 = vunpack.c.l.s4 %v4550_v15  ;;  %v4652_v21 = vld [vmem:[%s5839_s4 + $0x18] sm:$0xf]  ;;  %v4671_v30 = vsel %vm932_vm0, %v2033_v10, 0  ;;  %v295_v45 = vld [vmem:[%s5837_s2] sm:$0x1] }
  0x12   : > { %4521 = vmatprep.subr.msk.bf16.mxu0 %vm932_vm0, %v2033_v10  ;;  %v393_v25 = vsub.s32 0, %v4639_v19  ;;  %v4681_v33 = vsel %vm932_vm0, %v4652_v21, 0  ;;  %v296_v8 = vld [vmem:[%s5838_s3] sm:$0x1]  ;;  %vm530_vm2 = vcmask 1040384   ;;  %vm1324_vm4 = vcmask 1046528  }
  0x13   : > { %v300_v11 = vrot.slane %v298_v9, 7  ;;  %s5855_s13 = smov (!%p278_p3, %s3506_s13), 63  ;;  %v309_v18 = vunpack.c.0.s8 %v308_v16  ;;  %vm693_vm3 = vsmask.f32 7424  ;;  %vm2952_vm5 = vcmask 60416   ;;  %p289_p4 = scmp.lt.s32.totalorder %s4598_s25, 1 }
  0x14   : > { %s3507_s14 = sshll.u32 %s5855_s13, 2  ;;  %vm3412_vm6 = vcmask 58368  }
  0x15   : > { %v302_v12 = vsub.f32 %v4622_v7, %v300_v11  ;;  %s4646_s17 = scalar_lea.vmem %s5835_s0, %s3507_s14  ;;  %v312_v20 = vsub.s32 %v309_v18, %v4639_v19  ;;  %s5612_s26 = scalar_lea.vmem %s5841_s6, %s3507_s14 }
  0x16   : > { %v4655_v22 = vld [vmem:[%s4646_s17] sm:$0xff]   ;;  %v4658_v23 = vld [vmem:[%s4646_s17 + $0x8] sm:$0xff]   ;;  %v4662_v26 = vld [vmem:[%s4646_s17 + $0x10] sm:$0xff]   ;;  %s5857_s25 = smov (!%p289_p4, %s4598_s25), 1 }
  0x17   : > { %v303_v13 = vmax.f32 %v302_v12, 0.0  ;;  %v4665_v27 = vld [vmem:[%s4646_s17 + $0x18] sm:$0xff]   ;;  %v4674_v31 = vld [vmem:[%s4646_s17 + $0x20] sm:$0xff]   ;;  %v4677_v32 = vld [vmem:[%s4646_s17 + $0x28] sm:$0xff]   ;;  %v3721_v34 = vunpack.c.l.bf16 %v4655_v22  ;;  %v3722_v35 = vunpack.c.h.bf16 %v4655_v22  ;;  %v3725_v36 = vunpack.c.l.bf16 %v4658_v23  ;;  %s3510_s13 = sshll.u32 %s5857_s25, 1 }
  0x18   : > { %v3726_v37 = vunpack.c.h.bf16 %v4658_v23  ;;  %v3788_v38 = vld [vmem:[%s4646_s17 + $0x30] sm:$0xff]   ;;  %v3729_v40 = vunpack.c.l.bf16 %v4662_v26  ;;  %v3730_v41 = vunpack.c.h.bf16 %v4662_v26  ;;  %v3733_v42 = vunpack.c.l.bf16 %v4665_v27  ;;  %v4692_v43 = vld [vmem:[%s4646_s17 + $0x38] sm:$0xff]   ;;  %v4695_v44 = vld [vmem:[%s4646_s17 + $0x40] sm:$0xff]   ;;  %s292_s28 = scalar_lea.vmem %s5842_s7, %s3510_s13 }
  0x19   : > { %v304_v14 = vadd.f32 1e-05, %v303_v13  ;;  %v3734_v46 = vunpack.c.h.bf16 %v4665_v27  ;;  %v3737_v47 = vunpack.c.l.bf16 %v4674_v31  ;;  %v3738_v48 = vunpack.c.h.bf16 %v4674_v31  ;;  %v4705_v50 = vld [vmem:[%s4646_s17 + $0x48] sm:$0xff]   ;;  %v4708_v51 = vld [vmem:[%s4646_s17 + $0x50] sm:$0xff]   ;;  %v4712_v56 = vld [vmem:[%s4646_s17 + $0x58] sm:$0xff]  }
  0x1a   : > { %v3741_v49 = vunpack.c.l.bf16 %v4677_v32  ;;  %v3742_v53 = vunpack.c.h.bf16 %v4677_v32  ;;  %v3745_v54 = vunpack.c.l.bf16 %v3788_v38  ;;  %v3746_v55 = vunpack.c.h.bf16 %v3788_v38  ;;  %v4715_v57 = vld [vmem:[%s4646_s17 + $0x60] sm:$0xff]   ;;  %v4722_v62 = vld [vmem:[%s4646_s17 + $0x68] sm:$0xff]   ;;  %v4728_v4 = vld [vmem:[%s4646_s17 + $0x70] sm:$0xff]  }
  0x1b   : > { %4538 = vrsqrt.f32 %v304_v14  ;;  %v3749_v58 = vunpack.c.l.bf16 %v4692_v43  ;;  %v3750_v59 = vunpack.c.h.bf16 %v4692_v43  ;;  %v3753_v60 = vunpack.c.l.bf16 %v4695_v44  ;;  %v4731_v6 = vld [vmem:[%s4646_s17 + $0x78] sm:$0xff]  }
  0x1c   : > { %v3754_v61 = vunpack.c.h.bf16 %v4695_v44  ;;  %v3757_v0 = vunpack.c.l.bf16 %v4705_v50  ;;  %v3758_v1 = vunpack.c.h.bf16 %v4705_v50  ;;  %v3761_v2 = vunpack.c.l.bf16 %v4708_v51 }
  0x1d   : > { %v3762_v9 = vunpack.c.h.bf16 %v4708_v51  ;;  %v3765_v10 = vunpack.c.l.bf16 %v4712_v56  ;;  %v3766_v11 = vunpack.c.h.bf16 %v4712_v56  ;;  %v3769_v12 = vunpack.c.l.bf16 %v4715_v57 }
  0x1e   : > { %v3770_v15 = vunpack.c.h.bf16 %v4715_v57 }
  0x25   : > { %v4539_v24 = vpop.eup %4538 }
  0x26   : > { %v313_v28 = vrot.slane %v4539_v24, %v312_v20 }
  0x28   : > { %v314_v39 = vcombine.high %v313_v28, %v313_v28 }
  0x2a   : > { %v321_v52 = vrot.slane %v314_v39, %v312_v20 }
  0x2c   : > { %v323_v63 = vmul.f32 %v321_v52, %v295_v45 }
  0x2e   : > { %v324_v13 = vmul.f32 %v323_v63, %v4622_v7  ;;  %v4743_v14 = vrot.slane %v323_v63, %v393_v25 }
  0x30   : > { %v325_v23 = vsub.f32 %v296_v8, %v324_v13  ;;  %v396_v7 = vmul.f32 %v3721_v34, %v4743_v14  ;;  %v397_v24 = vmul.f32 %v3722_v35, %v4743_v14  ;;  %v398_v26 = vmul.f32 %v3725_v36, %v4743_v14 }
  0x31   : > { %v399_v27 = vmul.f32 %v3726_v37, %v4743_v14  ;;  %v400_v28 = vmul.f32 %v3729_v40, %v4743_v14  ;;  %v401_v31 = vmul.f32 %v3730_v41, %v4743_v14  ;;  %v402_v32 = vmul.f32 %v3733_v42, %v4743_v14 }
  0x32   : > { %v4760_v38 = vrot.slane %v325_v23, %v393_v25  ;;  %v403_v39 = vmul.f32 %v3734_v46, %v4743_v14  ;;  %v4764_v34 = vmul.f32 %v3737_v47, %v4743_v14  ;;  %v4767_v35 = vmul.f32 %v3738_v48, %v4743_v14 }
  0x33   : > { %v4770_v36 = vmul.f32 %v3741_v49, %v4743_v14  ;;  %v4773_v37 = vmul.f32 %v3742_v53, %v4743_v14  ;;  %v4776_v40 = vmul.f32 %v3745_v54, %v4743_v14  ;;  %v4779_v19 = vmul.f32 %v3746_v55, %v4743_v14 }
  0x34   : > { %v434_v25 = vadd.f32 %v4760_v38, %v396_v7  ;;  %v435_v41 = vadd.f32 %v4760_v38, %v397_v24  ;;  %v436_v42 = vadd.f32 %v4760_v38, %v398_v26  ;;  %v437_v45 = vadd.f32 %v4760_v38, %v399_v27 }
  0x35   : > { %v438_v46 = vadd.f32 %v4760_v38, %v400_v28  ;;  %v439_v47 = vadd.f32 %v4760_v38, %v401_v31  ;;  %v440_v48 = vadd.f32 %v4760_v38, %v402_v32  ;;  %v441_v49 = vadd.f32 %v4760_v38, %v403_v39 }
  0x36   : > { %v466_v52 = vmax.f32 %v434_v25, 0.0  ;;  %v467_v53 = vmax.f32 %v435_v41, 0.0  ;;  %v468_v54 = vmax.f32 %v436_v42, 0.0  ;;  %v469_v55 = vmax.f32 %v437_v45, 0.0 }
  0x37   : > { %v470_v63 = vmax.f32 %v438_v46, 0.0  ;;  %v471_v8 = vmax.f32 %v439_v47, 0.0  ;;  %v472_v13 = vmax.f32 %v440_v48, 0.0  ;;  %v473_v23 = vmax.f32 %v441_v49, 0.0 }
  0x38   : > { %v531_v7 = vrot.slane %v466_v52, 7  ;;  %v532_v24 = vrot.slane %v467_v53, 7  ;;  %v534_v26 = vrot.slane %v468_v54, 7  ;;  %v535_v27 = vrot.slane %v469_v55, 7 }
  0x39   : > { %v537_v28 = vrot.slane %v470_v63, 7  ;;  %v538_v22 = vrot.slane %v471_v8, 7  ;;  %v540_v31 = vrot.slane %v472_v13, 7  ;;  %v541_v20 = vrot.slane %v473_v23, 7 }
  0x3a   : > { %v533_v32 = vsel %vm530_vm2, %v531_v7, %v532_v24  ;;  %v627_v39 = vsel %vm530_vm2, 0.0, %v531_v7  ;;  %v643_v25 = vsel %vm530_vm2, %v532_v24, 0.0  ;;  %v536_v41 = vsel %vm530_vm2, %v534_v26, %v535_v27 }
  0x3b   : > { %v4793_v42 = vpack.c.bf16 %v533_v32, %v627_v39  ;;  %v4795_v45 = vpack.c.bf16 %v643_v25, %v643_v25  ;;  %v628_v46 = vsel %vm530_vm2, 0.0, %v534_v26  ;;  %v644_v47 = vsel %vm530_vm2, %v535_v27, 0.0 }
  0x3c   : > { %v4799_v48 = vpack.c.bf16 %v536_v41, %v628_v46  ;;  %v4801_v49 = vpack.c.bf16 %v644_v47, %v644_v47  ;;  %v539_v52 = vsel %vm530_vm2, %v537_v28, %v538_v22  ;;  %v629_v53 = vsel %vm530_vm2, 0.0, %v537_v28 }
  0x3d   : > { %v703_v54 = vshrl.u32 %v4793_v42, 16  ;;  %v705_v55 = vshll.u32 %v4793_v42, 16  ;;  %v710_v63 = vshll.u32 %v4795_v45, 16  ;;  %v645_v8 = vsel %vm530_vm2, %v538_v22, 0.0 }
  0x3e   : > { %v715_v13 = vshrl.u32 %v4799_v48, 16  ;;  %v717_v23 = vshll.u32 %v4799_v48, 16  ;;  %v722_v7 = vshll.u32 %v4801_v49, 16  ;;  %v1331_v24 = vrot.slane %v4801_v49, 1 }
  0x3f   : > { %v707_v26 = vrot.slane %v705_v55, 1  ;;  %v712_v27 = vrot.slane %v710_v63, 1  ;;  %v4813_v32 = vpack.c.bf16 %v539_v52, %v629_v53  ;;  %v4815_v28 = vpack.c.bf16 %v645_v8, %v645_v8 }
  0x40   : > { %v719_v39 = vrot.slane %v717_v23, 1  ;;  %v724_v25 = vrot.slane %v722_v7, 1  ;;  %v542_v41 = vsel %vm530_vm2, %v540_v31, %v541_v20  ;;  %v630_v22 = vsel %vm530_vm2, 0.0, %v540_v31 }
  0x41   : > { %v708_v46 = vor.u32 %v707_v26, %v703_v54  ;;  %v727_v47 = vshrl.u32 %v4813_v32, 16  ;;  %v729_v18 = vshll.u32 %v4813_v32, 16  ;;  %v734_v17 = vshll.u32 %v4815_v28, 16 }
  0x42   : > { %v720_v16 = vor.u32 %v719_v39, %v715_v13  ;;  %v646_v55 = vsel %vm530_vm2, %v541_v20, 0.0  ;;  %v4823_v52 = vpack.c.bf16 %v542_v41, %v630_v22  ;;  %v442_v53 = vadd.f32 %v4760_v38, %v4764_v34 }
  0x43   : > { %v713_v63 = vsel %vm693_vm3, %v708_v46, %v712_v27  ;;  %v731_v8 = vrot.slane %v729_v18, 1  ;;  %v736_v23 = vrot.slane %v734_v17, 1  ;;  %v4828_v31 = vpack.c.bf16 %v646_v55, %v646_v55  ;;  %v4842_v17 = vld [vmem:[%s5839_s4 + $0x8] sm:$0xf] }
  0x44   : > { %3954 = vmatmul.mubr.msk.bf16.vlgmr.msra.gmra.mrb[0].mxu1 %vm883_vm1, %v713_v63  ;;  %4089 = vmatprep.mubr.msk.bf16.mxu0 %vm883_vm1, %v713_v63  ;;  %v4833_v54 = vsel %vm693_vm3, %v720_v16, %v724_v25  ;;  %v739_v20 = vshrl.u32 %v4823_v52, 16  ;;  %v741_v13 = vshll.u32 %v4823_v52, 16  ;;  %v443_v34 = vadd.f32 %v4760_v38, %v4767_v35 }
  0x45   : > { %3986 = vmatpush3.bf16.msra.mxu1 %v4668_v29  ;;  %4090 = vmatmul.mubr.msk.bf16.vlgmr.msra.gmra.mrb[0].mxu0 %vm883_vm1, %v4833_v54  ;;  %v732_v18 = vor.u32 %v731_v8, %v727_v47  ;;  %v746_v16 = vshll.u32 %v4828_v31, 16  ;;  %v474_v7 = vmax.f32 %v442_v53, 0.0  ;;  %v444_v26 = vadd.f32 %v4760_v38, %v4770_v36 }
  0x46   : > { %4122 = vmatpush3.bf16.msra.mxu0 %v4671_v30  ;;  %3957 = vmatprep.mubr.msk.bf16.mxu1 %vm883_vm1, %v4833_v54  ;;  %v743_v35 = vrot.slane %v741_v13, 1  ;;  %v475_v27 = vmax.f32 %v443_v34, 0.0  ;;  %v445_v29 = vadd.f32 %v4760_v38, %v4773_v37  ;;  %v446_v39 = vadd.f32 %v4760_v38, %v4776_v40 }
  0x47   : > { %v4858_v25 = vsel %vm693_vm3, %v732_v18, %v736_v23  ;;  %v748_v41 = vrot.slane %v746_v16, 1  ;;  %v543_v22 = vrot.slane %v474_v7, 7  ;;  %v476_v46 = vmax.f32 %v444_v26, 0.0  ;;  %4522 = vmatprep.subr.msk.bf16.mxu0 %vm932_vm0, %v4652_v21  ;;  %4517 = vmatprep.subr.msk.bf16.mxu1 %vm932_vm0, %v4842_v17 }
  0x48   : > { %4093 = vmatprep.mubr.msk.bf16.mxu0 %vm883_vm1, %v4858_v25  ;;  %v744_v30 = vor.u32 %v743_v35, %v739_v20  ;;  %v544_v36 = vrot.slane %v475_v27, 7  ;;  %v477_v37 = vmax.f32 %v445_v29, 0.0  ;;  %v447_v40 = vadd.f32 %v4760_v38, %v4779_v19 }
  0x49   : > { %v631_v47 = vsel %vm530_vm2, 0.0, %v543_v22  ;;  %v546_v55 = vrot.slane %v476_v46, 7  ;;  %v478_v53 = vmax.f32 %v446_v39, 0.0  ;;  %v410_v21 = vmul.f32 %v3749_v58, %v4743_v14 }
  0x4a   : > { %v4873_v63 = vsel %vm693_vm3, %v744_v30, %v748_v41  ;;  %v545_v8 = vsel %vm530_vm2, %v543_v22, %v544_v36  ;;  %v647_v23 = vsel %vm530_vm2, %v544_v36, 0.0  ;;  %v547_v20 = vrot.slane %v477_v37, 7 }
  0x4b   : > { %v4877_v13 = vpack.c.bf16 %v545_v8, %v631_v47  ;;  %v4879_v34 = vpack.c.bf16 %v647_v23, %v647_v23  ;;  %v632_v19 = vsel %vm530_vm2, 0.0, %v546_v55  ;;  %v479_v18 = vmax.f32 %v447_v40, 0.0 }
  0x4c   : > { %3958 = vmatmul.mubr.msk.bf16.gmra.mrb[4].mxu1 %vm883_vm1, %v4858_v25  ;;  %v548_v58 = vsel %vm530_vm2, %v546_v55, %v547_v20  ;;  %v648_v16 = vsel %vm530_vm2, %v547_v20, 0.0  ;;  %v549_v7 = vrot.slane %v478_v53, 7  ;;  %v411_v26 = vmul.f32 %v3750_v59, %v4743_v14 }
  0x4d   : > { %4094 = vmatmul.mubr.msk.bf16.gmra.mrb[4].mxu0 %vm883_vm1, %v4873_v63  ;;  %3961 = vmatprep.mubr.msk.bf16.mxu1 %vm883_vm1, %v4873_v63  ;;  %v751_v35 = vshrl.u32 %v4877_v13, 16  ;;  %v753_v27 = vshll.u32 %v4877_v13, 16  ;;  %v758_v29 = vshll.u32 %v4879_v34, 16  ;;  %v4896_v39 = vpack.c.bf16 %v548_v58, %v632_v19 }
  0x4e   : > { %v4898_v41 = vpack.c.bf16 %v648_v16, %v648_v16  ;;  %v550_v22 = vrot.slane %v479_v18, 7  ;;  %v633_v43 = vsel %vm530_vm2, 0.0, %v549_v7  ;;  %v448_v59 = vadd.f32 %v4760_v38, %v410_v21 }
  0x4f   : > { %v755_v46 = vrot.slane %v753_v27, 1  ;;  %v760_v30 = vrot.slane %v758_v29, 1  ;;  %v763_v36 = vshrl.u32 %v4896_v39, 16  ;;  %v765_v37 = vshll.u32 %v4896_v39, 16 }
  0x50   : > { %v770_v40 = vshll.u32 %v4898_v41, 16  ;;  %v551_v47 = vsel %vm530_vm2, %v549_v7, %v550_v22  ;;  %v649_v55 = vsel %vm530_vm2, %v550_v22, 0.0  ;;  %v449_v53 = vadd.f32 %v4760_v38, %v411_v26 }
  0x51   : > { %v756_v8 = vor.u32 %v755_v46, %v751_v35  ;;  %v767_v23 = vrot.slane %v765_v37, 1  ;;  %v4908_v20 = vpack.c.bf16 %v551_v47, %v633_v43  ;;  %v4910_v21 = vpack.c.bf16 %v649_v55, %v649_v55 }
  0x52   : > { %v772_v19 = vrot.slane %v770_v40, 1  ;;  %v480_v18 = vmax.f32 %v448_v59, 0.0  ;;  %v481_v58 = vmax.f32 %v449_v53, 0.0  ;;  %v412_v16 = vmul.f32 %v3753_v60, %v4743_v14 }
  0x53   : > { %v4916_v27 = vsel %vm693_vm3, %v756_v8, %v760_v30  ;;  %v768_v7 = vor.u32 %v767_v23, %v763_v36  ;;  %v775_v29 = vshrl.u32 %v4908_v20, 16  ;;  %v777_v26 = vshll.u32 %v4908_v20, 16 }
  0x54   : > { %3962 = vmatmul.mubr.msk.bf16.gmra.mrb[8].mxu1 %vm883_vm1, %v4916_v27  ;;  %4097 = vmatprep.mubr.msk.bf16.mxu0 %vm883_vm1, %v4916_v27  ;;  %v782_v35 = vshll.u32 %v4910_v21, 16  ;;  %v552_v22 = vrot.slane %v480_v18, 7  ;;  %v553_v43 = vrot.slane %v481_v58, 7  ;;  %v413_v60 = vmul.f32 %v3754_v61, %v4743_v14 }
  0x55   : > { %v4929_v59 = vsel %vm693_vm3, %v768_v7, %v772_v19  ;;  %v779_v46 = vrot.slane %v777_v26, 1  ;;  %v450_v30 = vadd.f32 %v4760_v38, %v412_v16  ;;  %v1327_v36 = vrot.slane %v4793_v42, 1 }
  0x56   : > { %4098 = vmatmul.mubr.msk.bf16.gmra.mrb[8].mxu0 %vm883_vm1, %v4929_v59  ;;  %3965 = vmatprep.mubr.msk.bf16.mxu1 %vm883_vm1, %v4929_v59  ;;  %v784_v37 = vrot.slane %v782_v35, 1  ;;  %v554_v40 = vsel %vm530_vm2, %v552_v22, %v553_v43  ;;  %v634_v44 = vsel %vm530_vm2, 0.0, %v552_v22  ;;  %v650_v61 = vsel %vm530_vm2, %v553_v43, 0.0 }
  0x57   : > { %v780_v47 = vor.u32 %v779_v46, %v775_v29  ;;  %v4940_v55 = vpack.c.bf16 %v554_v40, %v634_v44  ;;  %v4942_v53 = vpack.c.bf16 %v650_v61, %v650_v61  ;;  %v451_v8 = vadd.f32 %v4760_v38, %v413_v60 }
  0x58   : > { %v482_v23 = vmax.f32 %v450_v30, 0.0  ;;  %v1328_v19 = vrot.slane %v4795_v45, 1  ;;  %v1330_v18 = vrot.slane %v4799_v48, 1  ;;  %v414_v58 = vmul.f32 %v3757_v0, %v4743_v14 }
  0x59   : > { %v4951_v16 = vsel %vm693_vm3, %v780_v47, %v784_v37  ;;  %v787_v7 = vshrl.u32 %v4940_v55, 16  ;;  %v789_v29 = vshll.u32 %v4940_v55, 16  ;;  %v794_v26 = vshll.u32 %v4942_v53, 16 }
  0x5a   : > { %4101 = vmatprep.mubr.msk.bf16.mxu0 %vm883_vm1, %v4951_v16  ;;  %v483_v35 = vmax.f32 %v451_v8, 0.0  ;;  %v555_v45 = vrot.slane %v482_v23, 7  ;;  %v4959_v22 = vsel %vm1324_vm4, %v1327_v36, %v1328_v19  ;;  %v4964_v0 = vsel %vm1324_vm4, %v1330_v18, %v1331_v24 }
  0x5b   : > { %v791_v43 = vrot.slane %v789_v29, 1  ;;  %v796_v60 = vrot.slane %v794_v26, 1  ;;  %v415_v46 = vmul.f32 %v3758_v1, %v4743_v14  ;;  %v452_v30 = vadd.f32 %v4760_v38, %v414_v58 }
  0x5c   : > { %3966 = vmatmul.mubr.msk.bf16.gmra.mrb[12].mxu1 %vm883_vm1, %v4951_v16  ;;  %v556_v37 = vrot.slane %v483_v35, 7  ;;  %v635_v36 = vsel %vm530_vm2, 0.0, %v555_v45  ;;  %v416_v49 = vmul.f32 %v3761_v2, %v4743_v14  ;;  %v417_v24 = vmul.f32 %v3762_v9, %v4743_v14 }
  0x5d   : > { %v792_v40 = vor.u32 %v791_v43, %v787_v7  ;;  %v453_v50 = vadd.f32 %v4760_v38, %v415_v46  ;;  %v484_v1 = vmax.f32 %v452_v30, 0.0  ;;  %v1333_v44 = vrot.slane %v4813_v32, 1 }
  0x5e   : > { %v557_v61 = vsel %vm530_vm2, %v555_v45, %v556_v37  ;;  %v651_v47 = vsel %vm530_vm2, %v556_v37, 0.0  ;;  %v454_v8 = vadd.f32 %v4760_v38, %v416_v49  ;;  %v455_v23 = vadd.f32 %v4760_v38, %v417_v24 }
  0x5f   : > { %v4986_v2 = vsel %vm693_vm3, %v792_v40, %v796_v60  ;;  %v4988_v19 = vpack.c.bf16 %v557_v61, %v635_v36  ;;  %v4990_v51 = vpack.c.bf16 %v651_v47, %v651_v47  ;;  %v485_v9 = vmax.f32 %v453_v50, 0.0 }
  0x60   : > { %4102 = vmatmul.mubr.msk.bf16.gmra.mrb[12].mxu0 %vm883_vm1, %v4986_v2  ;;  %3969 = vmatprep.mubr.msk.bf16.mxu1 %vm883_vm1, %v4986_v2  ;;  %v558_v18 = vrot.slane %v484_v1, 7  ;;  %v486_v58 = vmax.f32 %v454_v8, 0.0  ;;  %v487_v7 = vmax.f32 %v455_v23, 0.0  ;;  %v1334_v29 = vrot.slane %v4815_v28, 1 }
  0x61   : > { %v799_v26 = vshrl.u32 %v4988_v19, 16  ;;  %v801_v35 = vshll.u32 %v4988_v19, 16  ;;  %v806_v45 = vshll.u32 %v4990_v51, 16  ;;  %4123 = vmatprep.mubr.msk.bf16.mxu0 %vm883_vm1, %v4959_v22  ;;  %v559_v43 = vrot.slane %v485_v9, 7 }
  0x62   : > { %v636_v60 = vsel %vm530_vm2, 0.0, %v558_v18  ;;  %v561_v46 = vrot.slane %v486_v58, 7  ;;  %v562_v30 = vrot.slane %v487_v7, 7  ;;  %v5004_v37 = vsel %vm1324_vm4, %v1333_v44, %v1334_v29 }
  0x63   : > { %v803_v36 = vrot.slane %v801_v35, 1  ;;  %v808_v49 = vrot.slane %v806_v45, 1  ;;  %v560_v28 = vsel %vm530_vm2, %v558_v18, %v559_v43  ;;  %v652_v24 = vsel %vm530_vm2, %v559_v43, 0.0  ;;  %v5032_v43 = vld [vmem:[%s5839_s4 + $0x1c] sm:$0xf] }
  0x64   : > { %v5008_v40 = vpack.c.bf16 %v560_v28, %v636_v60  ;;  %v5010_v50 = vpack.c.bf16 %v652_v24, %v652_v24  ;;  %v563_v1 = vsel %vm530_vm2, %v561_v46, %v562_v30  ;;  %v637_v61 = vsel %vm530_vm2, 0.0, %v561_v46 }
  0x65   : > { %v804_v47 = vor.u32 %v803_v36, %v799_v26  ;;  %v653_v8 = vsel %vm530_vm2, %v562_v30, 0.0  ;;  %v5015_v23 = vpack.c.bf16 %v563_v1, %v637_v61  ;;  %v1336_v44 = vrot.slane %v4823_v52, 1 }
  0x66   : > { %v811_v9 = vshrl.u32 %v5008_v40, 16  ;;  %v813_v18 = vshll.u32 %v5008_v40, 16  ;;  %v818_v58 = vshll.u32 %v5010_v50, 16  ;;  %v5021_v7 = vpack.c.bf16 %v653_v8, %v653_v8 }
  0x67   : > { %v5024_v29 = vsel %vm693_vm3, %v804_v47, %v808_v49  ;;  %v823_v35 = vshrl.u32 %v5015_v23, 16  ;;  %v825_v26 = vshll.u32 %v5015_v23, 16  ;;  %v1337_v45 = vrot.slane %v4828_v31, 1 }
  0x68   : > { %3970 = vmatmul.mubr.msk.bf16.gmra.mrb[16].mxu1 %vm883_vm1, %v5024_v29  ;;  %4124 = vmatmul.mubr.msk.bf16.vlgmr.msra.gmra.mrb[0].mxu0 %vm883_vm1, %v4964_v0  ;;  %v815_v60 = vrot.slane %v813_v18, 1  ;;  %v820_v46 = vrot.slane %v818_v58, 1  ;;  %v830_v30 = vshll.u32 %v5021_v7, 16  ;;  %v418_v36 = vmul.f32 %v3765_v10, %v4743_v14 }
  0x69   : > { %4156 = vmatpush3.bf16.msra.mxu0 %v4681_v33  ;;  %v827_v31 = vrot.slane %v825_v26, 1  ;;  %4127 = vmatprep.mubr.msk.bf16.mxu0 %vm883_vm1, %v5004_v37  ;;  %v5046_v49 = vsel %vm1324_vm4, %v1336_v44, %v1337_v45  ;;  %v419_v28 = vmul.f32 %v3766_v11, %v4743_v14  ;;  %v420_v24 = vmul.f32 %v3769_v12, %v4743_v14 }
  0x6a   : > { %v816_v1 = vor.u32 %v815_v60, %v811_v9  ;;  %v832_v61 = vrot.slane %v830_v30, 1  ;;  %v456_v10 = vadd.f32 %v4760_v38, %v418_v36  ;;  %v421_v33 = vmul.f32 %v3770_v15, %v4743_v14  ;;  %4523 = vmatprep.subr.msk.bf16.mxu0 %vm932_vm0, %v5032_v43 }
  0x6b   : > { %v828_v47 = vor.u32 %v827_v31, %v823_v35  ;;  %v457_v8 = vadd.f32 %v4760_v38, %v419_v28  ;;  %v458_v56 = vadd.f32 %v4760_v38, %v420_v24  ;;  %v1339_v11 = vrot.slane %v4877_v13, 1 }
  0x6c   : > { %v5064_v12 = vsel %vm693_vm3, %v816_v1, %v820_v46  ;;  %v488_v44 = vmax.f32 %v456_v10, 0.0  ;;  %v459_v9 = vadd.f32 %v4760_v38, %v421_v33  ;;  %v1340_v18 = vrot.slane %v4879_v34, 1 }
  0x6d   : > { %3973 = vmatprep.mubr.msk.bf16.mxu1 %vm883_vm1, %v5064_v12  ;;  %v5071_v57 = vsel %vm693_vm3, %v828_v47, %v832_v61  ;;  %v489_v15 = vmax.f32 %v457_v8, 0.0  ;;  %v490_v58 = vmax.f32 %v458_v56, 0.0  ;;  %v1342_v35 = vrot.slane %v4896_v39, 1 }
  0x6e   : > { %v564_v26 = vrot.slane %v488_v44, 7  ;;  %v491_v45 = vmax.f32 %v459_v9, 0.0  ;;  %v5075_v60 = vsel %vm1324_vm4, %v1339_v11, %v1340_v18  ;;  %v1343_v46 = vrot.slane %v4898_v41, 1 }
  0x6f   : > { %v565_v30 = vrot.slane %v489_v15, 7  ;;  %v567_v36 = vrot.slane %v490_v58, 7  ;;  %v5847_v34 = vunpack.c.l.bf16 %v4722_v62  ;;  %v5848_v28 = vunpack.c.h.bf16 %v4722_v62 }
  0x70   : > { %3974 = vmatmul.mubr.msk.bf16.gmra.mrb[20].mxu1 %vm883_vm1, %v5071_v57  ;;  %4128 = vmatmul.mubr.msk.bf16.gmra.mrb[4].mxu0 %vm883_vm1, %v5046_v49  ;;  %v638_v1 = vsel %vm530_vm2, 0.0, %v564_v26  ;;  %v568_v61 = vrot.slane %v491_v45, 7  ;;  %v5090_v41 = vsel %vm1324_vm4, %v1342_v35, %v1343_v46  ;;  %v5849_v10 = vunpack.c.l.bf16 %v4728_v4 }
  0x71   : > { %v422_v31 = vmul.f32 %v5847_v34, %v4743_v14  ;;  %v423_v24 = vmul.f32 %v5848_v28, %v4743_v14  ;;  %v566_v47 = vsel %vm530_vm2, %v564_v26, %v565_v30  ;;  %v654_v62 = vsel %vm530_vm2, %v565_v30, 0.0  ;;  %4131 = vmatprep.mubr.msk.bf16.mxu0 %vm883_vm1, %v5075_v60 }
  0x72   : > { %v424_v33 = vmul.f32 %v5849_v10, %v4743_v14  ;;  %v639_v8 = vsel %vm530_vm2, 0.0, %v567_v36  ;;  %v5101_v11 = vpack.c.bf16 %v566_v47, %v638_v1  ;;  %v5103_v44 = vpack.c.bf16 %v654_v62, %v654_v62 }
  0x73   : > { %v460_v56 = vadd.f32 %v4760_v38, %v422_v31  ;;  %v569_v9 = vsel %vm530_vm2, %v567_v36, %v568_v61  ;;  %v655_v18 = vsel %vm530_vm2, %v568_v61, 0.0  ;;  %v461_v35 = vadd.f32 %v4760_v38, %v423_v24 }
  0x74   : > { %v5107_v15 = vpack.c.bf16 %v569_v9, %v639_v8  ;;  %v5109_v58 = vpack.c.bf16 %v655_v18, %v655_v18  ;;  %v835_v45 = vshrl.u32 %v5101_v11, 16  ;;  %v837_v46 = vshll.u32 %v5101_v11, 16 }
  0x75   : > { %v492_v26 = vmax.f32 %v460_v56, 0.0  ;;  %v842_v30 = vshll.u32 %v5103_v44, 16  ;;  %v5850_v34 = vunpack.c.h.bf16 %v4728_v4  ;;  %v493_v61 = vmax.f32 %v461_v35, 0.0 }
  0x76   : > { %v847_v36 = vshrl.u32 %v5107_v15, 16  ;;  %v849_v28 = vshll.u32 %v5107_v15, 16  ;;  %v854_v1 = vshll.u32 %v5109_v58, 16  ;;  %v839_v10 = vrot.slane %v837_v46, 1 }
  0x77   : > { %v425_v31 = vmul.f32 %v5850_v34, %v4743_v14  ;;  %v844_v24 = vrot.slane %v842_v30, 1  ;;  %v570_v47 = vrot.slane %v492_v26, 7  ;;  %v462_v62 = vadd.f32 %v4760_v38, %v424_v33 }
  0x78   : > { %v851_v8 = vrot.slane %v849_v28, 1  ;;  %v856_v56 = vrot.slane %v854_v1, 1  ;;  %v571_v9 = vrot.slane %v493_v61, 7  ;;  %v840_v5 = vor.u32 %v839_v10, %v835_v45  ;;  %4132 = vmatmul.mubr.msk.bf16.gmra.mrb[8].mxu0 %vm883_vm1, %v5090_v41 }
  0x79   : > { %v463_v18 = vadd.f32 %v4760_v38, %v425_v31  ;;  %v640_v4 = vsel %vm530_vm2, 0.0, %v570_v47  ;;  %v494_v34 = vmax.f32 %v462_v62, 0.0  ;;  %v1345_v3 = vrot.slane %v4908_v20, 1 }
  0x7a   : > { %v852_v35 = vor.u32 %v851_v8, %v847_v36  ;;  %v572_v46 = vsel %vm530_vm2, %v570_v47, %v571_v9  ;;  %v656_v26 = vsel %vm530_vm2, %v571_v9, 0.0  ;;  %v5130_v30 = vsel %vm693_vm3, %v840_v5, %v844_v24 }
  0x7b   : > { %v495_v33 = vmax.f32 %v463_v18, 0.0  ;;  %v5132_v28 = vpack.c.bf16 %v572_v46, %v640_v4  ;;  %v5134_v45 = vpack.c.bf16 %v656_v26, %v656_v26  ;;  %v573_v31 = vrot.slane %v494_v34, 7  ;;  %3977 = vmatprep.mubr.msk.bf16.mxu1 %vm883_vm1, %v5130_v30 }
  0x7c   : > { %v5139_v1 = vsel %vm693_vm3, %v852_v35, %v856_v56  ;;  %v1346_v61 = vrot.slane %v4910_v21, 1  ;;  %v1348_v10 = vrot.slane %v4940_v55, 1  ;;  %v1349_v21 = vrot.slane %v4942_v53, 1 }
  0x7d   : > { %v574_v36 = vrot.slane %v495_v33, 7  ;;  %3978 = vmatmul.mubr.msk.bf16.gmra.mrb[24].mxu1 %vm883_vm1, %v5139_v1  ;;  %v859_v5 = vshrl.u32 %v5132_v28, 16  ;;  %v861_v24 = vshll.u32 %v5132_v28, 16  ;;  %v866_v47 = vshll.u32 %v5134_v45, 16 }
  0x7e   : > { %v641_v62 = vsel %vm530_vm2, 0.0, %v573_v31  ;;  %v5152_v9 = vsel %vm1324_vm4, %v1345_v3, %v1346_v61  ;;  %v5162_v46 = vsel %vm1324_vm4, %v1348_v10, %v1349_v21  ;;  %v1351_v26 = vrot.slane %v4988_v19, 1 }
  0x7f   : > { %v575_v8 = vsel %vm530_vm2, %v573_v31, %v574_v36  ;;  %v657_v56 = vsel %vm530_vm2, %v574_v36, 0.0  ;;  %v863_v18 = vrot.slane %v861_v24, 1  ;;  %v868_v4 = vrot.slane %v866_v47, 1  ;;  %4135 = vmatprep.mubr.msk.bf16.mxu0 %vm883_vm1, %v5152_v9 }
  0x80   : > { %v5155_v34 = vpack.c.bf16 %v575_v8, %v641_v62  ;;  %v5157_v35 = vpack.c.bf16 %v657_v56, %v657_v56  ;;  %v1352_v33 = vrot.slane %v4990_v51, 1  ;;  %v3782_v3 = vunpack.c.h.bf16 %v4731_v6  ;;  %4136 = vmatmul.mubr.msk.bf16.gmra.mrb[12].mxu0 %vm883_vm1, %v5162_v46 }
  0x81   : > { %v864_v31 = vor.u32 %v863_v18, %v859_v5  ;;  %v1354_v10 = vrot.slane %v5008_v40, 1  ;;  %v1355_v47 = vrot.slane %v5010_v50, 1  ;;  %v1357_v51 = vrot.slane %v5015_v23, 1 }
  0x82   : > { %v871_v53 = vshrl.u32 %v5155_v34, 16  ;;  %v873_v36 = vshll.u32 %v5155_v34, 16  ;;  %v878_v61 = vshll.u32 %v5157_v35, 16  ;;  %v5173_v24 = vsel %vm1324_vm4, %v1351_v26, %v1352_v33 }
  0x83   : > { %v5179_v5 = vsel %vm693_vm3, %v864_v31, %v868_v4  ;;  %4139 = vmatprep.mubr.msk.bf16.mxu0 %vm883_vm1, %v5173_v24  ;;  %v1358_v56 = vrot.slane %v5021_v7, 1  ;;  %v5187_v18 = vsel %vm1324_vm4, %v1354_v10, %v1355_v47  ;;  %v5851_v50 = vunpack.c.l.bf16 %v4731_v6 }
  0x84   : > { %v875_v62 = vrot.slane %v873_v36, 1  ;;  %v880_v8 = vrot.slane %v878_v61, 1  ;;  %3981 = vmatprep.mubr.msk.bf16.mxu1 %vm883_vm1, %v5179_v5  ;;  %v427_v31 = vmul.f32 %v3782_v3, %v4743_v14  ;;  %v1360_v61 = vrot.slane %v5101_v11, 1 }
  0x85   : > { %v426_v26 = vmul.f32 %v5851_v50, %v4743_v14  ;;  %v5196_v33 = vsel %vm1324_vm4, %v1357_v51, %v1358_v56  ;;  %v1361_v14 = vrot.slane %v5103_v44, 1  ;;  %v1363_v10 = vrot.slane %v5107_v15, 1  ;;  %v1617_v44 = vld [vmem:[%s5839_s4 + $0xc] sm:$0xf] }
  0x86   : > { %v876_v21 = vor.u32 %v875_v62, %v871_v53  ;;  %v4551_v53 = vmov 0.0|0.0   ;;  %v465_v6 = vadd.f32 %v4760_v38, %v427_v31  ;;  %v1364_v47 = vrot.slane %v5109_v58, 1 }
  0x87   : > { %v464_v7 = vadd.f32 %v4760_v38, %v426_v26  ;;  %v5216_v56 = vsel %vm1324_vm4, %v1360_v61, %v1361_v14  ;;  %v1369_v61 = vrot.slane %v5155_v34, 1  ;;  %v1370_v14 = vrot.slane %v5157_v35, 1  ;;  %v5279_v35 = vld [vmem:[%s5839_s4 + $0x20] sm:$0xf] }
  0x88   : > { %v5193_v4 = vsel %vm693_vm3, %v876_v21, %v880_v8  ;;  %4140 = vmatmul.mubr.msk.bf16.gmra.mrb[16].mxu0 %vm883_vm1, %v5187_v18  ;;  %v497_v3 = vmax.f32 %v465_v6, 0.0  ;;  %v1422_v8 = vsel %vm932_vm0, %v4842_v17, 0  ;;  %v5226_v58 = vsel %vm1324_vm4, %v1363_v10, %v1364_v47 }
  0x89   : > { %3982 = vmatmul.mubr.msk.bf16.gmra.mrb[28].mxu1 %vm883_vm1, %v5193_v4  ;;  %4143 = vmatprep.mubr.msk.bf16.mxu0 %vm883_vm1, %v5196_v33  ;;  %v496_v36 = vmax.f32 %v464_v7, 0.0  ;;  %v1366_v6 = vrot.slane %v5132_v28, 1  ;;  %v5254_v47 = vsel %vm1324_vm4, %v1369_v61, %v1370_v14  ;;  %v2995_v61 = vld [vmem:[%s5840_s5 + $0x50] sm:$0xff]  ;;  %v2996_v14 = vld [vmem:[%s5840_s5 + $0x58] sm:$0xff] }
  0x8a   : > { %3987 = vmatprep.mubr.bf16.mxu1 %v4551_v53  ;;  %v577_v62 = vrot.slane %v497_v3, 7 }
  0x8b   : > { %v576_v51 = vrot.slane %v496_v36, 7  ;;  %v1367_v36 = vrot.slane %v5134_v45, 1  ;;  %v2432_v45 = vsel %vm932_vm0, %v5032_v43, 0  ;;  %v5312_v43 = vrot.slane %v4551_v53, 1 }
  0x8c   : > { %v658_v50 = vsel %vm530_vm2, %v577_v62, 0.0 }
  0x8d   : > { %v642_v38 = vsel %vm530_vm2, 0.0, %v576_v51  ;;  %v578_v21 = vsel %vm530_vm2, %v576_v51, %v577_v62  ;;  %v5230_v26 = vpack.c.bf16 %v658_v50, %v658_v50  ;;  %v5249_v10 = vsel %vm1324_vm4, %v1366_v6, %v1367_v36  ;;  %v2985_v51 = vld [vmem:[%s5840_s5] sm:$0xff]  ;;  %v2987_v62 = vld [vmem:[%s5840_s5 + $0x10] sm:$0xff]  ;;  %v2994_v36 = vld [vmem:[%s5840_s5 + $0x48] sm:$0xff] }
  0x8e   : > { %v5228_v17 = vpack.c.bf16 %v578_v21, %v642_v38  ;;  %3019 = vperm.xlu0 %4536, %v2985_v51   ;;  %3029 = vperm.xlu1 %4537, %v2987_v62   ;;  %v1622_v38 = vsel %vm932_vm0, %v1617_v44, 0  ;;  %v2988_v21 = vld [vmem:[%s5840_s5 + $0x18] sm:$0xff]  ;;  %v2989_v50 = vld [vmem:[%s5840_s5 + $0x20] sm:$0xff]  ;;  %v2998_v51 = vld [vmem:[%s5840_s5 + $0x68] sm:$0xff] }
  0x8f   : > { %v2031_v7 = vrot.slane %v5230_v26, 1  ;;  %v2993_v6 = vld [vmem:[%s5840_s5 + $0x40] sm:$0xff]  ;;  %v2999_v62 = vld [vmem:[%s5840_s5 + $0x70] sm:$0xff] }
  0x90   : > { %4144 = vmatmul.mubr.msk.bf16.gmra.mrb[20].mxu0 %vm883_vm1, %v5216_v56  ;;  %v2030_v31 = vrot.slane %v5228_v17, 1 }
  0x91   : > { %3988 = vmatmul.mubr.msk.bf16.vlgmr.msra.gmra.mrb[0].mxu1 %vm883_vm1, %v4793_v42  ;;  %4147 = vmatprep.mubr.msk.bf16.mxu0 %vm883_vm1, %v5226_v58 }
  0x92   : > { %4020 = vmatpush3.bf16.msra.mxu1 %v1422_v8  ;;  %3991 = vmatprep.mubr.msk.bf16.mxu1 %vm883_vm1, %v4799_v48  ;;  %v5246_v3 = vsel %vm1324_vm4, %v2030_v31, %v2031_v7  ;;  %v2986_v8 = vld [vmem:[%s5840_s5 + $0x8] sm:$0xff]  ;;  %v2991_v31 = vld [vmem:[%s5840_s5 + $0x30] sm:$0xff]  ;;  %v2992_v7 = vld [vmem:[%s5840_s5 + $0x38] sm:$0xff] }
  0x93   : > { %4518 = vmatprep.subr.msk.bf16.mxu1 %vm932_vm0, %v1617_v44  ;;  %3024 = vperm.xlu0 %4536, %v2986_v8   ;;  %v4540_v44 = vld [vmem:[%s5839_s4 + $0x10] sm:$0xf]  ;;  %v3001_v8 = vld [vmem:[%s5840_s5 + $0x80] sm:$0xff] }
  0x94   : > { %3034 = vperm.xlu1 %4537, %v2988_v21   ;;  %v3006_v21 = vld [vmem:[%s5840_s5 + $0xa8] sm:$0xff] }
  0x97   : > { %3039 = vperm.xlu0 %4536, %v2989_v50   ;;  %v3007_v50 = vld [vmem:[%s5840_s5 + $0xb0] sm:$0xff] }
  0x98   : > { %4148 = vmatmul.mubr.msk.bf16.gmra.mrb[24].mxu0 %vm883_vm1, %v5249_v10 }
  0x99   : > { %3992 = vmatmul.mubr.msk.bf16.gmra.mrb[4].mxu1 %vm883_vm1, %v4813_v32  ;;  %4151 = vmatprep.mubr.msk.bf16.mxu0 %vm883_vm1, %v5254_v47 }
  0x9a   : > { %3995 = vmatprep.mubr.msk.bf16.mxu1 %vm883_vm1, %v4823_v52 }
  0x9b   : > { %3049 = vperm.xlu0 %4536, %v2991_v31   ;;  %v3014_v31 = vld [vmem:[%s5840_s5 + $0xe8] sm:$0xff] }
  0x9f   : > { %3059 = vperm.xlu0 %4536, %v2993_v6   ;;  %v3016_v6 = vld [vmem:[%s5840_s5 + $0xf8] sm:$0xff] }
  0xa0   : > { %4152 = vmatmul.mubr.msk.bf16.gmra.mrb[28].mxu0 %vm883_vm1, %v5246_v3 }
  0xa1   : > { %3996 = vmatmul.mubr.msk.bf16.gmra.mrb[8].mxu1 %vm883_vm1, %v4877_v13  ;;  %4157 = vmatprep.mubr.msk.bf16.mxu0 %vm883_vm1, %v4799_v48 }
  0xa2   : > { %3999 = vmatprep.mubr.msk.bf16.mxu1 %vm883_vm1, %v4896_v39 }
  0xa3   : > { %3069 = vperm.xlu0 %4536, %v2995_v61   ;;  %v1817_v61 = vshrl.u32 %v5228_v17, 16 }
  0xa8   : > { %4158 = vmatmul.mubr.msk.bf16.vlgmr.msra.gmra.mrb[0].mxu0 %vm883_vm1, %v4813_v32 }
  0xa9   : > { %4000 = vmatmul.mubr.msk.bf16.gmra.mrb[12].mxu1 %vm883_vm1, %v4908_v20  ;;  %4190 = vmatpush3.bf16.msra.mxu0 %v2432_v45  ;;  %v2997_v45 = vld [vmem:[%s5840_s5 + $0x60] sm:$0xff] }
  0xaa   : > { %4003 = vmatprep.mubr.msk.bf16.mxu1 %vm883_vm1, %v4940_v55  ;;  %4161 = vmatprep.mubr.msk.bf16.mxu0 %vm883_vm1, %v4823_v52 }
  0xab   : > { %4524 = vmatprep.subr.msk.bf16.mxu0 %vm932_vm0, %v5279_v35  ;;  %3079 = vperm.xlu0 %4536, %v2997_v45   ;;  %v5852_v45 = vld [vmem:[#allocation2_spill] sm:$0xff] }
  0xaf   : > { %3089 = vperm.xlu0 %4536, %v2999_v62  }
  0xb0   : > { %4162 = vmatmul.mubr.msk.bf16.gmra.mrb[4].mxu0 %vm883_vm1, %v4877_v13 }
  0xb1   : > { %4004 = vmatmul.mubr.msk.bf16.gmra.mrb[16].mxu1 %vm883_vm1, %v4988_v19  ;;  %4165 = vmatprep.mubr.msk.bf16.mxu0 %vm883_vm1, %v4896_v39 }
  0xb2   : > { %4007 = vmatprep.mubr.msk.bf16.mxu1 %vm883_vm1, %v5008_v40 }
  0xb3   : > { %3099 = vperm.xlu0 %4536, %v3001_v8  }
  0xb8   : > { %4166 = vmatmul.mubr.msk.bf16.gmra.mrb[8].mxu0 %vm883_vm1, %v4908_v20 }
  0xb9   : > { %4008 = vmatmul.mubr.msk.bf16.gmra.mrb[20].mxu1 %vm883_vm1, %v5015_v23  ;;  %4169 = vmatprep.mubr.msk.bf16.mxu0 %vm883_vm1, %v4940_v55 }
  0xba   : > { %4011 = vmatprep.mubr.msk.bf16.mxu1 %vm883_vm1, %v5101_v11 }
  0xc0   : > { %4170 = vmatmul.mubr.msk.bf16.gmra.mrb[12].mxu0 %vm883_vm1, %v4988_v19 }
  0xc1   : > { %4012 = vmatmul.mubr.msk.bf16.gmra.mrb[24].mxu1 %vm883_vm1, %v5107_v15  ;;  %4173 = vmatprep.mubr.msk.bf16.mxu0 %vm883_vm1, %v5008_v40 }
  0xc2   : > { %4015 = vmatprep.mubr.msk.bf16.mxu1 %vm883_vm1, %v5132_v28 }
  0xc8   : > { %4174 = vmatmul.mubr.msk.bf16.gmra.mrb[16].mxu0 %vm883_vm1, %v5015_v23 }
  0xc9   : > { %4016 = vmatmul.mubr.msk.bf16.gmra.mrb[28].mxu1 %vm883_vm1, %v5155_v34  ;;  %4177 = vmatprep.mubr.msk.bf16.mxu0 %vm883_vm1, %v5101_v11 }
  0xca   : > { %4021 = vmatprep.mubr.msk.bf16.mxu1 %vm883_vm1, %v5312_v43 }
  0xd0   : > { %4178 = vmatmul.mubr.msk.bf16.gmra.mrb[20].mxu0 %vm883_vm1, %v5107_v15 }
  0xd1   : > { %4022 = vmatmul.mubr.msk.bf16.vlgmr.msra.gmra.mrb[0].mxu1 %vm883_vm1, %v4959_v22  ;;  %4181 = vmatprep.mubr.msk.bf16.mxu0 %vm883_vm1, %v5132_v28  ;;  %v2990_v22 = vld [vmem:[%s5840_s5 + $0x28] sm:$0xff] }
  0xd2   : > { %4054 = vmatpush3.bf16.msra.mxu1 %v1622_v38  ;;  %4025 = vmatprep.mubr.msk.bf16.mxu1 %vm883_vm1, %v4964_v0  ;;  %v3003_v38 = vld [vmem:[%s5840_s5 + $0x90] sm:$0xff] }
  0xd3   : > { %4520 = vmatprep.subr.msk.bf16.mxu1 %vm932_vm0, %v4540_v44  ;;  %3044 = vperm.xlu1 %4537, %v2990_v22   ;;  %v3010_v44 = vld [vmem:[%s5840_s5 + $0xc8] sm:$0xff]  ;;  %v3011_v22 = vld [vmem:[%s5840_s5 + $0xd0] sm:$0xff] }
  0xd4   : > { %3109 = vperm.xlu0 %4536, %v3003_v38  }
  0xd7   : > { %3054 = vperm.xlu1 %4537, %v2992_v7   ;;  %v3015_v7 = vld [vmem:[%s5840_s5 + $0xf0] sm:$0xff] }
  0xd8   : > { %4182 = vmatmul.mubr.msk.bf16.gmra.mrb[24].mxu0 %vm883_vm1, %v5155_v34 }
  0xd9   : > { %4026 = vmatmul.mubr.msk.bf16.gmra.mrb[4].mxu1 %vm883_vm1, %v5004_v37  ;;  %4185 = vmatprep.mubr.msk.bf16.mxu0 %vm883_vm1, %v5228_v17 }
  0xda   : > { %4029 = vmatprep.mubr.msk.bf16.mxu1 %vm883_vm1, %v5046_v49 }
  0xdb   : > { %3064 = vperm.xlu1 %4537, %v2994_v36   ;;  %v1819_v36 = vshll.u32 %v5228_v17, 16 }
  0xdf   : > { %3074 = vperm.xlu1 %4537, %v2996_v14   ;;  %v1824_v14 = vshll.u32 %v5230_v26, 16 }
  0xe0   : > { %4186 = vmatmul.mubr.bf16.gmra.mrb[28].mxu0 %v4551_v53  ;;  %v2629_v53 = vsel %vm932_vm0, %v5279_v35, 0  ;;  %v3002_v35 = vld [vmem:[%s5840_s5 + $0x88] sm:$0xff] }
  0xe1   : > { %4030 = vmatmul.mubr.msk.bf16.gmra.mrb[8].mxu1 %vm883_vm1, %v5075_v60  ;;  %4191 = vmatprep.mubr.msk.bf16.mxu0 %vm883_vm1, %v4833_v54  ;;  %v3000_v54 = vld [vmem:[%s5840_s5 + $0x78] sm:$0xff]  ;;  %v1826_v62 = vrot.slane %v1824_v14, 1 }
  0xe2   : > { %4033 = vmatprep.mubr.msk.bf16.mxu1 %vm883_vm1, %v5090_v41 }
  0xe3   : > { %3084 = vperm.xlu1 %4537, %v2998_v51  }
  0xe7   : > { %3094 = vperm.xlu1 %4537, %v3000_v54  }
  0xe8   : > { %4192 = vmatmul.mubr.msk.bf16.vlgmr.msra.gmra.mrb[0].mxu0 %vm883_vm1, %v4858_v25  ;;  %v3004_v25 = vld [vmem:[%s5840_s5 + $0x98] sm:$0xff] }
  0xe9   : > { %4034 = vmatmul.mubr.msk.bf16.gmra.mrb[12].mxu1 %vm883_vm1, %v5152_v9  ;;  %4224 = vmatpush3.bf16.msra.mxu0 %v2629_v53 }
  0xea   : > { %4037 = vmatprep.mubr.msk.bf16.mxu1 %vm883_vm1, %v5162_v46  ;;  %4195 = vmatprep.mubr.msk.bf16.mxu0 %vm883_vm1, %v4873_v63  ;;  %v3005_v63 = vld [vmem:[%s5840_s5 + $0xa0] sm:$0xff] }
  0xeb   : > { %3104 = vperm.xlu1 %4537, %v3002_v35   ;;  %3119 = vperm.xlu0 %4536, %v3005_v63  }
  0xef   : > { %3114 = vperm.xlu1 %4537, %v3004_v25   ;;  %3129 = vperm.xlu0 %4536, %v3007_v50  }
  0xf0   : > { %4196 = vmatmul.mubr.msk.bf16.gmra.mrb[4].mxu0 %vm883_vm1, %v4916_v27  ;;  %v3008_v27 = vld [vmem:[%s5840_s5 + $0xb8] sm:$0xff] }
  0xf1   : > { %4038 = vmatmul.mubr.msk.bf16.gmra.mrb[16].mxu1 %vm883_vm1, %v5173_v24  ;;  %4199 = vmatprep.mubr.msk.bf16.mxu0 %vm883_vm1, %v4929_v59  ;;  %v3009_v59 = vld [vmem:[%s5840_s5 + $0xc0] sm:$0xff] }
  0xf2   : > { %4041 = vmatprep.mubr.msk.bf16.mxu1 %vm883_vm1, %v5187_v18 }
  0xf3   : > { %3124 = vperm.xlu1 %4537, %v3006_v21   ;;  %3139 = vperm.xlu0 %4536, %v3009_v59  }
  0xf7   : > { %3134 = vperm.xlu1 %4537, %v3008_v27   ;;  %3149 = vperm.xlu0 %4536, %v3011_v22  }
  0xf8   : > { %4200 = vmatmul.mubr.msk.bf16.gmra.mrb[8].mxu0 %vm883_vm1, %v4951_v16  ;;  %v3012_v16 = vld [vmem:[%s5840_s5 + $0xd8] sm:$0xff] }
  0xf9   : > { %4042 = vmatmul.mubr.msk.bf16.gmra.mrb[20].mxu1 %vm883_vm1, %v5196_v33  ;;  %4203 = vmatprep.mubr.msk.bf16.mxu0 %vm883_vm1, %v4986_v2  ;;  %v3013_v2 = vld [vmem:[%s5840_s5 + $0xe0] sm:$0xff] }
  0xfa   : > { %4045 = vmatprep.mubr.msk.bf16.mxu1 %vm883_vm1, %v5216_v56 }
  0xfb   : > { %3144 = vperm.xlu1 %4537, %v3010_v44   ;;  %3159 = vperm.xlu0 %4536, %v3013_v2  }
  0xff   : > { %3154 = vperm.xlu1 %4537, %v3012_v16   ;;  %3169 = vperm.xlu0 %4536, %v3015_v7  }
 0x100   : > { %4204 = vmatmul.mubr.msk.bf16.gmra.mrb[12].mxu0 %vm883_vm1, %v5024_v29 }
 0x101   : > { %4046 = vmatmul.mubr.msk.bf16.gmra.mrb[24].mxu1 %vm883_vm1, %v5226_v58  ;;  %4207 = vmatprep.mubr.msk.bf16.mxu0 %vm883_vm1, %v5064_v12 }
 0x102   : > { %4049 = vmatprep.mubr.msk.bf16.mxu1 %vm883_vm1, %v5249_v10 }
 0x103   : > { %3164 = vperm.xlu1 %4537, %v3014_v31  }
 0x107   : > { %3174 = vperm.xlu1 %4537, %v3016_v6  }
 0x108   : > { %4208 = vmatmul.mubr.msk.bf16.gmra.mrb[16].mxu0 %vm883_vm1, %v5071_v57 }
 0x109   : > { %4050 = vmatmul.mubr.msk.bf16.gmra.mrb[28].mxu1 %vm883_vm1, %v5254_v47  ;;  %4211 = vmatprep.mubr.msk.bf16.mxu0 %vm883_vm1, %v5130_v30 }
 0x10a   : > { %4055 = vmatprep.mubr.msk.bf16.mxu1 %vm883_vm1, %v4793_v42  ;;  %v1821_v42 = vrot.slane %v1819_v36, 1 }
 0x10c   : > { %v1822_v51 = vor.u32 %v1821_v42, %v1817_v61 }
 0x110   : > { %4212 = vmatmul.mubr.msk.bf16.gmra.mrb[20].mxu0 %vm883_vm1, %v5139_v1 }
 0x111   : > { %4056 = vmatmul.mubr.msk.bf16.vlgmr.msra.gmra.mrb[0].mxu1 %vm883_vm1, %v4799_v48  ;;  %4215 = vmatprep.mubr.msk.bf16.mxu0 %vm883_vm1, %v5179_v5  ;;  %v1827_v48 = vsel %vm693_vm3, %v1822_v51, %v1826_v62 }
 0x112   : > { %4258 = vmatpush3.bf16.msra.mxu1 %v5852_v45  ;;  %4059 = vmatprep.mubr.msk.bf16.mxu1 %vm883_vm1, %v4813_v32  ;;  %v5853_v32 = vld [vmem:[#allocation3_spill] sm:$0xff] }
 0x118   : > { %4216 = vmatmul.mubr.msk.bf16.gmra.mrb[24].mxu0 %vm883_vm1, %v5193_v4 }
 0x119   : > { %4060 = vmatmul.mubr.msk.bf16.gmra.mrb[4].mxu1 %vm883_vm1, %v4823_v52  ;;  %4219 = vmatprep.mubr.msk.bf16.mxu0 %vm883_vm1, %v1827_v48 }
 0x11a   : > { %4063 = vmatprep.mubr.msk.bf16.mxu1 %vm883_vm1, %v4877_v13 }
 0x120   : > { %4220 = vmatmul.mubr.msk.bf16.gmra.mrb[28].mxu0 %vm883_vm1, %v5853_v32 }
 0x121   : > { %4064 = vmatmul.mubr.msk.bf16.gmra.mrb[8].mxu1 %vm883_vm1, %v4896_v39  ;;  %4225 = vmatprep.mubr.msk.bf16.mxu0 %vm883_vm1, %v4964_v0  ;;  %v3030_v0 = vpop.permute.xlu1 %3029 }
 0x122   : > { %4067 = vmatprep.mubr.msk.bf16.mxu1 %vm883_vm1, %v4908_v20 }
 0x128   : > { %4226 = vmatmul.mubr.msk.bf16.vlgmr.msra.gmra.mrb[0].mxu0 %vm883_vm1, %v5004_v37 }
 0x129   : > { %4068 = vmatmul.mubr.msk.bf16.gmra.mrb[12].mxu1 %vm883_vm1, %v4940_v55  ;;  %4229 = vmatprep.mubr.msk.bf16.mxu0 %vm883_vm1, %v5046_v49  ;;  %v3020_v55 = vpop.permute.xlu0 %3019 }
 0x12a   : > { %4071 = vmatprep.mubr.msk.bf16.mxu1 %vm883_vm1, %v4988_v19 }
 0x130   : > { %4230 = vmatmul.mubr.msk.bf16.gmra.mrb[4].mxu0 %vm883_vm1, %v5075_v60 }
 0x131   : > { %4072 = vmatmul.mubr.msk.bf16.gmra.mrb[16].mxu1 %vm883_vm1, %v5008_v40  ;;  %4233 = vmatprep.mubr.msk.bf16.mxu0 %vm883_vm1, %v5090_v41  ;;  %v3025_v40 = vpop.permute.xlu0 %3024 }
 0x132   : > { %4075 = vmatprep.mubr.msk.bf16.mxu1 %vm883_vm1, %v5015_v23 }
 0x138   : > { %4234 = vmatmul.mubr.msk.bf16.gmra.mrb[8].mxu0 %vm883_vm1, %v5152_v9 }
 0x139   : > { %4076 = vmatmul.mubr.msk.bf16.gmra.mrb[20].mxu1 %vm883_vm1, %v5101_v11  ;;  %4237 = vmatprep.mubr.msk.bf16.mxu0 %vm883_vm1, %v5162_v46 }
 0x13a   : > { %4079 = vmatprep.mubr.msk.bf16.mxu1 %vm883_vm1, %v5107_v15 }
 0x140   : > { %4238 = vmatmul.mubr.msk.bf16.gmra.mrb[12].mxu0 %vm883_vm1, %v5173_v24 }
 0x141   : > { %4080 = vmatmul.mubr.msk.bf16.gmra.mrb[24].mxu1 %vm883_vm1, %v5132_v28  ;;  %4241 = vmatprep.mubr.msk.bf16.mxu0 %vm883_vm1, %v5187_v18 }
 0x142   : > { %4083 = vmatprep.mubr.msk.bf16.mxu1 %vm883_vm1, %v5155_v34 }
 0x148   : > { %4242 = vmatmul.mubr.msk.bf16.gmra.mrb[16].mxu0 %vm883_vm1, %v5196_v33 }
 0x149   : > { %4084 = vmatmul.mubr.msk.bf16.gmra.mrb[28].mxu1 %vm883_vm1, %v5228_v17  ;;  %4245 = vmatprep.mubr.msk.bf16.mxu0 %vm883_vm1, %v5216_v56 }
 0x14a   : > { %4105 = vmatprep.mubr.msk.bf16.mxu1 %vm883_vm1, %v5024_v29  ;;  %v3035_v29 = vpop.permute.xlu1 %3034 }
 0x150   : > { %4246 = vmatmul.mubr.msk.bf16.gmra.mrb[20].mxu0 %vm883_vm1, %v5226_v58 }
 0x151   : > { %4106 = vmatmul.mubr.msk.bf16.vlgmr.msra.gmra.mrb[16].mxu1 %vm883_vm1, %v5064_v12  ;;  %4249 = vmatprep.mubr.msk.bf16.mxu0 %vm883_vm1, %v5249_v10  ;;  %v5583_v12 = vpop.permute.xlu0 %3039 }
 0x152   : > { %4109 = vmatprep.mubr.msk.bf16.mxu1 %vm883_vm1, %v5071_v57  ;;  %v5587_v60 = vpop.permute.xlu1 %3044 }
 0x156   : > { %v5597_v28 = vpop.permute.xlu1 %3054 }
 0x158   : > { %4250 = vmatmul.mubr.msk.bf16.gmra.mrb[24].mxu0 %vm883_vm1, %v5254_v47 }
 0x159   : > { %4110 = vmatmul.mubr.msk.bf16.gmra.mrb[20].mxu1 %vm883_vm1, %v5130_v30  ;;  %4253 = vmatprep.mubr.msk.bf16.mxu0 %vm883_vm1, %v5246_v3  ;;  %v5595_v30 = vpop.permute.xlu0 %3049 }
 0x15a   : > { %4113 = vmatprep.mubr.msk.bf16.mxu1 %vm883_vm1, %v5139_v1  ;;  %v5616_v58 = vpop.permute.xlu1 %3064 }
 0x15e   : > { %v5628_v16 = vpop.permute.xlu1 %3074 }
 0x160   : > { %4254 = vmatmul.mubr.msk.bf16.gmra.mrb[28].mxu0 %vm883_vm1, %v5312_v43 }
 0x161   : > { %4114 = vmatmul.mubr.msk.bf16.gmra.mrb[24].mxu1 %vm883_vm1, %v5179_v5 }
 0x162   : > { %4117 = vmatprep.mubr.msk.bf16.mxu1 %vm883_vm1, %v5193_v4  ;;  %v5614_v4 = vpop.permute.xlu0 %3059 }
 0x166   : > { %v5624_v59 = vpop.permute.xlu0 %3069 }
 0x169   : > { %4118 = vmatmul.mubr.msk.bf16.gmra.mrb[28].mxu1 %vm883_vm1, %v1827_v48 }
 0x1e4   : > { %v4057_v52 = vpop.f32.mrb[0].mxu1 }
 0x1e5   : > { %v1658_v13 = vpop.f32.mrb[1].mxu1 }
 0x1e6   : > { %v4058_v39 = vpop.f32.mrb[2].mxu1 }
 0x1e7   : > { %v1661_v20 = vpop.f32.mrb[3].mxu1 }
 0x1ec   : > { %v4061_v19 = vpop.f32.mrb[4].mxu1 }
 0x1ed   : > { %v1674_v37 = vpop.f32.mrb[5].mxu1 }
 0x1ee   : > { %v5579_v23 = vpop.f32.mrb[6].mxu1 }
 0x1ef   : > { %v5581_v49 = vpop.f32.mrb[7].mxu1 }
 0x1f4   : > { %v5585_v57 = vpop.f32.mrb[8].mxu1 }
 0x1f5   : > { %v5589_v41 = vpop.f32.mrb[9].mxu1 }
 0x1f6   : > { %v5591_v11 = vpop.f32.mrb[10].mxu1 }
 0x1f7   : > { %v5593_v15 = vpop.f32.mrb[11].mxu1 }
 0x1fb   : > { %v4227_v46 = vpop.f32.mrb[0].mxu0 }
 0x1fc   : > { %v5599_v1 = vpop.f32.mrb[12].mxu1  ;;  %v4259_v5 = vadd.f32 %v4227_v46, %v4057_v52  ;;  %v2665_v18 = vpop.f32.mrb[1].mxu0 }
 0x1fd   : > { %v5601_v9 = vpop.f32.mrb[13].mxu1  ;;  %v4260_v33 = vadd.f32 %v2665_v18, %v1658_v13  ;;  %v4228_v56 = vpop.f32.mrb[2].mxu0 }
 0x1fe   : > { %v5603_v34 = vpop.f32.mrb[14].mxu1  ;;  %v3689_v17 = vpack.c.bf16 %v4259_v5, %v4259_v5  ;;  %v3280_v26 = vmul.f32 %v4259_v5, %v4259_v5  ;;  %v4261_v3 = vadd.f32 %v4228_v56, %v4058_v39  ;;  %v2668_v10 = vpop.f32.mrb[3].mxu0  ;;  %v3179_v35 = vmul.f32 %v4259_v5, %v3030_v0 }
 0x1ff   : > { %v5605_v24 = vpop.f32.mrb[15].mxu1  ;;  %v3687_v47 = vpack.c.bf16 %v4260_v33, %v4260_v33  ;;  %v3278_v43 = vmul.f32 %v4260_v33, %v4260_v33  ;;  %v4262_v53 = vadd.f32 %v2668_v10, %v1661_v20  ;;  %v3177_v54 = vmul.f32 %v4260_v33, %v3020_v55  ;;  %v5641_v5 = vpop.permute.xlu0 %3079 }
 0x200   : > { %2955 = vst.msk [vmem:[%s5612_s26 + $0x8] sm:$0xf] %vm2952_vm5, %v3689_v17  ;;  %v3690_v8 = vpack.c.bf16 %v4261_v3, %v4261_v3  ;;  %v3312_v38 = vmul.f32 %v3280_v26, %v3030_v0  ;;  %v3281_v21 = vmul.f32 %v4261_v3, %v4261_v3  ;;  %v3180_v44 = vmul.f32 %v4261_v3, %v3035_v29  ;;  %v5647_v17 = vpop.permute.xlu1 %3084 }
 0x201   : > { %2953 = vst.msk [vmem:[%s5612_s26] sm:$0xf] %vm2952_vm5, %v3687_v47  ;;  %v3688_v25 = vpack.c.bf16 %v4262_v53, %v4262_v53  ;;  %v3310_v63 = vmul.f32 %v3278_v43, %v3020_v55  ;;  %v3178_v50 = vmul.f32 %v4262_v53, %v3025_v40  ;;  %v3279_v27 = vmul.f32 %v4262_v53, %v4262_v53 }
 0x202   : > { %2956 = vst.msk [vmem:[%s5612_s26 + $0xc] sm:$0xf] %vm2952_vm5, %v3690_v8  ;;  %v3209_v2 = vsel %vm883_vm1, %v3177_v54, 0.0  ;;  %v3212_v61 = vsel %vm883_vm1, %v3179_v35, 0.0  ;;  %v3345_v42 = vsel %vm883_vm1, %v3312_v38, 0.0  ;;  %v3313_v48 = vmul.f32 %v3281_v21, %v3035_v29 }
 0x203   : > { %2954 = vst.msk [vmem:[%s5612_s26 + $0x4] sm:$0xf] %vm2952_vm5, %v3688_v25  ;;  %v4231_v22 = vpop.f32.mrb[4].mxu0  ;;  %v3210_v31 = vsel %vm883_vm1, %v3178_v50, 0.0  ;;  %v3311_v7 = vmul.f32 %v3279_v27, %v3025_v40  ;;  %v3342_v62 = vsel %vm883_vm1, %v3310_v63, 0.0 }
 0x204   : > { %v4263_v6 = vadd.f32 %v4231_v22, %v4061_v19  ;;  %v2681_v36 = vpop.f32.mrb[5].mxu0  ;;  %v3211_v14 = vadd.f32 %v3210_v31, %v3209_v2  ;;  %v3214_v19 = vsel %vm883_vm1, %v3180_v44, 0.0  ;;  %v3347_v26 = vsel %vm883_vm1, %v3313_v48, 0.0 }
 0x205   : > { %v4264_v45 = vadd.f32 %v2681_v36, %v1674_v37  ;;  %v4232_v51 = vpop.f32.mrb[6].mxu0  ;;  %v3343_v32 = vsel %vm883_vm1, %v3311_v7, 0.0 }
 0x206   : > { %v3693_v52 = vpack.c.bf16 %v4263_v6, %v4263_v6  ;;  %v2684_v13 = vpop.f32.mrb[7].mxu0  ;;  %v3213_v39 = vadd.f32 %v3212_v61, %v3211_v14  ;;  %v3344_v20 = vadd.f32 %v3343_v32, %v3342_v62  ;;  %v3284_v40 = vmul.f32 %v4263_v6, %v4263_v6  ;;  %v5668_v61 = vpop.permute.xlu1 %3094 }
 0x207   : > { %v3691_v55 = vpack.c.bf16 %v4264_v45, %v4264_v45  ;;  %v3181_v0 = vmul.f32 %v4264_v45, %v5583_v12  ;;  %v3282_v37 = vmul.f32 %v4264_v45, %v4264_v45  ;;  %v4265_v46 = vadd.f32 %v4232_v51, %v5579_v23 }
 0x208   : > { %2959 = vst.msk [vmem:[%s5612_s26 + $0x18] sm:$0xf] %vm2952_vm5, %v3693_v52  ;;  %v3346_v29 = vadd.f32 %v3345_v42, %v3344_v20  ;;  %v3215_v18 = vadd.f32 %v3214_v19, %v3213_v39  ;;  %v4266_v56 = vadd.f32 %v2684_v13, %v5581_v49  ;;  %v3183_v23 = vmul.f32 %v4263_v6, %v5595_v30  ;;  %v5665_v6 = vpop.permute.xlu0 %3089 }
 0x209   : > { %2957 = vst.msk [vmem:[%s5612_s26 + $0x10] sm:$0xf] %vm2952_vm5, %v3691_v55  ;;  %v3216_v33 = vsel %vm883_vm1, %v3181_v0, 0.0  ;;  %v3314_v3 = vmul.f32 %v3282_v37, %v5583_v12  ;;  %v3694_v10 = vpack.c.bf16 %v4265_v46, %v4265_v46  ;;  %v3285_v35 = vmul.f32 %v4265_v46, %v4265_v46 }
 0x20a   : > { %v3217_v47 = vadd.f32 %v3216_v33, %v3215_v18  ;;  %v3348_v43 = vadd.f32 %v3347_v26, %v3346_v29  ;;  %v3692_v53 = vpack.c.bf16 %v4266_v56, %v4266_v56  ;;  %v3182_v49 = vmul.f32 %v4266_v56, %v5587_v60 }
 0x20b   : > { %v4235_v54 = vpop.f32.mrb[8].mxu0  ;;  %v3349_v8 = vsel %vm883_vm1, %v3314_v3, 0.0  ;;  %2960 = vst.msk [vmem:[%s5612_s26 + $0x1c] sm:$0xf] %vm2952_vm5, %v3694_v10  ;;  %v3283_v38 = vmul.f32 %v4266_v56, %v4266_v56  ;;  %v3316_v63 = vmul.f32 %v3284_v40, %v5595_v30  ;;  %v3184_v44 = vmul.f32 %v4265_v46, %v5597_v28  ;;  %v5691_v10 = vpop.permute.xlu1 %3104 }
 0x20c   : > { %v2697_v25 = vpop.f32.mrb[9].mxu0  ;;  %v3350_v21 = vadd.f32 %v3349_v8, %v3348_v43  ;;  %2958 = vst.msk [vmem:[%s5612_s26 + $0x14] sm:$0xf] %vm2952_vm5, %v3692_v53  ;;  %v4267_v12 = vadd.f32 %v4235_v54, %v5585_v57  ;;  %v3218_v22 = vsel %vm883_vm1, %v3182_v49, 0.0  ;;  %v3220_v30 = vsel %vm883_vm1, %v3183_v23, 0.0  ;;  %v5687_v18 = vpop.permute.xlu0 %3099 }
 0x20d   : > { %v4268_v50 = vadd.f32 %v2697_v25, %v5589_v41  ;;  %v4236_v27 = vpop.f32.mrb[10].mxu0  ;;  %v3315_v2 = vmul.f32 %v3283_v38, %v5587_v60  ;;  %v3219_v36 = vadd.f32 %v3218_v22, %v3217_v47  ;;  %v3317_v41 = vmul.f32 %v3285_v35, %v5597_v28 }
 0x20e   : > { %v4269_v31 = vadd.f32 %v4236_v27, %v5591_v11  ;;  %v2700_v7 = vpop.f32.mrb[11].mxu0  ;;  %v3697_v57 = vpack.c.bf16 %v4267_v12, %v4267_v12  ;;  %v3288_v11 = vmul.f32 %v4267_v12, %v4267_v12  ;;  %v3353_v48 = vsel %vm883_vm1, %v3316_v63, 0.0 }
 0x20f   : > { %v3351_v42 = vsel %vm883_vm1, %v3315_v2, 0.0  ;;  %v3695_v14 = vpack.c.bf16 %v4268_v50, %v4268_v50  ;;  %v3185_v45 = vmul.f32 %v4268_v50, %v5614_v4  ;;  %v3221_v60 = vadd.f32 %v3220_v30, %v3219_v36 }
 0x210   : > { %v3352_v51 = vadd.f32 %v3351_v42, %v3350_v21  ;;  %2963 = vst.msk [vmem:[%s5612_s26 + $0x28] sm:$0xf] %vm2952_vm5, %v3697_v57  ;;  %v3286_v62 = vmul.f32 %v4268_v50, %v4268_v50  ;;  %v3222_v32 = vsel %vm883_vm1, %v3184_v44, 0.0  ;;  %v3698_v52 = vpack.c.bf16 %v4269_v31, %v4269_v31  ;;  %v5709_v44 = vpop.permute.xlu0 %3109 }
 0x211   : > { %2961 = vst.msk [vmem:[%s5612_s26 + $0x20] sm:$0xf] %vm2952_vm5, %v3695_v14  ;;  %v3224_v28 = vsel %vm883_vm1, %v3185_v45, 0.0  ;;  %v3223_v39 = vadd.f32 %v3222_v32, %v3221_v60  ;;  %v3289_v55 = vmul.f32 %v4269_v31, %v4269_v31  ;;  %v3355_v19 = vsel %vm883_vm1, %v3317_v41, 0.0 }
 0x212   : > { %v3354_v13 = vadd.f32 %v3353_v48, %v3352_v51  ;;  %v3318_v20 = vmul.f32 %v3286_v62, %v5614_v4  ;;  %v3187_v40 = vmul.f32 %v4267_v12, %v5624_v59  ;;  %2964 = vst.msk [vmem:[%s5612_s26 + $0x2c] sm:$0xf] %vm2952_vm5, %v3698_v52  ;;  %v4270_v37 = vadd.f32 %v2700_v7, %v5593_v15  ;;  %v5711_v7 = vpop.permute.xlu1 %3114 }
 0x213   : > { %v4239_v0 = vpop.f32.mrb[12].mxu0  ;;  %v3320_v33 = vmul.f32 %v3288_v11, %v5624_v59  ;;  %v3225_v56 = vadd.f32 %v3224_v28, %v3223_v39  ;;  %v3188_v54 = vmul.f32 %v4269_v31, %v5628_v16  ;;  %v3321_v8 = vmul.f32 %v3289_v55, %v5628_v16 }
 0x214   : > { %v4271_v46 = vadd.f32 %v4239_v0, %v5599_v1  ;;  %v2713_v29 = vpop.f32.mrb[13].mxu0  ;;  %v3356_v4 = vadd.f32 %v3355_v19, %v3354_v13  ;;  %v3357_v26 = vsel %vm883_vm1, %v3318_v20, 0.0  ;;  %v3696_v23 = vpack.c.bf16 %v4270_v37, %v4270_v37  ;;  %v5730_v0 = vpop.permute.xlu0 %3119 }
 0x215   : > { %v4240_v3 = vpop.f32.mrb[14].mxu0  ;;  %v3186_v47 = vmul.f32 %v4270_v37, %v5616_v58  ;;  %v3287_v15 = vmul.f32 %v4270_v37, %v4270_v37  ;;  %v4272_v49 = vadd.f32 %v2713_v29, %v5601_v9  ;;  %v3228_v25 = vsel %vm883_vm1, %v3187_v40, 0.0 }
 0x216   : > { %v3701_v43 = vpack.c.bf16 %v4271_v46, %v4271_v46  ;;  %v2716_v1 = vpop.f32.mrb[15].mxu0  ;;  %v3358_v53 = vadd.f32 %v3357_v26, %v3356_v4  ;;  %2962 = vst.msk [vmem:[%s5612_s26 + $0x24] sm:$0xf] %vm2952_vm5, %v3696_v23  ;;  %v4273_v38 = vadd.f32 %v4240_v3, %v5603_v34  ;;  %v3361_v63 = vsel %vm883_vm1, %v3320_v33, 0.0 }
 0x217   : > { %v3226_v59 = vsel %vm883_vm1, %v3186_v47, 0.0  ;;  %v3319_v35 = vmul.f32 %v3287_v15, %v5616_v58  ;;  %v4274_v16 = vadd.f32 %v2716_v1, %v5605_v24  ;;  %v3699_v50 = vpack.c.bf16 %v4272_v49, %v4272_v49 }
 0x218   : > { %2967 = vst.msk [vmem:[%s5612_s26 + $0x38] sm:$0xf] %vm2952_vm5, %v3701_v43  ;;  %v3227_v21 = vadd.f32 %v3226_v59, %v3225_v56  ;;  %v3189_v27 = vmul.f32 %v4272_v49, %v5641_v5  ;;  %v3290_v58 = vmul.f32 %v4272_v49, %v4272_v49  ;;  %v3292_v34 = vmul.f32 %v4271_v46, %v4271_v46 }
 0x219   : > { %v3359_v12 = vsel %vm883_vm1, %v3319_v35, 0.0  ;;  %v3702_v2 = vpack.c.bf16 %v4273_v38, %v4273_v38  ;;  %v3230_v30 = vsel %vm883_vm1, %v3188_v54, 0.0  ;;  %v3363_v24 = vsel %vm883_vm1, %v3321_v8, 0.0  ;;  %2965 = vst.msk [vmem:[%s5612_s26 + $0x30] sm:$0xf] %vm2952_vm5, %v3699_v50 }
 0x21a   : > { %v3229_v9 = vadd.f32 %v3228_v25, %v3227_v21  ;;  %v3360_v22 = vadd.f32 %v3359_v12, %v3358_v53  ;;  %v3232_v36 = vsel %vm883_vm1, %v3189_v27, 0.0  ;;  %v3322_v57 = vmul.f32 %v3290_v58, %v5641_v5 }
 0x21b   : > { %v4243_v31 = vpop.f32.mrb[16].mxu0  ;;  %2968 = vst.msk [vmem:[%s5612_s26 + $0x3c] sm:$0xf] %vm2952_vm5, %v3702_v2  ;;  %v3700_v45 = vpack.c.bf16 %v4274_v16, %v4274_v16  ;;  %v3190_v60 = vmul.f32 %v4274_v16, %v5647_v17  ;;  %v3191_v11 = vmul.f32 %v4271_v46, %v5665_v6  ;;  %v3293_v48 = vmul.f32 %v4273_v38, %v4273_v38  ;;  %v5732_v46 = vpop.permute.xlu1 %3124 }
 0x21c   : > { %v2729_v41 = vpop.f32.mrb[17].mxu0  ;;  %v3362_v42 = vadd.f32 %v3361_v63, %v3360_v22  ;;  %v3231_v14 = vadd.f32 %v3230_v30, %v3229_v9  ;;  %v3365_v62 = vsel %vm883_vm1, %v3322_v57, 0.0  ;;  %v3291_v32 = vmul.f32 %v4274_v16, %v4274_v16 }
 0x21d   : > { %v4244_v51 = vpop.f32.mrb[18].mxu0  ;;  %v3324_v52 = vmul.f32 %v3292_v34, %v5665_v6  ;;  %2966 = vst.msk [vmem:[%s5612_s26 + $0x34] sm:$0xf] %vm2952_vm5, %v3700_v45  ;;  %v3234_v39 = vsel %vm883_vm1, %v3190_v60, 0.0  ;;  %v3192_v20 = vmul.f32 %v4273_v38, %v5668_v61  ;;  %v3236_v29 = vsel %vm883_vm1, %v3191_v11, 0.0 }
 0x21e   : > { %v2732_v28 = vpop.f32.mrb[19].mxu0  ;;  %v3233_v5 = vadd.f32 %v3232_v36, %v3231_v14  ;;  %v3364_v13 = vadd.f32 %v3363_v24, %v3362_v42  ;;  %v3323_v55 = vmul.f32 %v3291_v32, %v5647_v17  ;;  %v3325_v6 = vmul.f32 %v3293_v48, %v5668_v61 }
 0x21f   : > { %v3369_v26 = vsel %vm883_vm1, %v3324_v52, 0.0  ;;  %v3238_v43 = vsel %vm883_vm1, %v3192_v20, 0.0  ;;  %v3135_v57 = vpop.permute.xlu1 %3134 }
 0x220   : > { %v3366_v19 = vadd.f32 %v3365_v62, %v3364_v13  ;;  %v3235_v40 = vadd.f32 %v3234_v39, %v3233_v5  ;;  %v3367_v33 = vsel %vm883_vm1, %v3323_v55, 0.0  ;;  %v3371_v63 = vsel %vm883_vm1, %v3325_v6, 0.0 }
 0x222   : > { %v3237_v3 = vadd.f32 %v3236_v29, %v3235_v40  ;;  %v3368_v23 = vadd.f32 %v3367_v33, %v3366_v19 }
 0x223   : > { %v4247_v15 = vpop.f32.mrb[20].mxu0 }
 0x224   : > { %v4107_v37 = vpop.f32.mrb[16].mxu1  ;;  %v2745_v61 = vpop.f32.mrb[21].mxu0  ;;  %v3370_v59 = vadd.f32 %v3369_v26, %v3368_v23  ;;  %v3239_v38 = vadd.f32 %v3238_v43, %v3237_v3 }
 0x225   : > { %v1933_v56 = vpop.f32.mrb[17].mxu1  ;;  %v4275_v4 = vadd.f32 %v4243_v31, %v4107_v37  ;;  %v4248_v25 = vpop.f32.mrb[22].mxu0 }
 0x226   : > { %v4108_v17 = vpop.f32.mrb[18].mxu1  ;;  %v4276_v47 = vadd.f32 %v2729_v41, %v1933_v56  ;;  %v5743_v12 = vpop.f32.mrb[23].mxu0  ;;  %v3372_v27 = vadd.f32 %v3371_v63, %v3370_v59 }
 0x227   : > { %v3705_v1 = vpack.c.bf16 %v4275_v4, %v4275_v4  ;;  %v3296_v53 = vmul.f32 %v4275_v4, %v4275_v4  ;;  %v1936_v54 = vpop.f32.mrb[19].mxu1  ;;  %v4277_v8 = vadd.f32 %v4244_v51, %v4108_v17  ;;  %v3195_v9 = vmul.f32 %v4275_v4, %v5709_v44  ;;  %v3130_v31 = vpop.permute.xlu0 %3129 }
 0x228   : > { %v3703_v35 = vpack.c.bf16 %v4276_v47, %v4276_v47  ;;  %v3193_v49 = vmul.f32 %v4276_v47, %v5687_v18  ;;  %v3294_v21 = vmul.f32 %v4276_v47, %v4276_v47  ;;  %v4278_v2 = vadd.f32 %v2732_v28, %v1936_v54  ;;  %v5773_v59 = vpop.permute.xlu1 %3144 }
 0x229   : > { %2971 = vst.msk [vmem:[%s5612_s26 + $0x48] sm:$0xf] %vm2952_vm5, %v3705_v1  ;;  %v3706_v16 = vpack.c.bf16 %v4277_v8, %v4277_v8  ;;  %v3297_v58 = vmul.f32 %v4277_v8, %v4277_v8  ;;  %v3328_v30 = vmul.f32 %v3296_v53, %v5709_v44  ;;  %v3196_v24 = vmul.f32 %v4277_v8, %v5711_v7 }
 0x22a   : > { %2969 = vst.msk [vmem:[%s5612_s26 + $0x40] sm:$0xf] %vm2952_vm5, %v3703_v35  ;;  %v3240_v50 = vsel %vm883_vm1, %v3193_v49, 0.0  ;;  %v3326_v34 = vmul.f32 %v3294_v21, %v5687_v18  ;;  %v3704_v42 = vpack.c.bf16 %v4278_v2, %v4278_v2  ;;  %v3194_v14 = vmul.f32 %v4278_v2, %v5691_v10 }
 0x22b   : > { %v3241_v22 = vadd.f32 %v3240_v50, %v3239_v38  ;;  %2972 = vst.msk [vmem:[%s5612_s26 + $0x4c] sm:$0xf] %vm2952_vm5, %v3706_v16  ;;  %v3295_v45 = vmul.f32 %v4278_v2, %v4278_v2  ;;  %v3329_v18 = vmul.f32 %v3297_v58, %v5711_v7  ;;  %v4251_v32 = vpop.f32.mrb[24].mxu0  ;;  %v3244_v44 = vsel %vm883_vm1, %v3195_v9, 0.0  ;;  %v3140_v43 = vpop.permute.xlu0 %3139 }
 0x22c   : > { %v4111_v36 = vpop.f32.mrb[20].mxu1  ;;  %v3373_v41 = vsel %vm883_vm1, %v3326_v34, 0.0  ;;  %2970 = vst.msk [vmem:[%s5612_s26 + $0x44] sm:$0xf] %vm2952_vm5, %v3704_v42  ;;  %v3242_v28 = vsel %vm883_vm1, %v3194_v14, 0.0  ;;  %v2761_v39 = vpop.f32.mrb[25].mxu0 }
 0x22d   : > { %v1949_v60 = vpop.f32.mrb[21].mxu1  ;;  %v3374_v51 = vadd.f32 %v3373_v41, %v3372_v27  ;;  %v4279_v11 = vadd.f32 %v4247_v15, %v4111_v36  ;;  %v3327_v52 = vmul.f32 %v3295_v45, %v5691_v10  ;;  %v3377_v20 = vsel %vm883_vm1, %v3328_v30, 0.0  ;;  %v4252_v40 = vpop.f32.mrb[26].mxu0 }
 0x22e   : > { %v4112_v62 = vpop.f32.mrb[22].mxu1  ;;  %v4280_v48 = vadd.f32 %v2745_v61, %v1949_v60  ;;  %v3243_v7 = vadd.f32 %v3242_v28, %v3241_v22  ;;  %v2764_v56 = vpop.f32.mrb[27].mxu0  ;;  %v3246_v10 = vsel %vm883_vm1, %v3196_v24, 0.0  ;;  %v3379_v4 = vsel %vm883_vm1, %v3329_v18, 0.0 }
 0x22f   : > { %v1952_v5 = vpop.f32.mrb[23].mxu1  ;;  %v4281_v13 = vadd.f32 %v4248_v25, %v4112_v62  ;;  %v3709_v55 = vpack.c.bf16 %v4279_v11, %v4279_v11  ;;  %v3300_v19 = vmul.f32 %v4279_v11, %v4279_v11  ;;  %v3375_v37 = vsel %vm883_vm1, %v3327_v52, 0.0 }
 0x230   : > { %v3707_v29 = vpack.c.bf16 %v4280_v48, %v4280_v48  ;;  %v3197_v6 = vmul.f32 %v4280_v48, %v5730_v0  ;;  %v3298_v33 = vmul.f32 %v4280_v48, %v4280_v48  ;;  %v3245_v26 = vadd.f32 %v3244_v44, %v3243_v7  ;;  %v3155_v7 = vpop.permute.xlu1 %3154 }
 0x231   : > { %v3376_v3 = vadd.f32 %v3375_v37, %v3374_v51  ;;  %2975 = vst.msk [vmem:[%s5612_s26 + $0x58] sm:$0xf] %vm2952_vm5, %v3709_v55  ;;  %v3199_v23 = vmul.f32 %v4279_v11, %v3130_v31  ;;  %v3710_v15 = vpack.c.bf16 %v4281_v13, %v4281_v13  ;;  %v3332_v53 = vmul.f32 %v3300_v19, %v3130_v31  ;;  %v3150_v51 = vpop.permute.xlu0 %3149 }
 0x232   : > { %2973 = vst.msk [vmem:[%s5612_s26 + $0x50] sm:$0xf] %vm2952_vm5, %v3707_v29  ;;  %v3248_v17 = vsel %vm883_vm1, %v3197_v6, 0.0  ;;  %v3330_v47 = vmul.f32 %v3298_v33, %v5730_v0  ;;  %v3247_v54 = vadd.f32 %v3246_v10, %v3245_v26  ;;  %v3301_v8 = vmul.f32 %v4281_v13, %v4281_v13 }
 0x233   : > { %v3378_v1 = vadd.f32 %v3377_v20, %v3376_v3  ;;  %2976 = vst.msk [vmem:[%s5612_s26 + $0x5c] sm:$0xf] %vm2952_vm5, %v3710_v15  ;;  %v3200_v49 = vmul.f32 %v4281_v13, %v3135_v57  ;;  %v4282_v38 = vadd.f32 %v5743_v12, %v1952_v5  ;;  %v4255_v58 = vpop.f32.mrb[28].mxu0  ;;  %v3252_v24 = vsel %vm883_vm1, %v3199_v23, 0.0 }
 0x234   : > { %v4115_v61 = vpop.f32.mrb[24].mxu1  ;;  %v3381_v35 = vsel %vm883_vm1, %v3330_v47, 0.0  ;;  %v3249_v21 = vadd.f32 %v3248_v17, %v3247_v54  ;;  %v3333_v16 = vmul.f32 %v3301_v8, %v3135_v57  ;;  %v2777_v30 = vpop.f32.mrb[29].mxu0  ;;  %v3385_v18 = vsel %vm883_vm1, %v3332_v53, 0.0 }
 0x235   : > { %v1965_v25 = vpop.f32.mrb[25].mxu1  ;;  %v4283_v63 = vadd.f32 %v4251_v32, %v4115_v61  ;;  %v3380_v0 = vadd.f32 %v3379_v4, %v3378_v1  ;;  %v3708_v9 = vpack.c.bf16 %v4282_v38, %v4282_v38  ;;  %v3198_v22 = vmul.f32 %v4282_v38, %v5732_v46  ;;  %v5781_v41 = vpop.f32.mrb[30].mxu0 }
 0x236   : > { %v4116_v50 = vpop.f32.mrb[26].mxu1  ;;  %v4284_v27 = vadd.f32 %v2761_v39, %v1965_v25  ;;  %v3299_v34 = vmul.f32 %v4282_v38, %v4282_v38  ;;  %v2780_v60 = vpop.f32.mrb[31].mxu0  ;;  %v3254_v11 = vsel %vm883_vm1, %v3200_v49, 0.0  ;;  %v3387_v32 = vsel %vm883_vm1, %v3333_v16, 0.0 }
 0x237   : > { %v3713_v2 = vpack.c.bf16 %v4283_v63, %v4283_v63  ;;  %v1968_v31 = vpop.f32.mrb[27].mxu1  ;;  %v3382_v12 = vadd.f32 %v3381_v35, %v3380_v0  ;;  %v3304_v36 = vmul.f32 %v4283_v63, %v4283_v63  ;;  %2974 = vst.msk [vmem:[%s5612_s26 + $0x54] sm:$0xf] %vm2952_vm5, %v3708_v9  ;;  %v3250_v57 = vsel %vm883_vm1, %v3198_v22, 0.0  ;;  %v3160_v15 = vpop.permute.xlu0 %3159 }
 0x238   : > { %v3331_v42 = vmul.f32 %v3299_v34, %v5732_v46  ;;  %v3711_v14 = vpack.c.bf16 %v4284_v27, %v4284_v27  ;;  %v3201_v45 = vmul.f32 %v4284_v27, %v3140_v43  ;;  %v3251_v62 = vadd.f32 %v3250_v57, %v3249_v21  ;;  %v3165_v21 = vpop.permute.xlu1 %3164 }
 0x239   : > { %2979 = vst.msk [vmem:[%s5612_s26 + $0x68] sm:$0xf] %vm2952_vm5, %v3713_v2  ;;  %v3302_v48 = vmul.f32 %v4284_v27, %v4284_v27  ;;  %v4285_v28 = vadd.f32 %v4252_v40, %v4116_v50  ;;  %v4286_v46 = vadd.f32 %v2764_v56, %v1968_v31  ;;  %v3203_v13 = vmul.f32 %v4283_v63, %v3150_v51 }
 0x23a   : > { %v3383_v44 = vsel %vm883_vm1, %v3331_v42, 0.0  ;;  %2977 = vst.msk [vmem:[%s5612_s26 + $0x60] sm:$0xf] %vm2952_vm5, %v3711_v14  ;;  %v3253_v52 = vadd.f32 %v3252_v24, %v3251_v62  ;;  %v3336_v55 = vmul.f32 %v3304_v36, %v3150_v51  ;;  %v3256_v19 = vsel %vm883_vm1, %v3201_v45, 0.0 }
 0x23b   : > { %v3384_v5 = vadd.f32 %v3383_v44, %v3382_v12  ;;  %v3334_v39 = vmul.f32 %v3302_v48, %v3140_v43  ;;  %v3714_v37 = vpack.c.bf16 %v4285_v28, %v4285_v28  ;;  %v3712_v29 = vpack.c.bf16 %v4286_v46, %v4286_v46  ;;  %v3170_v24 = vpop.permute.xlu0 %3169 }
 0x23c   : > { %v4119_v20 = vpop.f32.mrb[28].mxu1  ;;  %v3255_v10 = vadd.f32 %v3254_v11, %v3253_v52  ;;  %v3305_v4 = vmul.f32 %v4285_v28, %v4285_v28  ;;  %v3202_v40 = vmul.f32 %v4286_v46, %v5773_v59  ;;  %v3204_v3 = vmul.f32 %v4285_v28, %v3155_v7 }
 0x23d   : > { %v1981_v6 = vpop.f32.mrb[29].mxu1  ;;  %v3386_v33 = vadd.f32 %v3385_v18, %v3384_v5  ;;  %v3389_v26 = vsel %vm883_vm1, %v3334_v39, 0.0  ;;  %2980 = vst.msk [vmem:[%s5612_s26 + $0x6c] sm:$0xf] %vm2952_vm5, %v3714_v37  ;;  %2978 = vst.msk [vmem:[%s5612_s26 + $0x64] sm:$0xf] %vm2952_vm5, %v3712_v29  ;;  %v3303_v23 = vmul.f32 %v4286_v46, %v4286_v46  ;;  %v4287_v17 = vadd.f32 %v4255_v58, %v4119_v20 }
 0x23e   : > { %v4120_v56 = vpop.f32.mrb[30].mxu1  ;;  %v3257_v43 = vadd.f32 %v3256_v19, %v3255_v10  ;;  %v3258_v53 = vsel %vm883_vm1, %v3202_v40, 0.0  ;;  %v4288_v54 = vadd.f32 %v2777_v30, %v1981_v6  ;;  %v3260_v8 = vsel %vm883_vm1, %v3203_v13, 0.0 }
 0x23f   : > { %v1984_v47 = vpop.f32.mrb[31].mxu1  ;;  %v3388_v1 = vadd.f32 %v3387_v32, %v3386_v33  ;;  %v3335_v61 = vmul.f32 %v3303_v23, %v5773_v59  ;;  %v3717_v35 = vpack.c.bf16 %v4287_v17, %v4287_v17  ;;  %v3337_v38 = vmul.f32 %v3305_v4, %v3155_v7  ;;  %v3175_v32 = vpop.permute.xlu1 %3174 }
 0x240   : > { %v3259_v25 = vadd.f32 %v3258_v53, %v3257_v43  ;;  %v3715_v63 = vpack.c.bf16 %v4288_v54, %v4288_v54  ;;  %v3393_v0 = vsel %vm883_vm1, %v3336_v55, 0.0  ;;  %v3205_v50 = vmul.f32 %v4288_v54, %v3160_v15 }
 0x241   : > { %v3390_v49 = vadd.f32 %v3389_v26, %v3388_v1  ;;  %v3391_v16 = vsel %vm883_vm1, %v3335_v61, 0.0  ;;  %2983 = vst.msk [vmem:[%s5612_s26 + $0x78] sm:$0xf] %vm2952_vm5, %v3717_v35  ;;  %v3306_v27 = vmul.f32 %v4288_v54, %v4288_v54  ;;  %v3262_v58 = vsel %vm883_vm1, %v3204_v3, 0.0 }
 0x242   : > { %v3261_v9 = vadd.f32 %v3260_v8, %v3259_v25  ;;  %2981 = vst.msk [vmem:[%s5612_s26 + $0x70] sm:$0xf] %vm2952_vm5, %v3715_v63  ;;  %v4289_v59 = vadd.f32 %v5781_v41, %v4120_v56  ;;  %v3308_v34 = vmul.f32 %v4287_v17, %v4287_v17  ;;  %v3264_v2 = vsel %vm883_vm1, %v3205_v50, 0.0 }
 0x243   : > { %v3392_v22 = vadd.f32 %v3391_v16, %v3390_v49  ;;  %v3338_v31 = vmul.f32 %v3306_v27, %v3160_v15  ;;  %v4290_v30 = vadd.f32 %v2780_v60, %v1984_v47  ;;  %v3395_v12 = vsel %vm883_vm1, %v3337_v38, 0.0 }
 0x244   : > { %v3263_v57 = vadd.f32 %v3262_v58, %v3261_v9  ;;  %v3718_v42 = vpack.c.bf16 %v4289_v59, %v4289_v59  ;;  %v3207_v14 = vmul.f32 %v4287_v17, %v3170_v24  ;;  %v3309_v51 = vmul.f32 %v4289_v59, %v4289_v59 }
 0x245   : > { %v3394_v36 = vadd.f32 %v3393_v0, %v3392_v22  ;;  %v3397_v45 = vsel %vm883_vm1, %v3338_v31, 0.0  ;;  %v3716_v18 = vpack.c.bf16 %v4290_v30, %v4290_v30  ;;  %v3206_v62 = vmul.f32 %v4290_v30, %v3165_v21 }
 0x246   : > { %v3265_v11 = vadd.f32 %v3264_v2, %v3263_v57  ;;  %2984 = vst.msk [vmem:[%s5612_s26 + $0x7c] sm:$0xf] %vm2952_vm5, %v3718_v42  ;;  %v3307_v48 = vmul.f32 %v4290_v30, %v4290_v30  ;;  %v3340_v60 = vmul.f32 %v3308_v34, %v3170_v24  ;;  %v3208_v28 = vmul.f32 %v4289_v59, %v3175_v32 }
 0x247   : > { %v3396_v41 = vadd.f32 %v3395_v12, %v3394_v36  ;;  %2982 = vst.msk [vmem:[%s5612_s26 + $0x74] sm:$0xf] %vm2952_vm5, %v3716_v18  ;;  %v3266_v46 = vsel %vm883_vm1, %v3206_v62, 0.0  ;;  %v3268_v13 = vsel %vm883_vm1, %v3207_v14, 0.0  ;;  %v3341_v39 = vmul.f32 %v3309_v51, %v3175_v32 }
 0x248   : > { %v3339_v52 = vmul.f32 %v3307_v48, %v3165_v21  ;;  %v3267_v5 = vadd.f32 %v3266_v46, %v3265_v11  ;;  %v3401_v19 = vsel %vm883_vm1, %v3340_v60, 0.0  ;;  %v3270_v37 = vsel %vm883_vm1, %v3208_v28, 0.0 }
 0x249   : > { %v3398_v44 = vadd.f32 %v3397_v45, %v3396_v41  ;;  %v3403_v33 = vsel %vm883_vm1, %v3341_v39, 0.0 }
 0x24a   : > { %v3399_v20 = vsel %vm883_vm1, %v3339_v52, 0.0  ;;  %v3269_v7 = vadd.f32 %v3268_v13, %v3267_v5 }
 0x24b   : > { %v3400_v55 = vadd.f32 %v3399_v20, %v3398_v44 }
 0x24c   : > { %v3271_v29 = vadd.f32 %v3270_v37, %v3269_v7 }
 0x24d   : > { %v3402_v6 = vadd.f32 %v3401_v19, %v3400_v55 }
 0x24e   : > { %v3272_v10 = vrot.slane %v3271_v29, 4 }
 0x24f   : > { %v3404_v4 = vadd.f32 %v3403_v33, %v3402_v6 }
 0x250   : > { %v3273_v40 = vadd.f32 %v3272_v10, %v3271_v29 }
 0x251   : > { %v3405_v56 = vrot.slane %v3404_v4, 4 }
 0x252   : > { %v3274_v26 = vrot.slane %v3273_v40, 2 }
 0x253   : > { %v3406_v3 = vadd.f32 %v3405_v56, %v3404_v4 }
 0x254   : > { %v3275_v23 = vadd.f32 %v3274_v26, %v3273_v40 }
 0x255   : > { %v3407_v17 = vrot.slane %v3406_v3, 2 }
 0x256   : > { %v3276_v47 = vrot.slane %v3275_v23, 1 }
 0x257   : > { %v3408_v15 = vadd.f32 %v3407_v17, %v3406_v3 }
 0x258   : > { %v3277_v1 = vadd.f32 %v3276_v47, %v3275_v23 }
 0x259   : > { %v3409_v43 = vrot.slane %v3408_v15, 1 }
 0x25b   : > { %v3410_v53 = vadd.f32 %v3409_v43, %v3408_v15 }
 0x25d   : > { %v3411_v54 = vsel %vm530_vm2, %v3277_v1, %v3410_v53 }
 0x25e   : > { %3413 = vst.msk [vmem:[%s292_s28] sm:$0x3] %vm3412_vm6, %v3411_v54 }
 0x25f PF: > { %s18_s24 = sadd.s32 1, %s4547_s24  }
 0x260   : > { %p15_p5 = scmp.ge.s32.totalorder %s18_s24, 4  }
 0x262   :  { %17 = sbr.rel (!%p15_p5) target bundleno = 1 (0x1), region = 86 }

</bundles_post_ra>
